<compile_context>
chip_gen: v6e
topology: v6e:2x2x1
jax: 0.10.0
libtpu: 0.0.40
codegen_flags: <defaults>
</compile_context>

<pallas_src>
import functools
import math

import jax
import jax.numpy as jnp
from jax.experimental import pallas as pl
from jax.experimental.pallas import tpu as pltpu

# ---------------- small-scale hyper-parameters (analogue of ClipvitlModel3) ----------------
B = 2
IMG = 16             # ViT-L/14@336px image 336 -> 16
IN_CH = 3
PATCH = 8            # patch 14 -> 8
GRID_P = IMG // PATCH
N_PATCH = GRID_P * GRID_P
SEQ = N_PATCH + 1    # + class token
WIDTH = 32           # ViT width 1024 -> 32
HEADS = 4
HEAD_DIM = WIDTH // HEADS
LAYERS = 2           # 24 -> 2
VIT_OUT = 32         # CLIP visual projection dim ("dim" = 768) -> 32
H_DIM = 48           # projector hidden (1024) -> 48
EMBED = 64           # projector output ("embed_dim" = 1344) -> 64
PROJ_PAD = 64        # common padded width for the stacked projector slab
N_CLASS = 16         # 1000 -> 16
K_SUB = 3            # sub-centers in ArcMarginProduct_subcenter
ARC_S = 45.0         # ArcFace scale
LN_EPS = 1e-5
CPP = IN_CH * PATCH * PATCH


# ------------------------------ in-kernel math helpers ------------------------------
def _erf(x):
    # Abramowitz & Stegun 7.1.26 rational approximation (|err| < 1.5e-7) so the
    # erf-based nn.GELU() can be evaluated with EUP-supported ops only.
    a1, a2, a3, a4, a5 = 0.254829592, -0.284496736, 1.421413741, -1.453152027, 1.061405429
    pcoef = 0.3275911
    sgn = jnp.where(x >= 0.0, 1.0, -1.0)
    ax = jnp.abs(x)
    t = 1.0 / (1.0 + pcoef * ax)
    poly = ((((a5 * t + a4) * t + a3) * t + a2) * t + a1) * t
    return sgn * (1.0 - poly * jnp.exp(-ax * ax))


def _gelu_erf(y):            # nn.GELU() (erf based)
    return 0.5 * y * (1.0 + _erf(y * (1.0 / math.sqrt(2.0))))


def _quickgelu(y):           # CLIP QuickGELU: x * sigmoid(1.702 x)
    return y * jax.nn.sigmoid(1.702 * y)


def _layer_norm(x, gb, eps=LN_EPS):
    g = gb[0:1, :]
    b = gb[1:2, :]
    mean = jnp.mean(x, axis=-1, keepdims=True)
    xc = x - mean
    var = jnp.mean(xc * xc, axis=-1, keepdims=True)
    return xc * jax.lax.rsqrt(var + eps) * g + b


# ------------------------------ fused kernel ------------------------------
def _fused_kernel(xp_ref, conv_w_ref, pos_cls_ref, ln_pre_ref,
                  lns_ref, qkv_w_ref, qkv_b_ref, outw_ref, out_b_ref,
                  fc1_w_ref, fc1_b_ref, fc2_w_ref, fc2_b_ref,
                  ln_post_ref, vproj_ref, proj_w_ref, proj_b_ref,
                  head_w_ref, mparams_ref, labels_ref,
                  out_ref, *, use_margin, batch_per_step):
    f32 = jnp.float32
    scale = HEAD_DIM ** -0.5

    for bi in range(batch_per_step):
        b_glob = pl.program_id(0) * batch_per_step + bi

        # ---- patch embedding: Conv2d(stride=patch, bias=False) as one matmul.
        # Row 0 of xp is a zero row (class token slot), so row 0 of `patch` is 0
        # and pos_cls row 0 already carries class_embedding + pos_embedding[0].
        xp = xp_ref[bi]                                                     # [SEQ, CPP]
        h = jnp.dot(xp, conv_w_ref[...], preferred_element_type=f32) + pos_cls_ref[...]
        h = _layer_norm(h, ln_pre_ref[...])                                 # [SEQ, W]

        for l in range(LAYERS):
            # ---- multi-head self-attention: per-head weight slabs, per-head
            # output-projection accumulation (no lane slicing, no head concat).
            y = _layer_norm(h, lns_ref[2 * l])
            attn = None
            for hh in range(HEADS):
                q_i = (l * 3 + 0) * HEADS + hh
                k_i = (l * 3 + 1) * HEADS + hh
                v_i = (l * 3 + 2) * HEADS + hh
                qh = jnp.dot(y, qkv_w_ref[q_i], preferred_element_type=f32) + qkv_b_ref[q_i]
                kh = jnp.dot(y, qkv_w_ref[k_i], preferred_element_type=f32) + qkv_b_ref[k_i]
                vh = jnp.dot(y, qkv_w_ref[v_i], preferred_element_type=f32) + qkv_b_ref[v_i]
                s = jax.lax.dot_general(qh, kh, (((1,), (1,)), ((), ())),
                                        preferred_element_type=f32) * scale  # [SEQ, SEQ]
                s = s - jnp.max(s, axis=-1, keepdims=True)
                e = jnp.exp(s)
                p_attn = e * pl.reciprocal(jnp.sum(e, axis=-1, keepdims=True), approx=True)
                hv = jnp.dot(p_attn, vh, preferred_element_type=f32)         # [SEQ, Dh]
                contrib = jnp.dot(hv, outw_ref[l * HEADS + hh],
                                  preferred_element_type=f32)                # [SEQ, W]
                attn = contrib if attn is None else attn + contrib
            h = h + attn + out_b_ref[l]

            # ---- MLP (QuickGELU, as in CLIP) ----
            y = _layer_norm(h, lns_ref[2 * l + 1])
            y = _quickgelu(jnp.dot(y, fc1_w_ref[l], preferred_element_type=f32) + fc1_b_ref[l])
            y = jnp.dot(y, fc2_w_ref[l], preferred_element_type=f32) + fc2_b_ref[l]
            h = h + y

        # ---- ln_post on the class token + visual projection (output padded to PROJ_PAD) ----
        cls_tok = _layer_norm(h[0:1, :], ln_post_ref[...])                   # [1, W]
        feat = jnp.dot(cls_tok, vproj_ref[...], preferred_element_type=f32)  # [1, PROJ_PAD]

        # ---- projector: 5 padded [PROJ_PAD, PROJ_PAD] layers, (Linear, GELU) x4 + Linear ----
        for i in range(5):
            feat = jnp.dot(feat, proj_w_ref[i], preferred_element_type=f32) + proj_b_ref[i]
            if i < 4:
                feat = _gelu_erf(feat)                                       # [1, PROJ_PAD(=EMBED)]

        # ---- ArcMarginProduct_subcenter: normalize feature; head weights were
        # pre-normalized + pre-transposed to [K_SUB, EMBED, N_CLASS] at init.
        fn = feat * jax.lax.rsqrt(jnp.maximum(jnp.sum(feat * feat, axis=-1, keepdims=True), 1e-24))
        cosine = jnp.dot(fn, head_w_ref[0], preferred_element_type=f32)      # [1, N_CLASS]
        for s_i in range(1, K_SUB):
            cosine = jnp.maximum(cosine,
                                 jnp.dot(fn, head_w_ref[s_i], preferred_element_type=f32))

        # ---- ArcFaceAdaptiveMargin margin (SMEM scalars; one-hot from iota) ----
        if use_margin:
            cos_m = mparams_ref[b_glob, 0]
            sin_m = mparams_ref[b_glob, 1]
            th = mparams_ref[b_glob, 2]
            mm = mparams_ref[b_glob, 3]
            lbl = labels_ref[b_glob]
            oh = (jax.lax.broadcasted_iota(jnp.int32, (1, N_CLASS), 1) == lbl).astype(f32)
            # clamp 1-cos^2 at 0 so float rounding (|cos| = 1+eps) cannot produce NaN
            sine = jnp.sqrt(jnp.maximum(1.0 - cosine * cosine, 0.0))
            phi = cosine * cos_m - sine * sin_m
            phi = jnp.where(cosine > th, phi, cosine - mm)
            out = oh * phi + (1.0 - oh) * cosine
        else:
            out = cosine
        out_ref[bi] = out * ARC_S


# ------------------------------ device heuristics ------------------------------
@functools.lru_cache(maxsize=1)
def _single_tensorcore_chip():
    # v5e / v6e have a single TensorCore -> fuse the batch into one grid step.
    # v7x (and v4/v5p) keep grid=(B,) "parallel" so the megacore splits the batch.
    try:
        kind = jax.devices()[0].device_kind.lower()
    except Exception:
        return False
    return any(t in kind for t in ("v5 lite", "v5e", "v5litepod", "v6 lite", "v6e"))


# ------------------------------ forward wrapper ------------------------------
def clipvitl_model3_forward(x, labels, params, split="train"):
    Bn = x.shape[0]
    # patchify NCHW -> [B, N_PATCH, C*p*p]; pixel order (c, ph, pw) matches Conv2d weight layout
    xp = x.reshape(Bn, IN_CH, GRID_P, PATCH, GRID_P, PATCH)
    xp = xp.transpose(0, 2, 4, 1, 3, 5).reshape(Bn, N_PATCH, CPP)
    # prepend a zero row (class-token slot) so no concat is needed inside the kernel
    xp = jnp.concatenate([jnp.zeros((Bn, 1, CPP), xp.dtype), xp], axis=1)    # [B, SEQ, CPP]

    use_margin = (split != "val")
    if use_margin:
        ms = params["margins"][labels].astype(jnp.float32)
        mparams = jnp.stack(
            [jnp.cos(ms), jnp.sin(ms), jnp.cos(math.pi - ms), jnp.sin(math.pi - ms) * ms],
            axis=-1)                                                          # [B, 4]
        lab = labels.astype(jnp.int32)
    else:
        mparams = jnp.zeros((Bn, 4), jnp.float32)
        lab = jnp.zeros((Bn,), jnp.int32)

    fuse_batch = _single_tensorcore_chip()
    bps = Bn if fuse_batch else 1            # samples handled per grid step
    grid = (Bn // bps,)

    weight_names = ["conv_w_mat", "pos_cls", "ln_pre",
                    "lns", "qkv_w", "qkv_b", "outw_h", "out_b",
                    "fc1_w", "fc1_b", "fc2_w", "fc2_b",
                    "ln_post", "vproj_pad", "proj_w", "proj_b", "head_w_nrm"]
    weights = [params[n] for n in weight_names]

    def _batch_spec(rest_shape):
        nd = len(rest_shape)
        return pl.BlockSpec((bps,) + tuple(rest_shape),
                            lambda g, _nd=nd: (g,) + (0,) * _nd)

    def _const_spec(shape):
        nd = len(shape)
        return pl.BlockSpec(tuple(shape), lambda g, _nd=nd: (0,) * _nd)

    smem_spec = pl.BlockSpec(memory_space=pltpu.MemorySpace.SMEM)

    in_specs = ([_batch_spec(xp.shape[1:])]
                + [_const_spec(w.shape) for w in weights]
                + [smem_spec, smem_spec])

    out = pl.pallas_call(
        functools.partial(_fused_kernel, use_margin=use_margin, batch_per_step=bps),
        grid=grid,
        in_specs=in_specs,
        out_specs=_batch_spec((1, N_CLASS)),
        out_shape=jax.ShapeDtypeStruct((Bn, 1, N_CLASS), jnp.float32),
        compiler_params=pltpu.CompilerParams(dimension_semantics=("parallel",)),
    )(xp, *weights, mparams, lab)
    return out.reshape(Bn, N_CLASS)


# ------------------------------ deterministic parameter init ------------------------------
def make_margins(n_class):
    # TODO(synk): original reads per-class counts from '../split_path/train_split_reduce.txt';
    # synthesize deterministic counts instead and apply the same margin formula.
    num_per_class = (jnp.arange(n_class, dtype=jnp.float32) * 37.0) % 101.0 + 1.0
    m = num_per_class ** (-0.25)
    m = (m - m.min()) / (m.max() - m.min()) * 0.45 + 0.07
    return m.astype(jnp.float32)


def init_params(key):
    keys = iter(jax.random.split(key, 64))

    def nrm(shape, scale=0.02):
        return (scale * jax.random.normal(next(keys), shape)).astype(jnp.float32)

    def ln_gb():
        return jnp.stack([jnp.ones((WIDTH,), jnp.float32), jnp.zeros((WIDTH,), jnp.float32)])

    p = {}
    conv_w = nrm((WIDTH, IN_CH, PATCH, PATCH))                          # Conv2d weight [out,in,kh,kw]
    p["conv_w_mat"] = conv_w.reshape(WIDTH, CPP).T                      # [C*p*p, W]
    class_emb = nrm((WIDTH,))
    pos_emb = nrm((SEQ, WIDTH))
    p["pos_cls"] = pos_emb.at[0].add(class_emb)                         # class token folded into row 0
    p["ln_pre"] = ln_gb()

    lns, qkv_w, qkv_b, outw_h, out_b = [], [], [], [], []
    fc1_w, fc1_b, fc2_w, fc2_b = [], [], [], []
    for _ in range(LAYERS):
        lns.append(ln_gb())                                             # ln_1
        lns.append(ln_gb())                                             # ln_2 (appended right after, index 2l+1 fixed below)
        in_w_t = nrm((3 * WIDTH, WIDTH)).T                              # in_proj weight, pre-transposed -> [W, 3W]
        in_b = nrm((3 * WIDTH,))
        for part in range(3):                                           # q, k, v
            for hh in range(HEADS):
                c0 = part * WIDTH + hh * HEAD_DIM
                qkv_w.append(in_w_t[:, c0:c0 + HEAD_DIM])               # [W, Dh]
                qkv_b.append(in_b[c0:c0 + HEAD_DIM].reshape(1, HEAD_DIM))
        ow_t = nrm((WIDTH, WIDTH)).T                                    # out_proj weight, pre-transposed -> [W(in), W(out)]
        for hh in range(HEADS):
            outw_h.append(ow_t[hh * HEAD_DIM:(hh + 1) * HEAD_DIM, :])   # [Dh, W]
        out_b.append(nrm((WIDTH,)).reshape(1, WIDTH))
        fc1_w.append(nrm((4 * WIDTH, WIDTH)).T)
        fc1_b.append(nrm((4 * WIDTH,)).reshape(1, 4 * WIDTH))
        fc2_w.append(nrm((WIDTH, 4 * WIDTH)).T)
        fc2_b.append(nrm((WIDTH,)).reshape(1, WIDTH))

    # note: lns was appended as [ln1_0, ln2_0, ln1_1, ln2_1, ...] which is exactly
    # index 2l (ln_1) / 2l+1 (ln_2) used by the kernel.
    p["lns"] = jnp.stack(lns)                                           # [2*LAYERS, 2, W]
    p["qkv_w"] = jnp.stack(qkv_w)                                       # [LAYERS*3*HEADS, W, Dh]
    p["qkv_b"] = jnp.stack(qkv_b)                                       # [LAYERS*3*HEADS, 1, Dh]
    p["outw_h"] = jnp.stack(outw_h)                                     # [LAYERS*HEADS, Dh, W]
    p["out_b"] = jnp.stack(out_b)                                       # [LAYERS, 1, W]
    p["fc1_w"], p["fc1_b"] = jnp.stack(fc1_w), jnp.stack(fc1_b)
    p["fc2_w"], p["fc2_b"] = jnp.stack(fc2_w), jnp.stack(fc2_b)

    p["ln_post"] = ln_gb()
    vproj = nrm((WIDTH, VIT_OUT))                                       # already [in, out]
    p["vproj_pad"] = jnp.pad(vproj, ((0, 0), (0, PROJ_PAD - VIT_OUT)))  # [W, PROJ_PAD]

    # projector packed into a single zero-padded slab [5, PROJ_PAD, PROJ_PAD]
    proj_dims = [(H_DIM, VIT_OUT), (H_DIM, H_DIM), (H_DIM, H_DIM), (EMBED, H_DIM), (EMBED, EMBED)]
    pw, pb = [], []
    for (o, n) in proj_dims:                                            # PyTorch layout [out, in]
        w = nrm((o, n)).T                                               # pre-transposed -> [in, out]
        b = nrm((o,)).reshape(1, o)
        pw.append(jnp.pad(w, ((0, PROJ_PAD - n), (0, PROJ_PAD - o))))
        pb.append(jnp.pad(b, ((0, 0), (0, PROJ_PAD - o))))
    p["proj_w"] = jnp.stack(pw)                                         # [5, PROJ_PAD, PROJ_PAD]
    p["proj_b"] = jnp.stack(pb)                                         # [5, 1, PROJ_PAD]

    # ArcMarginProduct_subcenter weight: uniform(-stdv, stdv), stdv = 1/sqrt(in_features),
    # rows ordered (class*k + sub). Pre-normalized (F.normalize over in_features) and
    # pre-transposed to [K_SUB, EMBED, N_CLASS] so the kernel does leading-axis matmuls.
    stdv = 1.0 / math.sqrt(EMBED)
    head_w = jax.random.uniform(next(keys), (N_CLASS * K_SUB, EMBED),
                                minval=-stdv, maxval=stdv, dtype=jnp.float32)
    head_wn = head_w / jnp.maximum(
        jnp.sqrt(jnp.sum(head_w * head_w, axis=-1, keepdims=True)), 1e-12)
    p["head_w_nrm"] = head_wn.reshape(N_CLASS, K_SUB, EMBED).transpose(1, 2, 0)  # [K_SUB, E, N_CLASS]
    p["margins"] = make_margins(N_CLASS)
    return p


if __name__ == "__main__":
    key = jax.random.PRNGKey(0)
    pkey, xkey, lkey = jax.random.split(key, 3)
    params = init_params(pkey)
    x = jax.random.normal(xkey, (B, IN_CH, IMG, IMG), dtype=jnp.float32)   # NCHW
    labels = jax.random.randint(lkey, (B,), 0, N_CLASS)

    forward = jax.jit(clipvitl_model3_forward, static_argnames=("split",))
    out = forward(x, labels, params, split="train")
    out = jax.block_until_ready(out)
    assert out.shape == (B, N_CLASS) and out.dtype == jnp.float32
    assert bool(jnp.all(jnp.isfinite(out)))
    print("KERNEL_OK")
</pallas_src>

<mosaic_0001>
module attributes {stable_mosaic.version = 11 : i64} {
  func.func @_fused_kernel(%arg0: i32, %arg1: memref<1x5x192xf32, #tpu.memory_space<vmem>>, %arg2: memref<192x32xf32, #tpu.memory_space<vmem>>, %arg3: memref<5x32xf32, #tpu.memory_space<vmem>>, %arg4: memref<2x32xf32, #tpu.memory_space<vmem>>, %arg5: memref<4x2x32xf32, #tpu.memory_space<vmem>>, %arg6: memref<24x32x8xf32, #tpu.memory_space<vmem>>, %arg7: memref<24x1x8xf32, #tpu.memory_space<vmem>>, %arg8: memref<8x8x32xf32, #tpu.memory_space<vmem>>, %arg9: memref<2x1x32xf32, #tpu.memory_space<vmem>>, %arg10: memref<2x32x128xf32, #tpu.memory_space<vmem>>, %arg11: memref<2x1x128xf32, #tpu.memory_space<vmem>>, %arg12: memref<2x128x32xf32, #tpu.memory_space<vmem>>, %arg13: memref<2x1x32xf32, #tpu.memory_space<vmem>>, %arg14: memref<2x32xf32, #tpu.memory_space<vmem>>, %arg15: memref<32x64xf32, #tpu.memory_space<vmem>>, %arg16: memref<5x64x64xf32, #tpu.memory_space<vmem>>, %arg17: memref<5x1x64xf32, #tpu.memory_space<vmem>>, %arg18: memref<3x64x16xf32, #tpu.memory_space<vmem>>, %arg19: memref<2x4xf32, #tpu.memory_space<smem>>, %arg20: memref<2xi32, #tpu.memory_space<smem>>, %arg21: memref<1x1x16xf32, #tpu.memory_space<vmem>>) attributes {dimension_semantics = [#tpu.dimension_semantics<parallel>], iteration_bounds = array<i64: 2>, scalar_prefetch = 0 : i64, scratch_operands = 0 : i64, tpu.core_type = #tpu.core_type<tc>, window_params = [{transform_indices = @transform_0, window_bounds = array<i64: 1, 5, 192>}, {pipeline_mode = #tpu.pipeline_mode<synchronous>, transform_indices = @transform_1, window_bounds = array<i64: 192, 32>}, {pipeline_mode = #tpu.pipeline_mode<synchronous>, transform_indices = @transform_2, window_bounds = array<i64: 5, 32>}, {pipeline_mode = #tpu.pipeline_mode<synchronous>, transform_indices = @transform_3, window_bounds = array<i64: 2, 32>}, {pipeline_mode = #tpu.pipeline_mode<synchronous>, transform_indices = @transform_4, window_bounds = array<i64: 4, 2, 32>}, {pipeline_mode = #tpu.pipeline_mode<synchronous>, transform_indices = @transform_5, window_bounds = array<i64: 24, 32, 8>}, {pipeline_mode = #tpu.pipeline_mode<synchronous>, transform_indices = @transform_6, window_bounds = array<i64: 24, 1, 8>}, {pipeline_mode = #tpu.pipeline_mode<synchronous>, transform_indices = @transform_7, window_bounds = array<i64: 8, 8, 32>}, {pipeline_mode = #tpu.pipeline_mode<synchronous>, transform_indices = @transform_8, window_bounds = array<i64: 2, 1, 32>}, {pipeline_mode = #tpu.pipeline_mode<synchronous>, transform_indices = @transform_9, window_bounds = array<i64: 2, 32, 128>}, {pipeline_mode = #tpu.pipeline_mode<synchronous>, transform_indices = @transform_10, window_bounds = array<i64: 2, 1, 128>}, {pipeline_mode = #tpu.pipeline_mode<synchronous>, transform_indices = @transform_11, window_bounds = array<i64: 2, 128, 32>}, {pipeline_mode = #tpu.pipeline_mode<synchronous>, transform_indices = @transform_12, window_bounds = array<i64: 2, 1, 32>}, {pipeline_mode = #tpu.pipeline_mode<synchronous>, transform_indices = @transform_13, window_bounds = array<i64: 2, 32>}, {pipeline_mode = #tpu.pipeline_mode<synchronous>, transform_indices = @transform_14, window_bounds = array<i64: 32, 64>}, {pipeline_mode = #tpu.pipeline_mode<synchronous>, transform_indices = @transform_15, window_bounds = array<i64: 5, 64, 64>}, {pipeline_mode = #tpu.pipeline_mode<synchronous>, transform_indices = @transform_16, window_bounds = array<i64: 5, 1, 64>}, {pipeline_mode = #tpu.pipeline_mode<synchronous>, transform_indices = @transform_17, window_bounds = array<i64: 3, 64, 16>}, {transform_indices = @transform_18, window_bounds = array<i64: 2, 4>}, {transform_indices = @transform_19, window_bounds = array<i64: 2>}, {transform_indices = @transform_20, window_bounds = array<i64: 1, 1, 16>}]} {
    %c1_i32 = arith.constant 1 : i32
    %0 = arith.muli %arg0, %c1_i32 : i32
    %c0_i32 = arith.constant 0 : i32
    %1 = arith.addi %0, %c0_i32 : i32
    %c0 = arith.constant 0 : index
    %c0_0 = arith.constant 0 : index
    %c0_1 = arith.constant 0 : index
    %2 = vector.load %arg1[%c0, %c0_0, %c0_1] : memref<1x5x192xf32, #tpu.memory_space<vmem>>, vector<1x5x192xf32>
    %3 = vector.shape_cast %2 : vector<1x5x192xf32> to vector<5x192xf32>
    %c0_2 = arith.constant 0 : index
    %c0_3 = arith.constant 0 : index
    %4 = vector.load %arg2[%c0_2, %c0_3] : memref<192x32xf32, #tpu.memory_space<vmem>>, vector<192x32xf32>
    %cst = arith.constant dense<0.000000e+00> : vector<5x32xf32>
    %5 = tpu.matmul %3, %4, %cst {dimension_numbers = #tpu.dot_dimension_numbers<[1], [0], [0], [1], [0, 0, 1, 1], [], []>} : vector<5x192xf32>, vector<192x32xf32>, vector<5x32xf32> -> vector<5x32xf32>
    %c0_4 = arith.constant 0 : index
    %c0_5 = arith.constant 0 : index
    %6 = vector.load %arg3[%c0_4, %c0_5] : memref<5x32xf32, #tpu.memory_space<vmem>>, vector<5x32xf32>
    %7 = arith.addf %5, %6 : vector<5x32xf32>
    %c0_6 = arith.constant 0 : index
    %c0_7 = arith.constant 0 : index
    %8 = vector.load %arg4[%c0_6, %c0_7] : memref<2x32xf32, #tpu.memory_space<vmem>>, vector<2x32xf32>
    %9 = vector.extract_strided_slice %8 {offsets = [0, 0], sizes = [1, 32], strides = [1, 1]} : vector<2x32xf32> to vector<1x32xf32>
    %10 = vector.extract_strided_slice %8 {offsets = [1, 0], sizes = [1, 32], strides = [1, 1]} : vector<2x32xf32> to vector<1x32xf32>
    %cst_8 = arith.constant dense<0.000000e+00> : vector<5xf32>
    %11 = vector.multi_reduction <add>, %7, %cst_8 [1] : vector<5x32xf32> to vector<5xf32>
    %12 = vector.shape_cast %11 : vector<5xf32> to vector<5x1xf32>
    %cst_9 = arith.constant 3.200000e+01 : f32
    %13 = vector.broadcast %cst_9 : f32 to vector<5x1xf32>
    %14 = arith.divf %12, %13 : vector<5x1xf32>
    %15 = vector.broadcast %14 : vector<5x1xf32> to vector<5x32xf32>
    %16 = arith.subf %7, %15 : vector<5x32xf32>
    %17 = arith.mulf %16, %16 : vector<5x32xf32>
    %cst_10 = arith.constant dense<0.000000e+00> : vector<5xf32>
    %18 = vector.multi_reduction <add>, %17, %cst_10 [1] : vector<5x32xf32> to vector<5xf32>
    %19 = vector.shape_cast %18 : vector<5xf32> to vector<5x1xf32>
    %cst_11 = arith.constant 3.200000e+01 : f32
    %20 = vector.broadcast %cst_11 : f32 to vector<5x1xf32>
    %21 = arith.divf %19, %20 : vector<5x1xf32>
    %cst_12 = arith.constant 9.99999974E-6 : f32
    %22 = vector.broadcast %cst_12 : f32 to vector<5x1xf32>
    %23 = arith.addf %21, %22 : vector<5x1xf32>
    %24 = math.rsqrt %23 : vector<5x1xf32>
    %25 = vector.broadcast %24 : vector<5x1xf32> to vector<5x32xf32>
    %26 = arith.mulf %16, %25 : vector<5x32xf32>
    %27 = vector.broadcast %9 : vector<1x32xf32> to vector<5x32xf32>
    %28 = arith.mulf %26, %27 : vector<5x32xf32>
    %29 = vector.broadcast %10 : vector<1x32xf32> to vector<5x32xf32>
    %30 = arith.addf %28, %29 : vector<5x32xf32>
    %c0_13 = arith.constant 0 : index
    %c0_14 = arith.constant 0 : index
    %c0_15 = arith.constant 0 : index
    %31 = vector.load %arg5[%c0_13, %c0_14, %c0_15] : memref<4x2x32xf32, #tpu.memory_space<vmem>>, vector<1x2x32xf32>
    %32 = vector.shape_cast %31 : vector<1x2x32xf32> to vector<2x32xf32>
    %33 = vector.extract_strided_slice %32 {offsets = [0, 0], sizes = [1, 32], strides = [1, 1]} : vector<2x32xf32> to vector<1x32xf32>
    %34 = vector.extract_strided_slice %32 {offsets = [1, 0], sizes = [1, 32], strides = [1, 1]} : vector<2x32xf32> to vector<1x32xf32>
    %cst_16 = arith.constant dense<0.000000e+00> : vector<5xf32>
    %35 = vector.multi_reduction <add>, %30, %cst_16 [1] : vector<5x32xf32> to vector<5xf32>
    %36 = vector.shape_cast %35 : vector<5xf32> to vector<5x1xf32>
    %cst_17 = arith.constant 3.200000e+01 : f32
    %37 = vector.broadcast %cst_17 : f32 to vector<5x1xf32>
    %38 = arith.divf %36, %37 : vector<5x1xf32>
    %39 = vector.broadcast %38 : vector<5x1xf32> to vector<5x32xf32>
    %40 = arith.subf %30, %39 : vector<5x32xf32>
    %41 = arith.mulf %40, %40 : vector<5x32xf32>
    %cst_18 = arith.constant dense<0.000000e+00> : vector<5xf32>
    %42 = vector.multi_reduction <add>, %41, %cst_18 [1] : vector<5x32xf32> to vector<5xf32>
    %43 = vector.shape_cast %42 : vector<5xf32> to vector<5x1xf32>
    %cst_19 = arith.constant 3.200000e+01 : f32
    %44 = vector.broadcast %cst_19 : f32 to vector<5x1xf32>
    %45 = arith.divf %43, %44 : vector<5x1xf32>
    %cst_20 = arith.constant 9.99999974E-6 : f32
    %46 = vector.broadcast %cst_20 : f32 to vector<5x1xf32>
    %47 = arith.addf %45, %46 : vector<5x1xf32>
    %48 = math.rsqrt %47 : vector<5x1xf32>
    %49 = vector.broadcast %48 : vector<5x1xf32> to vector<5x32xf32>
    %50 = arith.mulf %40, %49 : vector<5x32xf32>
    %51 = vector.broadcast %33 : vector<1x32xf32> to vector<5x32xf32>
    %52 = arith.mulf %50, %51 : vector<5x32xf32>
    %53 = vector.broadcast %34 : vector<1x32xf32> to vector<5x32xf32>
    %54 = arith.addf %52, %53 : vector<5x32xf32>
    %c0_21 = arith.constant 0 : index
    %c0_22 = arith.constant 0 : index
    %c0_23 = arith.constant 0 : index
    %55 = vector.load %arg6[%c0_21, %c0_22, %c0_23] : memref<24x32x8xf32, #tpu.memory_space<vmem>>, vector<1x32x8xf32>
    %56 = vector.shape_cast %55 : vector<1x32x8xf32> to vector<32x8xf32>
    %cst_24 = arith.constant dense<0.000000e+00> : vector<5x8xf32>
    %57 = tpu.matmul %54, %56, %cst_24 {dimension_numbers = #tpu.dot_dimension_numbers<[1], [0], [0], [1], [0, 0, 1, 1], [], []>} : vector<5x32xf32>, vector<32x8xf32>, vector<5x8xf32> -> vector<5x8xf32>
    %c0_25 = arith.constant 0 : index
    %c0_26 = arith.constant 0 : index
    %c0_27 = arith.constant 0 : index
    %58 = vector.load %arg7[%c0_25, %c0_26, %c0_27] : memref<24x1x8xf32, #tpu.memory_space<vmem>>, vector<1x1x8xf32>
    %59 = vector.shape_cast %58 : vector<1x1x8xf32> to vector<1x8xf32>
    %60 = vector.broadcast %59 : vector<1x8xf32> to vector<5x8xf32>
    %61 = arith.addf %57, %60 : vector<5x8xf32>
    %c4 = arith.constant 4 : index
    %c0_28 = arith.constant 0 : index
    %c0_29 = arith.constant 0 : index
    %62 = vector.load %arg6[%c4, %c0_28, %c0_29] : memref<24x32x8xf32, #tpu.memory_space<vmem>>, vector<1x32x8xf32>
    %63 = vector.shape_cast %62 : vector<1x32x8xf32> to vector<32x8xf32>
    %cst_30 = arith.constant dense<0.000000e+00> : vector<5x8xf32>
    %64 = tpu.matmul %54, %63, %cst_30 {dimension_numbers = #tpu.dot_dimension_numbers<[1], [0], [0], [1], [0, 0, 1, 1], [], []>} : vector<5x32xf32>, vector<32x8xf32>, vector<5x8xf32> -> vector<5x8xf32>
    %c4_31 = arith.constant 4 : index
    %c0_32 = arith.constant 0 : index
    %c0_33 = arith.constant 0 : index
    %65 = vector.load %arg7[%c4_31, %c0_32, %c0_33] : memref<24x1x8xf32, #tpu.memory_space<vmem>>, vector<1x1x8xf32>
    %66 = vector.shape_cast %65 : vector<1x1x8xf32> to vector<1x8xf32>
    %67 = vector.broadcast %66 : vector<1x8xf32> to vector<5x8xf32>
    %68 = arith.addf %64, %67 : vector<5x8xf32>
    %c8 = arith.constant 8 : index
    %c0_34 = arith.constant 0 : index
    %c0_35 = arith.constant 0 : index
    %69 = vector.load %arg6[%c8, %c0_34, %c0_35] : memref<24x32x8xf32, #tpu.memory_space<vmem>>, vector<1x32x8xf32>
    %70 = vector.shape_cast %69 : vector<1x32x8xf32> to vector<32x8xf32>
    %cst_36 = arith.constant dense<0.000000e+00> : vector<5x8xf32>
    %71 = tpu.matmul %54, %70, %cst_36 {dimension_numbers = #tpu.dot_dimension_numbers<[1], [0], [0], [1], [0, 0, 1, 1], [], []>} : vector<5x32xf32>, vector<32x8xf32>, vector<5x8xf32> -> vector<5x8xf32>
    %c8_37 = arith.constant 8 : index
    %c0_38 = arith.constant 0 : index
    %c0_39 = arith.constant 0 : index
    %72 = vector.load %arg7[%c8_37, %c0_38, %c0_39] : memref<24x1x8xf32, #tpu.memory_space<vmem>>, vector<1x1x8xf32>
    %73 = vector.shape_cast %72 : vector<1x1x8xf32> to vector<1x8xf32>
    %74 = vector.broadcast %73 : vector<1x8xf32> to vector<5x8xf32>
    %75 = arith.addf %71, %74 : vector<5x8xf32>
    %cst_40 = arith.constant dense<0.000000e+00> : vector<5x5xf32>
    %76 = tpu.matmul %61, %68, %cst_40 {dimension_numbers = #tpu.dot_dimension_numbers<[1], [1], [0], [0], [0, 0, 1, 0], [], []>} : vector<5x8xf32>, vector<5x8xf32>, vector<5x5xf32> -> vector<5x5xf32>
    %cst_41 = arith.constant 0.353553385 : f32
    %77 = vector.broadcast %cst_41 : f32 to vector<5x5xf32>
    %78 = arith.mulf %76, %77 : vector<5x5xf32>
    %cst_42 = arith.constant dense<0xFF800000> : vector<5xf32>
    %79 = vector.multi_reduction <maximumf>, %78, %cst_42 [1] : vector<5x5xf32> to vector<5xf32>
    %80 = vector.shape_cast %79 : vector<5xf32> to vector<5x1xf32>
    %81 = vector.broadcast %80 : vector<5x1xf32> to vector<5x5xf32>
    %82 = arith.subf %78, %81 : vector<5x5xf32>
    %83 = math.exp %82 : vector<5x5xf32>
    %cst_43 = arith.constant dense<0.000000e+00> : vector<5xf32>
    %84 = vector.multi_reduction <add>, %83, %cst_43 [1] : vector<5x5xf32> to vector<5xf32>
    %85 = vector.shape_cast %84 : vector<5xf32> to vector<5x1xf32>
    %86 = tpu.reciprocal %85 {approx = true} : vector<5x1xf32> -> vector<5x1xf32>
    %87 = vector.broadcast %86 : vector<5x1xf32> to vector<5x5xf32>
    %88 = arith.mulf %83, %87 : vector<5x5xf32>
    %cst_44 = arith.constant dense<0.000000e+00> : vector<5x8xf32>
    %89 = tpu.matmul %88, %75, %cst_44 {dimension_numbers = #tpu.dot_dimension_numbers<[1], [0], [0], [1], [0, 0, 1, 1], [], []>} : vector<5x5xf32>, vector<5x8xf32>, vector<5x8xf32> -> vector<5x8xf32>
    %c0_45 = arith.constant 0 : index
    %c0_46 = arith.constant 0 : index
    %c0_47 = arith.constant 0 : index
    %90 = vector.load %arg8[%c0_45, %c0_46, %c0_47] : memref<8x8x32xf32, #tpu.memory_space<vmem>>, vector<1x8x32xf32>
    %91 = vector.shape_cast %90 : vector<1x8x32xf32> to vector<8x32xf32>
    %cst_48 = arith.constant dense<0.000000e+00> : vector<5x32xf32>
    %92 = tpu.matmul %89, %91, %cst_48 {dimension_numbers = #tpu.dot_dimension_numbers<[1], [0], [0], [1], [0, 0, 1, 1], [], []>} : vector<5x8xf32>, vector<8x32xf32>, vector<5x32xf32> -> vector<5x32xf32>
    %c1 = arith.constant 1 : index
    %c0_49 = arith.constant 0 : index
    %c0_50 = arith.constant 0 : index
    %93 = vector.load %arg6[%c1, %c0_49, %c0_50] : memref<24x32x8xf32, #tpu.memory_space<vmem>>, vector<1x32x8xf32>
    %94 = vector.shape_cast %93 : vector<1x32x8xf32> to vector<32x8xf32>
    %cst_51 = arith.constant dense<0.000000e+00> : vector<5x8xf32>
    %95 = tpu.matmul %54, %94, %cst_51 {dimension_numbers = #tpu.dot_dimension_numbers<[1], [0], [0], [1], [0, 0, 1, 1], [], []>} : vector<5x32xf32>, vector<32x8xf32>, vector<5x8xf32> -> vector<5x8xf32>
    %c1_52 = arith.constant 1 : index
    %c0_53 = arith.constant 0 : index
    %c0_54 = arith.constant 0 : index
    %96 = vector.load %arg7[%c1_52, %c0_53, %c0_54] : memref<24x1x8xf32, #tpu.memory_space<vmem>>, vector<1x1x8xf32>
    %97 = vector.shape_cast %96 : vector<1x1x8xf32> to vector<1x8xf32>
    %98 = vector.broadcast %97 : vector<1x8xf32> to vector<5x8xf32>
    %99 = arith.addf %95, %98 : vector<5x8xf32>
    %c5 = arith.constant 5 : index
    %c0_55 = arith.constant 0 : index
    %c0_56 = arith.constant 0 : index
    %100 = vector.load %arg6[%c5, %c0_55, %c0_56] : memref<24x32x8xf32, #tpu.memory_space<vmem>>, vector<1x32x8xf32>
    %101 = vector.shape_cast %100 : vector<1x32x8xf32> to vector<32x8xf32>
    %cst_57 = arith.constant dense<0.000000e+00> : vector<5x8xf32>
    %102 = tpu.matmul %54, %101, %cst_57 {dimension_numbers = #tpu.dot_dimension_numbers<[1], [0], [0], [1], [0, 0, 1, 1], [], []>} : vector<5x32xf32>, vector<32x8xf32>, vector<5x8xf32> -> vector<5x8xf32>
    %c5_58 = arith.constant 5 : index
    %c0_59 = arith.constant 0 : index
    %c0_60 = arith.constant 0 : index
    %103 = vector.load %arg7[%c5_58, %c0_59, %c0_60] : memref<24x1x8xf32, #tpu.memory_space<vmem>>, vector<1x1x8xf32>
    %104 = vector.shape_cast %103 : vector<1x1x8xf32> to vector<1x8xf32>
    %105 = vector.broadcast %104 : vector<1x8xf32> to vector<5x8xf32>
    %106 = arith.addf %102, %105 : vector<5x8xf32>
    %c9 = arith.constant 9 : index
    %c0_61 = arith.constant 0 : index
    %c0_62 = arith.constant 0 : index
    %107 = vector.load %arg6[%c9, %c0_61, %c0_62] : memref<24x32x8xf32, #tpu.memory_space<vmem>>, vector<1x32x8xf32>
    %108 = vector.shape_cast %107 : vector<1x32x8xf32> to vector<32x8xf32>
    %cst_63 = arith.constant dense<0.000000e+00> : vector<5x8xf32>
    %109 = tpu.matmul %54, %108, %cst_63 {dimension_numbers = #tpu.dot_dimension_numbers<[1], [0], [0], [1], [0, 0, 1, 1], [], []>} : vector<5x32xf32>, vector<32x8xf32>, vector<5x8xf32> -> vector<5x8xf32>
    %c9_64 = arith.constant 9 : index
    %c0_65 = arith.constant 0 : index
    %c0_66 = arith.constant 0 : index
    %110 = vector.load %arg7[%c9_64, %c0_65, %c0_66] : memref<24x1x8xf32, #tpu.memory_space<vmem>>, vector<1x1x8xf32>
    %111 = vector.shape_cast %110 : vector<1x1x8xf32> to vector<1x8xf32>
    %112 = vector.broadcast %111 : vector<1x8xf32> to vector<5x8xf32>
    %113 = arith.addf %109, %112 : vector<5x8xf32>
    %cst_67 = arith.constant dense<0.000000e+00> : vector<5x5xf32>
    %114 = tpu.matmul %99, %106, %cst_67 {dimension_numbers = #tpu.dot_dimension_numbers<[1], [1], [0], [0], [0, 0, 1, 0], [], []>} : vector<5x8xf32>, vector<5x8xf32>, vector<5x5xf32> -> vector<5x5xf32>
    %cst_68 = arith.constant 0.353553385 : f32
    %115 = vector.broadcast %cst_68 : f32 to vector<5x5xf32>
    %116 = arith.mulf %114, %115 : vector<5x5xf32>
    %cst_69 = arith.constant dense<0xFF800000> : vector<5xf32>
    %117 = vector.multi_reduction <maximumf>, %116, %cst_69 [1] : vector<5x5xf32> to vector<5xf32>
    %118 = vector.shape_cast %117 : vector<5xf32> to vector<5x1xf32>
    %119 = vector.broadcast %118 : vector<5x1xf32> to vector<5x5xf32>
    %120 = arith.subf %116, %119 : vector<5x5xf32>
    %121 = math.exp %120 : vector<5x5xf32>
    %cst_70 = arith.constant dense<0.000000e+00> : vector<5xf32>
    %122 = vector.multi_reduction <add>, %121, %cst_70 [1] : vector<5x5xf32> to vector<5xf32>
    %123 = vector.shape_cast %122 : vector<5xf32> to vector<5x1xf32>
    %124 = tpu.reciprocal %123 {approx = true} : vector<5x1xf32> -> vector<5x1xf32>
    %125 = vector.broadcast %124 : vector<5x1xf32> to vector<5x5xf32>
    %126 = arith.mulf %121, %125 : vector<5x5xf32>
    %cst_71 = arith.constant dense<0.000000e+00> : vector<5x8xf32>
    %127 = tpu.matmul %126, %113, %cst_71 {dimension_numbers = #tpu.dot_dimension_numbers<[1], [0], [0], [1], [0, 0, 1, 1], [], []>} : vector<5x5xf32>, vector<5x8xf32>, vector<5x8xf32> -> vector<5x8xf32>
    %c1_72 = arith.constant 1 : index
    %c0_73 = arith.constant 0 : index
    %c0_74 = arith.constant 0 : index
    %128 = vector.load %arg8[%c1_72, %c0_73, %c0_74] : memref<8x8x32xf32, #tpu.memory_space<vmem>>, vector<1x8x32xf32>
    %129 = vector.shape_cast %128 : vector<1x8x32xf32> to vector<8x32xf32>
    %cst_75 = arith.constant dense<0.000000e+00> : vector<5x32xf32>
    %130 = tpu.matmul %127, %129, %cst_75 {dimension_numbers = #tpu.dot_dimension_numbers<[1], [0], [0], [1], [0, 0, 1, 1], [], []>} : vector<5x8xf32>, vector<8x32xf32>, vector<5x32xf32> -> vector<5x32xf32>
    %131 = arith.addf %92, %130 : vector<5x32xf32>
    %c2 = arith.constant 2 : index
    %c0_76 = arith.constant 0 : index
    %c0_77 = arith.constant 0 : index
    %132 = vector.load %arg6[%c2, %c0_76, %c0_77] : memref<24x32x8xf32, #tpu.memory_space<vmem>>, vector<1x32x8xf32>
    %133 = vector.shape_cast %132 : vector<1x32x8xf32> to vector<32x8xf32>
    %cst_78 = arith.constant dense<0.000000e+00> : vector<5x8xf32>
    %134 = tpu.matmul %54, %133, %cst_78 {dimension_numbers = #tpu.dot_dimension_numbers<[1], [0], [0], [1], [0, 0, 1, 1], [], []>} : vector<5x32xf32>, vector<32x8xf32>, vector<5x8xf32> -> vector<5x8xf32>
    %c2_79 = arith.constant 2 : index
    %c0_80 = arith.constant 0 : index
    %c0_81 = arith.constant 0 : index
    %135 = vector.load %arg7[%c2_79, %c0_80, %c0_81] : memref<24x1x8xf32, #tpu.memory_space<vmem>>, vector<1x1x8xf32>
    %136 = vector.shape_cast %135 : vector<1x1x8xf32> to vector<1x8xf32>
    %137 = vector.broadcast %136 : vector<1x8xf32> to vector<5x8xf32>
    %138 = arith.addf %134, %137 : vector<5x8xf32>
    %c6 = arith.constant 6 : index
    %c0_82 = arith.constant 0 : index
    %c0_83 = arith.constant 0 : index
    %139 = vector.load %arg6[%c6, %c0_82, %c0_83] : memref<24x32x8xf32, #tpu.memory_space<vmem>>, vector<1x32x8xf32>
    %140 = vector.shape_cast %139 : vector<1x32x8xf32> to vector<32x8xf32>
    %cst_84 = arith.constant dense<0.000000e+00> : vector<5x8xf32>
    %141 = tpu.matmul %54, %140, %cst_84 {dimension_numbers = #tpu.dot_dimension_numbers<[1], [0], [0], [1], [0, 0, 1, 1], [], []>} : vector<5x32xf32>, vector<32x8xf32>, vector<5x8xf32> -> vector<5x8xf32>
    %c6_85 = arith.constant 6 : index
    %c0_86 = arith.constant 0 : index
    %c0_87 = arith.constant 0 : index
    %142 = vector.load %arg7[%c6_85, %c0_86, %c0_87] : memref<24x1x8xf32, #tpu.memory_space<vmem>>, vector<1x1x8xf32>
    %143 = vector.shape_cast %142 : vector<1x1x8xf32> to vector<1x8xf32>
    %144 = vector.broadcast %143 : vector<1x8xf32> to vector<5x8xf32>
    %145 = arith.addf %141, %144 : vector<5x8xf32>
    %c10 = arith.constant 10 : index
    %c0_88 = arith.constant 0 : index
    %c0_89 = arith.constant 0 : index
    %146 = vector.load %arg6[%c10, %c0_88, %c0_89] : memref<24x32x8xf32, #tpu.memory_space<vmem>>, vector<1x32x8xf32>
    %147 = vector.shape_cast %146 : vector<1x32x8xf32> to vector<32x8xf32>
    %cst_90 = arith.constant dense<0.000000e+00> : vector<5x8xf32>
    %148 = tpu.matmul %54, %147, %cst_90 {dimension_numbers = #tpu.dot_dimension_numbers<[1], [0], [0], [1], [0, 0, 1, 1], [], []>} : vector<5x32xf32>, vector<32x8xf32>, vector<5x8xf32> -> vector<5x8xf32>
    %c10_91 = arith.constant 10 : index
    %c0_92 = arith.constant 0 : index
    %c0_93 = arith.constant 0 : index
    %149 = vector.load %arg7[%c10_91, %c0_92, %c0_93] : memref<24x1x8xf32, #tpu.memory_space<vmem>>, vector<1x1x8xf32>
    %150 = vector.shape_cast %149 : vector<1x1x8xf32> to vector<1x8xf32>
    %151 = vector.broadcast %150 : vector<1x8xf32> to vector<5x8xf32>
    %152 = arith.addf %148, %151 : vector<5x8xf32>
    %cst_94 = arith.constant dense<0.000000e+00> : vector<5x5xf32>
    %153 = tpu.matmul %138, %145, %cst_94 {dimension_numbers = #tpu.dot_dimension_numbers<[1], [1], [0], [0], [0, 0, 1, 0], [], []>} : vector<5x8xf32>, vector<5x8xf32>, vector<5x5xf32> -> vector<5x5xf32>
    %cst_95 = arith.constant 0.353553385 : f32
    %154 = vector.broadcast %cst_95 : f32 to vector<5x5xf32>
    %155 = arith.mulf %153, %154 : vector<5x5xf32>
    %cst_96 = arith.constant dense<0xFF800000> : vector<5xf32>
    %156 = vector.multi_reduction <maximumf>, %155, %cst_96 [1] : vector<5x5xf32> to vector<5xf32>
    %157 = vector.shape_cast %156 : vector<5xf32> to vector<5x1xf32>
    %158 = vector.broadcast %157 : vector<5x1xf32> to vector<5x5xf32>
    %159 = arith.subf %155, %158 : vector<5x5xf32>
    %160 = math.exp %159 : vector<5x5xf32>
    %cst_97 = arith.constant dense<0.000000e+00> : vector<5xf32>
    %161 = vector.multi_reduction <add>, %160, %cst_97 [1] : vector<5x5xf32> to vector<5xf32>
    %162 = vector.shape_cast %161 : vector<5xf32> to vector<5x1xf32>
    %163 = tpu.reciprocal %162 {approx = true} : vector<5x1xf32> -> vector<5x1xf32>
    %164 = vector.broadcast %163 : vector<5x1xf32> to vector<5x5xf32>
    %165 = arith.mulf %160, %164 : vector<5x5xf32>
    %cst_98 = arith.constant dense<0.000000e+00> : vector<5x8xf32>
    %166 = tpu.matmul %165, %152, %cst_98 {dimension_numbers = #tpu.dot_dimension_numbers<[1], [0], [0], [1], [0, 0, 1, 1], [], []>} : vector<5x5xf32>, vector<5x8xf32>, vector<5x8xf32> -> vector<5x8xf32>
    %c2_99 = arith.constant 2 : index
    %c0_100 = arith.constant 0 : index
    %c0_101 = arith.constant 0 : index
    %167 = vector.load %arg8[%c2_99, %c0_100, %c0_101] : memref<8x8x32xf32, #tpu.memory_space<vmem>>, vector<1x8x32xf32>
    %168 = vector.shape_cast %167 : vector<1x8x32xf32> to vector<8x32xf32>
    %cst_102 = arith.constant dense<0.000000e+00> : vector<5x32xf32>
    %169 = tpu.matmul %166, %168, %cst_102 {dimension_numbers = #tpu.dot_dimension_numbers<[1], [0], [0], [1], [0, 0, 1, 1], [], []>} : vector<5x8xf32>, vector<8x32xf32>, vector<5x32xf32> -> vector<5x32xf32>
    %170 = arith.addf %131, %169 : vector<5x32xf32>
    %c3 = arith.constant 3 : index
    %c0_103 = arith.constant 0 : index
    %c0_104 = arith.constant 0 : index
    %171 = vector.load %arg6[%c3, %c0_103, %c0_104] : memref<24x32x8xf32, #tpu.memory_space<vmem>>, vector<1x32x8xf32>
    %172 = vector.shape_cast %171 : vector<1x32x8xf32> to vector<32x8xf32>
    %cst_105 = arith.constant dense<0.000000e+00> : vector<5x8xf32>
    %173 = tpu.matmul %54, %172, %cst_105 {dimension_numbers = #tpu.dot_dimension_numbers<[1], [0], [0], [1], [0, 0, 1, 1], [], []>} : vector<5x32xf32>, vector<32x8xf32>, vector<5x8xf32> -> vector<5x8xf32>
    %c3_106 = arith.constant 3 : index
    %c0_107 = arith.constant 0 : index
    %c0_108 = arith.constant 0 : index
    %174 = vector.load %arg7[%c3_106, %c0_107, %c0_108] : memref<24x1x8xf32, #tpu.memory_space<vmem>>, vector<1x1x8xf32>
    %175 = vector.shape_cast %174 : vector<1x1x8xf32> to vector<1x8xf32>
    %176 = vector.broadcast %175 : vector<1x8xf32> to vector<5x8xf32>
    %177 = arith.addf %173, %176 : vector<5x8xf32>
    %c7 = arith.constant 7 : index
    %c0_109 = arith.constant 0 : index
    %c0_110 = arith.constant 0 : index
    %178 = vector.load %arg6[%c7, %c0_109, %c0_110] : memref<24x32x8xf32, #tpu.memory_space<vmem>>, vector<1x32x8xf32>
    %179 = vector.shape_cast %178 : vector<1x32x8xf32> to vector<32x8xf32>
    %cst_111 = arith.constant dense<0.000000e+00> : vector<5x8xf32>
    %180 = tpu.matmul %54, %179, %cst_111 {dimension_numbers = #tpu.dot_dimension_numbers<[1], [0], [0], [1], [0, 0, 1, 1], [], []>} : vector<5x32xf32>, vector<32x8xf32>, vector<5x8xf32> -> vector<5x8xf32>
    %c7_112 = arith.constant 7 : index
    %c0_113 = arith.constant 0 : index
    %c0_114 = arith.constant 0 : index
    %181 = vector.load %arg7[%c7_112, %c0_113, %c0_114] : memref<24x1x8xf32, #tpu.memory_space<vmem>>, vector<1x1x8xf32>
    %182 = vector.shape_cast %181 : vector<1x1x8xf32> to vector<1x8xf32>
    %183 = vector.broadcast %182 : vector<1x8xf32> to vector<5x8xf32>
    %184 = arith.addf %180, %183 : vector<5x8xf32>
    %c11 = arith.constant 11 : index
    %c0_115 = arith.constant 0 : index
    %c0_116 = arith.constant 0 : index
    %185 = vector.load %arg6[%c11, %c0_115, %c0_116] : memref<24x32x8xf32, #tpu.memory_space<vmem>>, vector<1x32x8xf32>
    %186 = vector.shape_cast %185 : vector<1x32x8xf32> to vector<32x8xf32>
    %cst_117 = arith.constant dense<0.000000e+00> : vector<5x8xf32>
    %187 = tpu.matmul %54, %186, %cst_117 {dimension_numbers = #tpu.dot_dimension_numbers<[1], [0], [0], [1], [0, 0, 1, 1], [], []>} : vector<5x32xf32>, vector<32x8xf32>, vector<5x8xf32> -> vector<5x8xf32>
    %c11_118 = arith.constant 11 : index
    %c0_119 = arith.constant 0 : index
    %c0_120 = arith.constant 0 : index
    %188 = vector.load %arg7[%c11_118, %c0_119, %c0_120] : memref<24x1x8xf32, #tpu.memory_space<vmem>>, vector<1x1x8xf32>
    %189 = vector.shape_cast %188 : vector<1x1x8xf32> to vector<1x8xf32>
    %190 = vector.broadcast %189 : vector<1x8xf32> to vector<5x8xf32>
    %191 = arith.addf %187, %190 : vector<5x8xf32>
    %cst_121 = arith.constant dense<0.000000e+00> : vector<5x5xf32>
    %192 = tpu.matmul %177, %184, %cst_121 {dimension_numbers = #tpu.dot_dimension_numbers<[1], [1], [0], [0], [0, 0, 1, 0], [], []>} : vector<5x8xf32>, vector<5x8xf32>, vector<5x5xf32> -> vector<5x5xf32>
    %cst_122 = arith.constant 0.353553385 : f32
    %193 = vector.broadcast %cst_122 : f32 to vector<5x5xf32>
    %194 = arith.mulf %192, %193 : vector<5x5xf32>
    %cst_123 = arith.constant dense<0xFF800000> : vector<5xf32>
    %195 = vector.multi_reduction <maximumf>, %194, %cst_123 [1] : vector<5x5xf32> to vector<5xf32>
    %196 = vector.shape_cast %195 : vector<5xf32> to vector<5x1xf32>
    %197 = vector.broadcast %196 : vector<5x1xf32> to vector<5x5xf32>
    %198 = arith.subf %194, %197 : vector<5x5xf32>
    %199 = math.exp %198 : vector<5x5xf32>
    %cst_124 = arith.constant dense<0.000000e+00> : vector<5xf32>
    %200 = vector.multi_reduction <add>, %199, %cst_124 [1] : vector<5x5xf32> to vector<5xf32>
    %201 = vector.shape_cast %200 : vector<5xf32> to vector<5x1xf32>
    %202 = tpu.reciprocal %201 {approx = true} : vector<5x1xf32> -> vector<5x1xf32>
    %203 = vector.broadcast %202 : vector<5x1xf32> to vector<5x5xf32>
    %204 = arith.mulf %199, %203 : vector<5x5xf32>
    %cst_125 = arith.constant dense<0.000000e+00> : vector<5x8xf32>
    %205 = tpu.matmul %204, %191, %cst_125 {dimension_numbers = #tpu.dot_dimension_numbers<[1], [0], [0], [1], [0, 0, 1, 1], [], []>} : vector<5x5xf32>, vector<5x8xf32>, vector<5x8xf32> -> vector<5x8xf32>
    %c3_126 = arith.constant 3 : index
    %c0_127 = arith.constant 0 : index
    %c0_128 = arith.constant 0 : index
    %206 = vector.load %arg8[%c3_126, %c0_127, %c0_128] : memref<8x8x32xf32, #tpu.memory_space<vmem>>, vector<1x8x32xf32>
    %207 = vector.shape_cast %206 : vector<1x8x32xf32> to vector<8x32xf32>
    %cst_129 = arith.constant dense<0.000000e+00> : vector<5x32xf32>
    %208 = tpu.matmul %205, %207, %cst_129 {dimension_numbers = #tpu.dot_dimension_numbers<[1], [0], [0], [1], [0, 0, 1, 1], [], []>} : vector<5x8xf32>, vector<8x32xf32>, vector<5x32xf32> -> vector<5x32xf32>
    %209 = arith.addf %170, %208 : vector<5x32xf32>
    %210 = arith.addf %30, %209 : vector<5x32xf32>
    %c0_130 = arith.constant 0 : index
    %c0_131 = arith.constant 0 : index
    %c0_132 = arith.constant 0 : index
    %211 = vector.load %arg9[%c0_130, %c0_131, %c0_132] : memref<2x1x32xf32, #tpu.memory_space<vmem>>, vector<1x1x32xf32>
    %212 = vector.shape_cast %211 : vector<1x1x32xf32> to vector<1x32xf32>
    %213 = vector.broadcast %212 : vector<1x32xf32> to vector<5x32xf32>
    %214 = arith.addf %210, %213 : vector<5x32xf32>
    %c1_133 = arith.constant 1 : index
    %c0_134 = arith.constant 0 : index
    %c0_135 = arith.constant 0 : index
    %215 = vector.load %arg5[%c1_133, %c0_134, %c0_135] : memref<4x2x32xf32, #tpu.memory_space<vmem>>, vector<1x2x32xf32>
    %216 = vector.shape_cast %215 : vector<1x2x32xf32> to vector<2x32xf32>
    %217 = vector.extract_strided_slice %216 {offsets = [0, 0], sizes = [1, 32], strides = [1, 1]} : vector<2x32xf32> to vector<1x32xf32>
    %218 = vector.extract_strided_slice %216 {offsets = [1, 0], sizes = [1, 32], strides = [1, 1]} : vector<2x32xf32> to vector<1x32xf32>
    %cst_136 = arith.constant dense<0.000000e+00> : vector<5xf32>
    %219 = vector.multi_reduction <add>, %214, %cst_136 [1] : vector<5x32xf32> to vector<5xf32>
    %220 = vector.shape_cast %219 : vector<5xf32> to vector<5x1xf32>
    %cst_137 = arith.constant 3.200000e+01 : f32
    %221 = vector.broadcast %cst_137 : f32 to vector<5x1xf32>
    %222 = arith.divf %220, %221 : vector<5x1xf32>
    %223 = vector.broadcast %222 : vector<5x1xf32> to vector<5x32xf32>
    %224 = arith.subf %214, %223 : vector<5x32xf32>
    %225 = arith.mulf %224, %224 : vector<5x32xf32>
    %cst_138 = arith.constant dense<0.000000e+00> : vector<5xf32>
    %226 = vector.multi_reduction <add>, %225, %cst_138 [1] : vector<5x32xf32> to vector<5xf32>
    %227 = vector.shape_cast %226 : vector<5xf32> to vector<5x1xf32>
    %cst_139 = arith.constant 3.200000e+01 : f32
    %228 = vector.broadcast %cst_139 : f32 to vector<5x1xf32>
    %229 = arith.divf %227, %228 : vector<5x1xf32>
    %cst_140 = arith.constant 9.99999974E-6 : f32
    %230 = vector.broadcast %cst_140 : f32 to vector<5x1xf32>
    %231 = arith.addf %229, %230 : vector<5x1xf32>
    %232 = math.rsqrt %231 : vector<5x1xf32>
    %233 = vector.broadcast %232 : vector<5x1xf32> to vector<5x32xf32>
    %234 = arith.mulf %224, %233 : vector<5x32xf32>
    %235 = vector.broadcast %217 : vector<1x32xf32> to vector<5x32xf32>
    %236 = arith.mulf %234, %235 : vector<5x32xf32>
    %237 = vector.broadcast %218 : vector<1x32xf32> to vector<5x32xf32>
    %238 = arith.addf %236, %237 : vector<5x32xf32>
    %c0_141 = arith.constant 0 : index
    %c0_142 = arith.constant 0 : index
    %c0_143 = arith.constant 0 : index
    %239 = vector.load %arg10[%c0_141, %c0_142, %c0_143] : memref<2x32x128xf32, #tpu.memory_space<vmem>>, vector<1x32x128xf32>
    %240 = vector.shape_cast %239 : vector<1x32x128xf32> to vector<32x128xf32>
    %cst_144 = arith.constant dense<0.000000e+00> : vector<5x128xf32>
    %241 = tpu.matmul %238, %240, %cst_144 {dimension_numbers = #tpu.dot_dimension_numbers<[1], [0], [0], [1], [0, 0, 1, 1], [], []>} : vector<5x32xf32>, vector<32x128xf32>, vector<5x128xf32> -> vector<5x128xf32>
    %c0_145 = arith.constant 0 : index
    %c0_146 = arith.constant 0 : index
    %c0_147 = arith.constant 0 : index
    %242 = vector.load %arg11[%c0_145, %c0_146, %c0_147] : memref<2x1x128xf32, #tpu.memory_space<vmem>>, vector<1x1x128xf32>
    %243 = vector.shape_cast %242 : vector<1x1x128xf32> to vector<1x128xf32>
    %244 = vector.broadcast %243 : vector<1x128xf32> to vector<5x128xf32>
    %245 = arith.addf %241, %244 : vector<5x128xf32>
    %cst_148 = arith.constant 1.702000e+00 : f32
    %246 = vector.broadcast %cst_148 : f32 to vector<5x128xf32>
    %247 = arith.mulf %246, %245 : vector<5x128xf32>
    %248 = arith.negf %247 : vector<5x128xf32>
    %249 = math.exp %248 : vector<5x128xf32>
    %cst_149 = arith.constant 1.000000e+00 : f32
    %250 = vector.broadcast %cst_149 : f32 to vector<5x128xf32>
    %251 = arith.addf %250, %249 : vector<5x128xf32>
    %252 = arith.divf %250, %251 : vector<5x128xf32>
    %253 = arith.mulf %245, %252 : vector<5x128xf32>
    %c0_150 = arith.constant 0 : index
    %c0_151 = arith.constant 0 : index
    %c0_152 = arith.constant 0 : index
    %254 = vector.load %arg12[%c0_150, %c0_151, %c0_152] : memref<2x128x32xf32, #tpu.memory_space<vmem>>, vector<1x128x32xf32>
    %255 = vector.shape_cast %254 : vector<1x128x32xf32> to vector<128x32xf32>
    %cst_153 = arith.constant dense<0.000000e+00> : vector<5x32xf32>
    %256 = tpu.matmul %253, %255, %cst_153 {dimension_numbers = #tpu.dot_dimension_numbers<[1], [0], [0], [1], [0, 0, 1, 1], [], []>} : vector<5x128xf32>, vector<128x32xf32>, vector<5x32xf32> -> vector<5x32xf32>
    %c0_154 = arith.constant 0 : index
    %c0_155 = arith.constant 0 : index
    %c0_156 = arith.constant 0 : index
    %257 = vector.load %arg13[%c0_154, %c0_155, %c0_156] : memref<2x1x32xf32, #tpu.memory_space<vmem>>, vector<1x1x32xf32>
    %258 = vector.shape_cast %257 : vector<1x1x32xf32> to vector<1x32xf32>
    %259 = vector.broadcast %258 : vector<1x32xf32> to vector<5x32xf32>
    %260 = arith.addf %256, %259 : vector<5x32xf32>
    %261 = arith.addf %214, %260 : vector<5x32xf32>
    %c2_157 = arith.constant 2 : index
    %c0_158 = arith.constant 0 : index
    %c0_159 = arith.constant 0 : index
    %262 = vector.load %arg5[%c2_157, %c0_158, %c0_159] : memref<4x2x32xf32, #tpu.memory_space<vmem>>, vector<1x2x32xf32>
    %263 = vector.shape_cast %262 : vector<1x2x32xf32> to vector<2x32xf32>
    %264 = vector.extract_strided_slice %263 {offsets = [0, 0], sizes = [1, 32], strides = [1, 1]} : vector<2x32xf32> to vector<1x32xf32>
    %265 = vector.extract_strided_slice %263 {offsets = [1, 0], sizes = [1, 32], strides = [1, 1]} : vector<2x32xf32> to vector<1x32xf32>
    %cst_160 = arith.constant dense<0.000000e+00> : vector<5xf32>
    %266 = vector.multi_reduction <add>, %261, %cst_160 [1] : vector<5x32xf32> to vector<5xf32>
    %267 = vector.shape_cast %266 : vector<5xf32> to vector<5x1xf32>
    %cst_161 = arith.constant 3.200000e+01 : f32
    %268 = vector.broadcast %cst_161 : f32 to vector<5x1xf32>
    %269 = arith.divf %267, %268 : vector<5x1xf32>
    %270 = vector.broadcast %269 : vector<5x1xf32> to vector<5x32xf32>
    %271 = arith.subf %261, %270 : vector<5x32xf32>
    %272 = arith.mulf %271, %271 : vector<5x32xf32>
    %cst_162 = arith.constant dense<0.000000e+00> : vector<5xf32>
    %273 = vector.multi_reduction <add>, %272, %cst_162 [1] : vector<5x32xf32> to vector<5xf32>
    %274 = vector.shape_cast %273 : vector<5xf32> to vector<5x1xf32>
    %cst_163 = arith.constant 3.200000e+01 : f32
    %275 = vector.broadcast %cst_163 : f32 to vector<5x1xf32>
    %276 = arith.divf %274, %275 : vector<5x1xf32>
    %cst_164 = arith.constant 9.99999974E-6 : f32
    %277 = vector.broadcast %cst_164 : f32 to vector<5x1xf32>
    %278 = arith.addf %276, %277 : vector<5x1xf32>
    %279 = math.rsqrt %278 : vector<5x1xf32>
    %280 = vector.broadcast %279 : vector<5x1xf32> to vector<5x32xf32>
    %281 = arith.mulf %271, %280 : vector<5x32xf32>
    %282 = vector.broadcast %264 : vector<1x32xf32> to vector<5x32xf32>
    %283 = arith.mulf %281, %282 : vector<5x32xf32>
    %284 = vector.broadcast %265 : vector<1x32xf32> to vector<5x32xf32>
    %285 = arith.addf %283, %284 : vector<5x32xf32>
    %c12 = arith.constant 12 : index
    %c0_165 = arith.constant 0 : index
    %c0_166 = arith.constant 0 : index
    %286 = vector.load %arg6[%c12, %c0_165, %c0_166] : memref<24x32x8xf32, #tpu.memory_space<vmem>>, vector<1x32x8xf32>
    %287 = vector.shape_cast %286 : vector<1x32x8xf32> to vector<32x8xf32>
    %cst_167 = arith.constant dense<0.000000e+00> : vector<5x8xf32>
    %288 = tpu.matmul %285, %287, %cst_167 {dimension_numbers = #tpu.dot_dimension_numbers<[1], [0], [0], [1], [0, 0, 1, 1], [], []>} : vector<5x32xf32>, vector<32x8xf32>, vector<5x8xf32> -> vector<5x8xf32>
    %c12_168 = arith.constant 12 : index
    %c0_169 = arith.constant 0 : index
    %c0_170 = arith.constant 0 : index
    %289 = vector.load %arg7[%c12_168, %c0_169, %c0_170] : memref<24x1x8xf32, #tpu.memory_space<vmem>>, vector<1x1x8xf32>
    %290 = vector.shape_cast %289 : vector<1x1x8xf32> to vector<1x8xf32>
    %291 = vector.broadcast %290 : vector<1x8xf32> to vector<5x8xf32>
    %292 = arith.addf %288, %291 : vector<5x8xf32>
    %c16 = arith.constant 16 : index
    %c0_171 = arith.constant 0 : index
    %c0_172 = arith.constant 0 : index
    %293 = vector.load %arg6[%c16, %c0_171, %c0_172] : memref<24x32x8xf32, #tpu.memory_space<vmem>>, vector<1x32x8xf32>
    %294 = vector.shape_cast %293 : vector<1x32x8xf32> to vector<32x8xf32>
    %cst_173 = arith.constant dense<0.000000e+00> : vector<5x8xf32>
    %295 = tpu.matmul %285, %294, %cst_173 {dimension_numbers = #tpu.dot_dimension_numbers<[1], [0], [0], [1], [0, 0, 1, 1], [], []>} : vector<5x32xf32>, vector<32x8xf32>, vector<5x8xf32> -> vector<5x8xf32>
    %c16_174 = arith.constant 16 : index
    %c0_175 = arith.constant 0 : index
    %c0_176 = arith.constant 0 : index
    %296 = vector.load %arg7[%c16_174, %c0_175, %c0_176] : memref<24x1x8xf32, #tpu.memory_space<vmem>>, vector<1x1x8xf32>
    %297 = vector.shape_cast %296 : vector<1x1x8xf32> to vector<1x8xf32>
    %298 = vector.broadcast %297 : vector<1x8xf32> to vector<5x8xf32>
    %299 = arith.addf %295, %298 : vector<5x8xf32>
    %c20 = arith.constant 20 : index
    %c0_177 = arith.constant 0 : index
    %c0_178 = arith.constant 0 : index
    %300 = vector.load %arg6[%c20, %c0_177, %c0_178] : memref<24x32x8xf32, #tpu.memory_space<vmem>>, vector<1x32x8xf32>
    %301 = vector.shape_cast %300 : vector<1x32x8xf32> to vector<32x8xf32>
    %cst_179 = arith.constant dense<0.000000e+00> : vector<5x8xf32>
    %302 = tpu.matmul %285, %301, %cst_179 {dimension_numbers = #tpu.dot_dimension_numbers<[1], [0], [0], [1], [0, 0, 1, 1], [], []>} : vector<5x32xf32>, vector<32x8xf32>, vector<5x8xf32> -> vector<5x8xf32>
    %c20_180 = arith.constant 20 : index
    %c0_181 = arith.constant 0 : index
    %c0_182 = arith.constant 0 : index
    %303 = vector.load %arg7[%c20_180, %c0_181, %c0_182] : memref<24x1x8xf32, #tpu.memory_space<vmem>>, vector<1x1x8xf32>
    %304 = vector.shape_cast %303 : vector<1x1x8xf32> to vector<1x8xf32>
    %305 = vector.broadcast %304 : vector<1x8xf32> to vector<5x8xf32>
    %306 = arith.addf %302, %305 : vector<5x8xf32>
    %cst_183 = arith.constant dense<0.000000e+00> : vector<5x5xf32>
    %307 = tpu.matmul %292, %299, %cst_183 {dimension_numbers = #tpu.dot_dimension_numbers<[1], [1], [0], [0], [0, 0, 1, 0], [], []>} : vector<5x8xf32>, vector<5x8xf32>, vector<5x5xf32> -> vector<5x5xf32>
    %cst_184 = arith.constant 0.353553385 : f32
    %308 = vector.broadcast %cst_184 : f32 to vector<5x5xf32>
    %309 = arith.mulf %307, %308 : vector<5x5xf32>
    %cst_185 = arith.constant dense<0xFF800000> : vector<5xf32>
    %310 = vector.multi_reduction <maximumf>, %309, %cst_185 [1] : vector<5x5xf32> to vector<5xf32>
    %311 = vector.shape_cast %310 : vector<5xf32> to vector<5x1xf32>
    %312 = vector.broadcast %311 : vector<5x1xf32> to vector<5x5xf32>
    %313 = arith.subf %309, %312 : vector<5x5xf32>
    %314 = math.exp %313 : vector<5x5xf32>
    %cst_186 = arith.constant dense<0.000000e+00> : vector<5xf32>
    %315 = vector.multi_reduction <add>, %314, %cst_186 [1] : vector<5x5xf32> to vector<5xf32>
    %316 = vector.shape_cast %315 : vector<5xf32> to vector<5x1xf32>
    %317 = tpu.reciprocal %316 {approx = true} : vector<5x1xf32> -> vector<5x1xf32>
    %318 = vector.broadcast %317 : vector<5x1xf32> to vector<5x5xf32>
    %319 = arith.mulf %314, %318 : vector<5x5xf32>
    %cst_187 = arith.constant dense<0.000000e+00> : vector<5x8xf32>
    %320 = tpu.matmul %319, %306, %cst_187 {dimension_numbers = #tpu.dot_dimension_numbers<[1], [0], [0], [1], [0, 0, 1, 1], [], []>} : vector<5x5xf32>, vector<5x8xf32>, vector<5x8xf32> -> vector<5x8xf32>
    %c4_188 = arith.constant 4 : index
    %c0_189 = arith.constant 0 : index
    %c0_190 = arith.constant 0 : index
    %321 = vector.load %arg8[%c4_188, %c0_189, %c0_190] : memref<8x8x32xf32, #tpu.memory_space<vmem>>, vector<1x8x32xf32>
    %322 = vector.shape_cast %321 : vector<1x8x32xf32> to vector<8x32xf32>
    %cst_191 = arith.constant dense<0.000000e+00> : vector<5x32xf32>
    %323 = tpu.matmul %320, %322, %cst_191 {dimension_numbers = #tpu.dot_dimension_numbers<[1], [0], [0], [1], [0, 0, 1, 1], [], []>} : vector<5x8xf32>, vector<8x32xf32>, vector<5x32xf32> -> vector<5x32xf32>
    %c13 = arith.constant 13 : index
    %c0_192 = arith.constant 0 : index
    %c0_193 = arith.constant 0 : index
    %324 = vector.load %arg6[%c13, %c0_192, %c0_193] : memref<24x32x8xf32, #tpu.memory_space<vmem>>, vector<1x32x8xf32>
    %325 = vector.shape_cast %324 : vector<1x32x8xf32> to vector<32x8xf32>
    %cst_194 = arith.constant dense<0.000000e+00> : vector<5x8xf32>
    %326 = tpu.matmul %285, %325, %cst_194 {dimension_numbers = #tpu.dot_dimension_numbers<[1], [0], [0], [1], [0, 0, 1, 1], [], []>} : vector<5x32xf32>, vector<32x8xf32>, vector<5x8xf32> -> vector<5x8xf32>
    %c13_195 = arith.constant 13 : index
    %c0_196 = arith.constant 0 : index
    %c0_197 = arith.constant 0 : index
    %327 = vector.load %arg7[%c13_195, %c0_196, %c0_197] : memref<24x1x8xf32, #tpu.memory_space<vmem>>, vector<1x1x8xf32>
    %328 = vector.shape_cast %327 : vector<1x1x8xf32> to vector<1x8xf32>
    %329 = vector.broadcast %328 : vector<1x8xf32> to vector<5x8xf32>
    %330 = arith.addf %326, %329 : vector<5x8xf32>
    %c17 = arith.constant 17 : index
    %c0_198 = arith.constant 0 : index
    %c0_199 = arith.constant 0 : index
    %331 = vector.load %arg6[%c17, %c0_198, %c0_199] : memref<24x32x8xf32, #tpu.memory_space<vmem>>, vector<1x32x8xf32>
    %332 = vector.shape_cast %331 : vector<1x32x8xf32> to vector<32x8xf32>
    %cst_200 = arith.constant dense<0.000000e+00> : vector<5x8xf32>
    %333 = tpu.matmul %285, %332, %cst_200 {dimension_numbers = #tpu.dot_dimension_numbers<[1], [0], [0], [1], [0, 0, 1, 1], [], []>} : vector<5x32xf32>, vector<32x8xf32>, vector<5x8xf32> -> vector<5x8xf32>
    %c17_201 = arith.constant 17 : index
    %c0_202 = arith.constant 0 : index
    %c0_203 = arith.constant 0 : index
    %334 = vector.load %arg7[%c17_201, %c0_202, %c0_203] : memref<24x1x8xf32, #tpu.memory_space<vmem>>, vector<1x1x8xf32>
    %335 = vector.shape_cast %334 : vector<1x1x8xf32> to vector<1x8xf32>
    %336 = vector.broadcast %335 : vector<1x8xf32> to vector<5x8xf32>
    %337 = arith.addf %333, %336 : vector<5x8xf32>
    %c21 = arith.constant 21 : index
    %c0_204 = arith.constant 0 : index
    %c0_205 = arith.constant 0 : index
    %338 = vector.load %arg6[%c21, %c0_204, %c0_205] : memref<24x32x8xf32, #tpu.memory_space<vmem>>, vector<1x32x8xf32>
    %339 = vector.shape_cast %338 : vector<1x32x8xf32> to vector<32x8xf32>
    %cst_206 = arith.constant dense<0.000000e+00> : vector<5x8xf32>
    %340 = tpu.matmul %285, %339, %cst_206 {dimension_numbers = #tpu.dot_dimension_numbers<[1], [0], [0], [1], [0, 0, 1, 1], [], []>} : vector<5x32xf32>, vector<32x8xf32>, vector<5x8xf32> -> vector<5x8xf32>
    %c21_207 = arith.constant 21 : index
    %c0_208 = arith.constant 0 : index
    %c0_209 = arith.constant 0 : index
    %341 = vector.load %arg7[%c21_207, %c0_208, %c0_209] : memref<24x1x8xf32, #tpu.memory_space<vmem>>, vector<1x1x8xf32>
    %342 = vector.shape_cast %341 : vector<1x1x8xf32> to vector<1x8xf32>
    %343 = vector.broadcast %342 : vector<1x8xf32> to vector<5x8xf32>
    %344 = arith.addf %340, %343 : vector<5x8xf32>
    %cst_210 = arith.constant dense<0.000000e+00> : vector<5x5xf32>
    %345 = tpu.matmul %330, %337, %cst_210 {dimension_numbers = #tpu.dot_dimension_numbers<[1], [1], [0], [0], [0, 0, 1, 0], [], []>} : vector<5x8xf32>, vector<5x8xf32>, vector<5x5xf32> -> vector<5x5xf32>
    %cst_211 = arith.constant 0.353553385 : f32
    %346 = vector.broadcast %cst_211 : f32 to vector<5x5xf32>
    %347 = arith.mulf %345, %346 : vector<5x5xf32>
    %cst_212 = arith.constant dense<0xFF800000> : vector<5xf32>
    %348 = vector.multi_reduction <maximumf>, %347, %cst_212 [1] : vector<5x5xf32> to vector<5xf32>
    %349 = vector.shape_cast %348 : vector<5xf32> to vector<5x1xf32>
    %350 = vector.broadcast %349 : vector<5x1xf32> to vector<5x5xf32>
    %351 = arith.subf %347, %350 : vector<5x5xf32>
    %352 = math.exp %351 : vector<5x5xf32>
    %cst_213 = arith.constant dense<0.000000e+00> : vector<5xf32>
    %353 = vector.multi_reduction <add>, %352, %cst_213 [1] : vector<5x5xf32> to vector<5xf32>
    %354 = vector.shape_cast %353 : vector<5xf32> to vector<5x1xf32>
    %355 = tpu.reciprocal %354 {approx = true} : vector<5x1xf32> -> vector<5x1xf32>
    %356 = vector.broadcast %355 : vector<5x1xf32> to vector<5x5xf32>
    %357 = arith.mulf %352, %356 : vector<5x5xf32>
    %cst_214 = arith.constant dense<0.000000e+00> : vector<5x8xf32>
    %358 = tpu.matmul %357, %344, %cst_214 {dimension_numbers = #tpu.dot_dimension_numbers<[1], [0], [0], [1], [0, 0, 1, 1], [], []>} : vector<5x5xf32>, vector<5x8xf32>, vector<5x8xf32> -> vector<5x8xf32>
    %c5_215 = arith.constant 5 : index
    %c0_216 = arith.constant 0 : index
    %c0_217 = arith.constant 0 : index
    %359 = vector.load %arg8[%c5_215, %c0_216, %c0_217] : memref<8x8x32xf32, #tpu.memory_space<vmem>>, vector<1x8x32xf32>
    %360 = vector.shape_cast %359 : vector<1x8x32xf32> to vector<8x32xf32>
    %cst_218 = arith.constant dense<0.000000e+00> : vector<5x32xf32>
    %361 = tpu.matmul %358, %360, %cst_218 {dimension_numbers = #tpu.dot_dimension_numbers<[1], [0], [0], [1], [0, 0, 1, 1], [], []>} : vector<5x8xf32>, vector<8x32xf32>, vector<5x32xf32> -> vector<5x32xf32>
    %362 = arith.addf %323, %361 : vector<5x32xf32>
    %c14 = arith.constant 14 : index
    %c0_219 = arith.constant 0 : index
    %c0_220 = arith.constant 0 : index
    %363 = vector.load %arg6[%c14, %c0_219, %c0_220] : memref<24x32x8xf32, #tpu.memory_space<vmem>>, vector<1x32x8xf32>
    %364 = vector.shape_cast %363 : vector<1x32x8xf32> to vector<32x8xf32>
    %cst_221 = arith.constant dense<0.000000e+00> : vector<5x8xf32>
    %365 = tpu.matmul %285, %364, %cst_221 {dimension_numbers = #tpu.dot_dimension_numbers<[1], [0], [0], [1], [0, 0, 1, 1], [], []>} : vector<5x32xf32>, vector<32x8xf32>, vector<5x8xf32> -> vector<5x8xf32>
    %c14_222 = arith.constant 14 : index
    %c0_223 = arith.constant 0 : index
    %c0_224 = arith.constant 0 : index
    %366 = vector.load %arg7[%c14_222, %c0_223, %c0_224] : memref<24x1x8xf32, #tpu.memory_space<vmem>>, vector<1x1x8xf32>
    %367 = vector.shape_cast %366 : vector<1x1x8xf32> to vector<1x8xf32>
    %368 = vector.broadcast %367 : vector<1x8xf32> to vector<5x8xf32>
    %369 = arith.addf %365, %368 : vector<5x8xf32>
    %c18 = arith.constant 18 : index
    %c0_225 = arith.constant 0 : index
    %c0_226 = arith.constant 0 : index
    %370 = vector.load %arg6[%c18, %c0_225, %c0_226] : memref<24x32x8xf32, #tpu.memory_space<vmem>>, vector<1x32x8xf32>
    %371 = vector.shape_cast %370 : vector<1x32x8xf32> to vector<32x8xf32>
    %cst_227 = arith.constant dense<0.000000e+00> : vector<5x8xf32>
    %372 = tpu.matmul %285, %371, %cst_227 {dimension_numbers = #tpu.dot_dimension_numbers<[1], [0], [0], [1], [0, 0, 1, 1], [], []>} : vector<5x32xf32>, vector<32x8xf32>, vector<5x8xf32> -> vector<5x8xf32>
    %c18_228 = arith.constant 18 : index
    %c0_229 = arith.constant 0 : index
    %c0_230 = arith.constant 0 : index
    %373 = vector.load %arg7[%c18_228, %c0_229, %c0_230] : memref<24x1x8xf32, #tpu.memory_space<vmem>>, vector<1x1x8xf32>
    %374 = vector.shape_cast %373 : vector<1x1x8xf32> to vector<1x8xf32>
    %375 = vector.broadcast %374 : vector<1x8xf32> to vector<5x8xf32>
    %376 = arith.addf %372, %375 : vector<5x8xf32>
    %c22 = arith.constant 22 : index
    %c0_231 = arith.constant 0 : index
    %c0_232 = arith.constant 0 : index
    %377 = vector.load %arg6[%c22, %c0_231, %c0_232] : memref<24x32x8xf32, #tpu.memory_space<vmem>>, vector<1x32x8xf32>
    %378 = vector.shape_cast %377 : vector<1x32x8xf32> to vector<32x8xf32>
    %cst_233 = arith.constant dense<0.000000e+00> : vector<5x8xf32>
    %379 = tpu.matmul %285, %378, %cst_233 {dimension_numbers = #tpu.dot_dimension_numbers<[1], [0], [0], [1], [0, 0, 1, 1], [], []>} : vector<5x32xf32>, vector<32x8xf32>, vector<5x8xf32> -> vector<5x8xf32>
    %c22_234 = arith.constant 22 : index
    %c0_235 = arith.constant 0 : index
    %c0_236 = arith.constant 0 : index
    %380 = vector.load %arg7[%c22_234, %c0_235, %c0_236] : memref<24x1x8xf32, #tpu.memory_space<vmem>>, vector<1x1x8xf32>
    %381 = vector.shape_cast %380 : vector<1x1x8xf32> to vector<1x8xf32>
    %382 = vector.broadcast %381 : vector<1x8xf32> to vector<5x8xf32>
    %383 = arith.addf %379, %382 : vector<5x8xf32>
    %cst_237 = arith.constant dense<0.000000e+00> : vector<5x5xf32>
    %384 = tpu.matmul %369, %376, %cst_237 {dimension_numbers = #tpu.dot_dimension_numbers<[1], [1], [0], [0], [0, 0, 1, 0], [], []>} : vector<5x8xf32>, vector<5x8xf32>, vector<5x5xf32> -> vector<5x5xf32>
    %cst_238 = arith.constant 0.353553385 : f32
    %385 = vector.broadcast %cst_238 : f32 to vector<5x5xf32>
    %386 = arith.mulf %384, %385 : vector<5x5xf32>
    %cst_239 = arith.constant dense<0xFF800000> : vector<5xf32>
    %387 = vector.multi_reduction <maximumf>, %386, %cst_239 [1] : vector<5x5xf32> to vector<5xf32>
    %388 = vector.shape_cast %387 : vector<5xf32> to vector<5x1xf32>
    %389 = vector.broadcast %388 : vector<5x1xf32> to vector<5x5xf32>
    %390 = arith.subf %386, %389 : vector<5x5xf32>
    %391 = math.exp %390 : vector<5x5xf32>
    %cst_240 = arith.constant dense<0.000000e+00> : vector<5xf32>
    %392 = vector.multi_reduction <add>, %391, %cst_240 [1] : vector<5x5xf32> to vector<5xf32>
    %393 = vector.shape_cast %392 : vector<5xf32> to vector<5x1xf32>
    %394 = tpu.reciprocal %393 {approx = true} : vector<5x1xf32> -> vector<5x1xf32>
    %395 = vector.broadcast %394 : vector<5x1xf32> to vector<5x5xf32>
    %396 = arith.mulf %391, %395 : vector<5x5xf32>
    %cst_241 = arith.constant dense<0.000000e+00> : vector<5x8xf32>
    %397 = tpu.matmul %396, %383, %cst_241 {dimension_numbers = #tpu.dot_dimension_numbers<[1], [0], [0], [1], [0, 0, 1, 1], [], []>} : vector<5x5xf32>, vector<5x8xf32>, vector<5x8xf32> -> vector<5x8xf32>
    %c6_242 = arith.constant 6 : index
    %c0_243 = arith.constant 0 : index
    %c0_244 = arith.constant 0 : index
    %398 = vector.load %arg8[%c6_242, %c0_243, %c0_244] : memref<8x8x32xf32, #tpu.memory_space<vmem>>, vector<1x8x32xf32>
    %399 = vector.shape_cast %398 : vector<1x8x32xf32> to vector<8x32xf32>
    %cst_245 = arith.constant dense<0.000000e+00> : vector<5x32xf32>
    %400 = tpu.matmul %397, %399, %cst_245 {dimension_numbers = #tpu.dot_dimension_numbers<[1], [0], [0], [1], [0, 0, 1, 1], [], []>} : vector<5x8xf32>, vector<8x32xf32>, vector<5x32xf32> -> vector<5x32xf32>
    %401 = arith.addf %362, %400 : vector<5x32xf32>
    %c15 = arith.constant 15 : index
    %c0_246 = arith.constant 0 : index
    %c0_247 = arith.constant 0 : index
    %402 = vector.load %arg6[%c15, %c0_246, %c0_247] : memref<24x32x8xf32, #tpu.memory_space<vmem>>, vector<1x32x8xf32>
    %403 = vector.shape_cast %402 : vector<1x32x8xf32> to vector<32x8xf32>
    %cst_248 = arith.constant dense<0.000000e+00> : vector<5x8xf32>
    %404 = tpu.matmul %285, %403, %cst_248 {dimension_numbers = #tpu.dot_dimension_numbers<[1], [0], [0], [1], [0, 0, 1, 1], [], []>} : vector<5x32xf32>, vector<32x8xf32>, vector<5x8xf32> -> vector<5x8xf32>
    %c15_249 = arith.constant 15 : index
    %c0_250 = arith.constant 0 : index
    %c0_251 = arith.constant 0 : index
    %405 = vector.load %arg7[%c15_249, %c0_250, %c0_251] : memref<24x1x8xf32, #tpu.memory_space<vmem>>, vector<1x1x8xf32>
    %406 = vector.shape_cast %405 : vector<1x1x8xf32> to vector<1x8xf32>
    %407 = vector.broadcast %406 : vector<1x8xf32> to vector<5x8xf32>
    %408 = arith.addf %404, %407 : vector<5x8xf32>
    %c19 = arith.constant 19 : index
    %c0_252 = arith.constant 0 : index
    %c0_253 = arith.constant 0 : index
    %409 = vector.load %arg6[%c19, %c0_252, %c0_253] : memref<24x32x8xf32, #tpu.memory_space<vmem>>, vector<1x32x8xf32>
    %410 = vector.shape_cast %409 : vector<1x32x8xf32> to vector<32x8xf32>
    %cst_254 = arith.constant dense<0.000000e+00> : vector<5x8xf32>
    %411 = tpu.matmul %285, %410, %cst_254 {dimension_numbers = #tpu.dot_dimension_numbers<[1], [0], [0], [1], [0, 0, 1, 1], [], []>} : vector<5x32xf32>, vector<32x8xf32>, vector<5x8xf32> -> vector<5x8xf32>
    %c19_255 = arith.constant 19 : index
    %c0_256 = arith.constant 0 : index
    %c0_257 = arith.constant 0 : index
    %412 = vector.load %arg7[%c19_255, %c0_256, %c0_257] : memref<24x1x8xf32, #tpu.memory_space<vmem>>, vector<1x1x8xf32>
    %413 = vector.shape_cast %412 : vector<1x1x8xf32> to vector<1x8xf32>
    %414 = vector.broadcast %413 : vector<1x8xf32> to vector<5x8xf32>
    %415 = arith.addf %411, %414 : vector<5x8xf32>
    %c23 = arith.constant 23 : index
    %c0_258 = arith.constant 0 : index
    %c0_259 = arith.constant 0 : index
    %416 = vector.load %arg6[%c23, %c0_258, %c0_259] : memref<24x32x8xf32, #tpu.memory_space<vmem>>, vector<1x32x8xf32>
    %417 = vector.shape_cast %416 : vector<1x32x8xf32> to vector<32x8xf32>
    %cst_260 = arith.constant dense<0.000000e+00> : vector<5x8xf32>
    %418 = tpu.matmul %285, %417, %cst_260 {dimension_numbers = #tpu.dot_dimension_numbers<[1], [0], [0], [1], [0, 0, 1, 1], [], []>} : vector<5x32xf32>, vector<32x8xf32>, vector<5x8xf32> -> vector<5x8xf32>
    %c23_261 = arith.constant 23 : index
    %c0_262 = arith.constant 0 : index
    %c0_263 = arith.constant 0 : index
    %419 = vector.load %arg7[%c23_261, %c0_262, %c0_263] : memref<24x1x8xf32, #tpu.memory_space<vmem>>, vector<1x1x8xf32>
    %420 = vector.shape_cast %419 : vector<1x1x8xf32> to vector<1x8xf32>
    %421 = vector.broadcast %420 : vector<1x8xf32> to vector<5x8xf32>
    %422 = arith.addf %418, %421 : vector<5x8xf32>
    %cst_264 = arith.constant dense<0.000000e+00> : vector<5x5xf32>
    %423 = tpu.matmul %408, %415, %cst_264 {dimension_numbers = #tpu.dot_dimension_numbers<[1], [1], [0], [0], [0, 0, 1, 0], [], []>} : vector<5x8xf32>, vector<5x8xf32>, vector<5x5xf32> -> vector<5x5xf32>
    %cst_265 = arith.constant 0.353553385 : f32
    %424 = vector.broadcast %cst_265 : f32 to vector<5x5xf32>
    %425 = arith.mulf %423, %424 : vector<5x5xf32>
    %cst_266 = arith.constant dense<0xFF800000> : vector<5xf32>
    %426 = vector.multi_reduction <maximumf>, %425, %cst_266 [1] : vector<5x5xf32> to vector<5xf32>
    %427 = vector.shape_cast %426 : vector<5xf32> to vector<5x1xf32>
    %428 = vector.broadcast %427 : vector<5x1xf32> to vector<5x5xf32>
    %429 = arith.subf %425, %428 : vector<5x5xf32>
    %430 = math.exp %429 : vector<5x5xf32>
    %cst_267 = arith.constant dense<0.000000e+00> : vector<5xf32>
    %431 = vector.multi_reduction <add>, %430, %cst_267 [1] : vector<5x5xf32> to vector<5xf32>
    %432 = vector.shape_cast %431 : vector<5xf32> to vector<5x1xf32>
    %433 = tpu.reciprocal %432 {approx = true} : vector<5x1xf32> -> vector<5x1xf32>
    %434 = vector.broadcast %433 : vector<5x1xf32> to vector<5x5xf32>
    %435 = arith.mulf %430, %434 : vector<5x5xf32>
    %cst_268 = arith.constant dense<0.000000e+00> : vector<5x8xf32>
    %436 = tpu.matmul %435, %422, %cst_268 {dimension_numbers = #tpu.dot_dimension_numbers<[1], [0], [0], [1], [0, 0, 1, 1], [], []>} : vector<5x5xf32>, vector<5x8xf32>, vector<5x8xf32> -> vector<5x8xf32>
    %c7_269 = arith.constant 7 : index
    %c0_270 = arith.constant 0 : index
    %c0_271 = arith.constant 0 : index
    %437 = vector.load %arg8[%c7_269, %c0_270, %c0_271] : memref<8x8x32xf32, #tpu.memory_space<vmem>>, vector<1x8x32xf32>
    %438 = vector.shape_cast %437 : vector<1x8x32xf32> to vector<8x32xf32>
    %cst_272 = arith.constant dense<0.000000e+00> : vector<5x32xf32>
    %439 = tpu.matmul %436, %438, %cst_272 {dimension_numbers = #tpu.dot_dimension_numbers<[1], [0], [0], [1], [0, 0, 1, 1], [], []>} : vector<5x8xf32>, vector<8x32xf32>, vector<5x32xf32> -> vector<5x32xf32>
    %440 = arith.addf %401, %439 : vector<5x32xf32>
    %441 = arith.addf %261, %440 : vector<5x32xf32>
    %c1_273 = arith.constant 1 : index
    %c0_274 = arith.constant 0 : index
    %c0_275 = arith.constant 0 : index
    %442 = vector.load %arg9[%c1_273, %c0_274, %c0_275] : memref<2x1x32xf32, #tpu.memory_space<vmem>>, vector<1x1x32xf32>
    %443 = vector.shape_cast %442 : vector<1x1x32xf32> to vector<1x32xf32>
    %444 = vector.broadcast %443 : vector<1x32xf32> to vector<5x32xf32>
    %445 = arith.addf %441, %444 : vector<5x32xf32>
    %c3_276 = arith.constant 3 : index
    %c0_277 = arith.constant 0 : index
    %c0_278 = arith.constant 0 : index
    %446 = vector.load %arg5[%c3_276, %c0_277, %c0_278] : memref<4x2x32xf32, #tpu.memory_space<vmem>>, vector<1x2x32xf32>
    %447 = vector.shape_cast %446 : vector<1x2x32xf32> to vector<2x32xf32>
    %448 = vector.extract_strided_slice %447 {offsets = [0, 0], sizes = [1, 32], strides = [1, 1]} : vector<2x32xf32> to vector<1x32xf32>
    %449 = vector.extract_strided_slice %447 {offsets = [1, 0], sizes = [1, 32], strides = [1, 1]} : vector<2x32xf32> to vector<1x32xf32>
    %cst_279 = arith.constant dense<0.000000e+00> : vector<5xf32>
    %450 = vector.multi_reduction <add>, %445, %cst_279 [1] : vector<5x32xf32> to vector<5xf32>
    %451 = vector.shape_cast %450 : vector<5xf32> to vector<5x1xf32>
    %cst_280 = arith.constant 3.200000e+01 : f32
    %452 = vector.broadcast %cst_280 : f32 to vector<5x1xf32>
    %453 = arith.divf %451, %452 : vector<5x1xf32>
    %454 = vector.broadcast %453 : vector<5x1xf32> to vector<5x32xf32>
    %455 = arith.subf %445, %454 : vector<5x32xf32>
    %456 = arith.mulf %455, %455 : vector<5x32xf32>
    %cst_281 = arith.constant dense<0.000000e+00> : vector<5xf32>
    %457 = vector.multi_reduction <add>, %456, %cst_281 [1] : vector<5x32xf32> to vector<5xf32>
    %458 = vector.shape_cast %457 : vector<5xf32> to vector<5x1xf32>
    %cst_282 = arith.constant 3.200000e+01 : f32
    %459 = vector.broadcast %cst_282 : f32 to vector<5x1xf32>
    %460 = arith.divf %458, %459 : vector<5x1xf32>
    %cst_283 = arith.constant 9.99999974E-6 : f32
    %461 = vector.broadcast %cst_283 : f32 to vector<5x1xf32>
    %462 = arith.addf %460, %461 : vector<5x1xf32>
    %463 = math.rsqrt %462 : vector<5x1xf32>
    %464 = vector.broadcast %463 : vector<5x1xf32> to vector<5x32xf32>
    %465 = arith.mulf %455, %464 : vector<5x32xf32>
    %466 = vector.broadcast %448 : vector<1x32xf32> to vector<5x32xf32>
    %467 = arith.mulf %465, %466 : vector<5x32xf32>
    %468 = vector.broadcast %449 : vector<1x32xf32> to vector<5x32xf32>
    %469 = arith.addf %467, %468 : vector<5x32xf32>
    %c1_284 = arith.constant 1 : index
    %c0_285 = arith.constant 0 : index
    %c0_286 = arith.constant 0 : index
    %470 = vector.load %arg10[%c1_284, %c0_285, %c0_286] : memref<2x32x128xf32, #tpu.memory_space<vmem>>, vector<1x32x128xf32>
    %471 = vector.shape_cast %470 : vector<1x32x128xf32> to vector<32x128xf32>
    %cst_287 = arith.constant dense<0.000000e+00> : vector<5x128xf32>
    %472 = tpu.matmul %469, %471, %cst_287 {dimension_numbers = #tpu.dot_dimension_numbers<[1], [0], [0], [1], [0, 0, 1, 1], [], []>} : vector<5x32xf32>, vector<32x128xf32>, vector<5x128xf32> -> vector<5x128xf32>
    %c1_288 = arith.constant 1 : index
    %c0_289 = arith.constant 0 : index
    %c0_290 = arith.constant 0 : index
    %473 = vector.load %arg11[%c1_288, %c0_289, %c0_290] : memref<2x1x128xf32, #tpu.memory_space<vmem>>, vector<1x1x128xf32>
    %474 = vector.shape_cast %473 : vector<1x1x128xf32> to vector<1x128xf32>
    %475 = vector.broadcast %474 : vector<1x128xf32> to vector<5x128xf32>
    %476 = arith.addf %472, %475 : vector<5x128xf32>
    %cst_291 = arith.constant 1.702000e+00 : f32
    %477 = vector.broadcast %cst_291 : f32 to vector<5x128xf32>
    %478 = arith.mulf %477, %476 : vector<5x128xf32>
    %479 = arith.negf %478 : vector<5x128xf32>
    %480 = math.exp %479 : vector<5x128xf32>
    %cst_292 = arith.constant 1.000000e+00 : f32
    %481 = vector.broadcast %cst_292 : f32 to vector<5x128xf32>
    %482 = arith.addf %481, %480 : vector<5x128xf32>
    %483 = arith.divf %481, %482 : vector<5x128xf32>
    %484 = arith.mulf %476, %483 : vector<5x128xf32>
    %c1_293 = arith.constant 1 : index
    %c0_294 = arith.constant 0 : index
    %c0_295 = arith.constant 0 : index
    %485 = vector.load %arg12[%c1_293, %c0_294, %c0_295] : memref<2x128x32xf32, #tpu.memory_space<vmem>>, vector<1x128x32xf32>
    %486 = vector.shape_cast %485 : vector<1x128x32xf32> to vector<128x32xf32>
    %cst_296 = arith.constant dense<0.000000e+00> : vector<5x32xf32>
    %487 = tpu.matmul %484, %486, %cst_296 {dimension_numbers = #tpu.dot_dimension_numbers<[1], [0], [0], [1], [0, 0, 1, 1], [], []>} : vector<5x128xf32>, vector<128x32xf32>, vector<5x32xf32> -> vector<5x32xf32>
    %c1_297 = arith.constant 1 : index
    %c0_298 = arith.constant 0 : index
    %c0_299 = arith.constant 0 : index
    %488 = vector.load %arg13[%c1_297, %c0_298, %c0_299] : memref<2x1x32xf32, #tpu.memory_space<vmem>>, vector<1x1x32xf32>
    %489 = vector.shape_cast %488 : vector<1x1x32xf32> to vector<1x32xf32>
    %490 = vector.broadcast %489 : vector<1x32xf32> to vector<5x32xf32>
    %491 = arith.addf %487, %490 : vector<5x32xf32>
    %492 = arith.addf %445, %491 : vector<5x32xf32>
    %493 = vector.extract_strided_slice %492 {offsets = [0, 0], sizes = [1, 32], strides = [1, 1]} : vector<5x32xf32> to vector<1x32xf32>
    %c0_300 = arith.constant 0 : index
    %c0_301 = arith.constant 0 : index
    %494 = vector.load %arg14[%c0_300, %c0_301] : memref<2x32xf32, #tpu.memory_space<vmem>>, vector<2x32xf32>
    %495 = vector.extract_strided_slice %494 {offsets = [0, 0], sizes = [1, 32], strides = [1, 1]} : vector<2x32xf32> to vector<1x32xf32>
    %496 = vector.extract_strided_slice %494 {offsets = [1, 0], sizes = [1, 32], strides = [1, 1]} : vector<2x32xf32> to vector<1x32xf32>
    %cst_302 = arith.constant dense<0.000000e+00> : vector<1xf32>
    %497 = vector.multi_reduction <add>, %493, %cst_302 [1] : vector<1x32xf32> to vector<1xf32>
    %498 = vector.shape_cast %497 : vector<1xf32> to vector<1x1xf32>
    %cst_303 = arith.constant 3.200000e+01 : f32
    %499 = vector.broadcast %cst_303 : f32 to vector<1x1xf32>
    %500 = arith.divf %498, %499 : vector<1x1xf32>
    %501 = vector.broadcast %500 : vector<1x1xf32> to vector<1x32xf32>
    %502 = arith.subf %493, %501 : vector<1x32xf32>
    %503 = arith.mulf %502, %502 : vector<1x32xf32>
    %cst_304 = arith.constant dense<0.000000e+00> : vector<1xf32>
    %504 = vector.multi_reduction <add>, %503, %cst_304 [1] : vector<1x32xf32> to vector<1xf32>
    %505 = vector.shape_cast %504 : vector<1xf32> to vector<1x1xf32>
    %cst_305 = arith.constant 3.200000e+01 : f32
    %506 = vector.broadcast %cst_305 : f32 to vector<1x1xf32>
    %507 = arith.divf %505, %506 : vector<1x1xf32>
    %cst_306 = arith.constant 9.99999974E-6 : f32
    %508 = vector.broadcast %cst_306 : f32 to vector<1x1xf32>
    %509 = arith.addf %507, %508 : vector<1x1xf32>
    %510 = math.rsqrt %509 : vector<1x1xf32>
    %511 = vector.broadcast %510 : vector<1x1xf32> to vector<1x32xf32>
    %512 = arith.mulf %502, %511 : vector<1x32xf32>
    %513 = arith.mulf %512, %495 : vector<1x32xf32>
    %514 = arith.addf %513, %496 : vector<1x32xf32>
    %c0_307 = arith.constant 0 : index
    %c0_308 = arith.constant 0 : index
    %515 = vector.load %arg15[%c0_307, %c0_308] : memref<32x64xf32, #tpu.memory_space<vmem>>, vector<32x64xf32>
    %cst_309 = arith.constant dense<0.000000e+00> : vector<1x64xf32>
    %516 = tpu.matmul %514, %515, %cst_309 {dimension_numbers = #tpu.dot_dimension_numbers<[1], [0], [0], [1], [0, 0, 1, 1], [], []>} : vector<1x32xf32>, vector<32x64xf32>, vector<1x64xf32> -> vector<1x64xf32>
    %c0_310 = arith.constant 0 : index
    %c0_311 = arith.constant 0 : index
    %c0_312 = arith.constant 0 : index
    %517 = vector.load %arg16[%c0_310, %c0_311, %c0_312] : memref<5x64x64xf32, #tpu.memory_space<vmem>>, vector<1x64x64xf32>
    %518 = vector.shape_cast %517 : vector<1x64x64xf32> to vector<64x64xf32>
    %cst_313 = arith.constant dense<0.000000e+00> : vector<1x64xf32>
    %519 = tpu.matmul %516, %518, %cst_313 {dimension_numbers = #tpu.dot_dimension_numbers<[1], [0], [0], [1], [0, 0, 1, 1], [], []>} : vector<1x64xf32>, vector<64x64xf32>, vector<1x64xf32> -> vector<1x64xf32>
    %c0_314 = arith.constant 0 : index
    %c0_315 = arith.constant 0 : index
    %c0_316 = arith.constant 0 : index
    %520 = vector.load %arg17[%c0_314, %c0_315, %c0_316] : memref<5x1x64xf32, #tpu.memory_space<vmem>>, vector<1x1x64xf32>
    %521 = vector.shape_cast %520 : vector<1x1x64xf32> to vector<1x64xf32>
    %522 = arith.addf %519, %521 : vector<1x64xf32>
    %cst_317 = arith.constant 5.000000e-01 : f32
    %523 = vector.broadcast %cst_317 : f32 to vector<1x64xf32>
    %524 = arith.mulf %523, %522 : vector<1x64xf32>
    %cst_318 = arith.constant 0.707106769 : f32
    %525 = vector.broadcast %cst_318 : f32 to vector<1x64xf32>
    %526 = arith.mulf %522, %525 : vector<1x64xf32>
    %cst_319 = arith.constant 0.000000e+00 : f32
    %527 = vector.broadcast %cst_319 : f32 to vector<1x64xf32>
    %528 = arith.cmpf oge, %526, %527 : vector<1x64xf32>
    %cst_320 = arith.constant 1.000000e+00 : f32
    %cst_321 = arith.constant -1.000000e+00 : f32
    %529 = vector.broadcast %cst_320 : f32 to vector<1x64xf32>
    %530 = vector.broadcast %cst_321 : f32 to vector<1x64xf32>
    %531 = arith.select %528, %529, %530 : vector<1x64xi1>, vector<1x64xf32>
    %532 = math.absf %526 : vector<1x64xf32>
    %cst_322 = arith.constant 0.327591091 : f32
    %533 = vector.broadcast %cst_322 : f32 to vector<1x64xf32>
    %534 = arith.mulf %533, %532 : vector<1x64xf32>
    %cst_323 = arith.constant 1.000000e+00 : f32
    %535 = vector.broadcast %cst_323 : f32 to vector<1x64xf32>
    %536 = arith.addf %535, %534 : vector<1x64xf32>
    %cst_324 = arith.constant 1.000000e+00 : f32
    %537 = vector.broadcast %cst_324 : f32 to vector<1x64xf32>
    %538 = arith.divf %537, %536 : vector<1x64xf32>
    %cst_325 = arith.constant 1.06140542 : f32
    %539 = vector.broadcast %cst_325 : f32 to vector<1x64xf32>
    %540 = arith.mulf %539, %538 : vector<1x64xf32>
    %cst_326 = arith.constant -1.45315206 : f32
    %541 = vector.broadcast %cst_326 : f32 to vector<1x64xf32>
    %542 = arith.addf %540, %541 : vector<1x64xf32>
    %543 = arith.mulf %542, %538 : vector<1x64xf32>
    %cst_327 = arith.constant 1.42141378 : f32
    %544 = vector.broadcast %cst_327 : f32 to vector<1x64xf32>
    %545 = arith.addf %543, %544 : vector<1x64xf32>
    %546 = arith.mulf %545, %538 : vector<1x64xf32>
    %cst_328 = arith.constant -0.284496725 : f32
    %547 = vector.broadcast %cst_328 : f32 to vector<1x64xf32>
    %548 = arith.addf %546, %547 : vector<1x64xf32>
    %549 = arith.mulf %548, %538 : vector<1x64xf32>
    %cst_329 = arith.constant 0.254829586 : f32
    %550 = vector.broadcast %cst_329 : f32 to vector<1x64xf32>
    %551 = arith.addf %549, %550 : vector<1x64xf32>
    %552 = arith.mulf %551, %538 : vector<1x64xf32>
    %cst_330 = arith.constant 0.000000e+00 : f32
    %553 = vector.broadcast %cst_330 : f32 to vector<1x64xf32>
    %554 = arith.subf %553, %532 : vector<1x64xf32>
    %555 = arith.mulf %554, %532 : vector<1x64xf32>
    %556 = math.exp %555 : vector<1x64xf32>
    %557 = arith.mulf %552, %556 : vector<1x64xf32>
    %cst_331 = arith.constant 1.000000e+00 : f32
    %558 = vector.broadcast %cst_331 : f32 to vector<1x64xf32>
    %559 = arith.subf %558, %557 : vector<1x64xf32>
    %560 = arith.mulf %531, %559 : vector<1x64xf32>
    %cst_332 = arith.constant 1.000000e+00 : f32
    %561 = vector.broadcast %cst_332 : f32 to vector<1x64xf32>
    %562 = arith.addf %561, %560 : vector<1x64xf32>
    %563 = arith.mulf %524, %562 : vector<1x64xf32>
    %c1_333 = arith.constant 1 : index
    %c0_334 = arith.constant 0 : index
    %c0_335 = arith.constant 0 : index
    %564 = vector.load %arg16[%c1_333, %c0_334, %c0_335] : memref<5x64x64xf32, #tpu.memory_space<vmem>>, vector<1x64x64xf32>
    %565 = vector.shape_cast %564 : vector<1x64x64xf32> to vector<64x64xf32>
    %cst_336 = arith.constant dense<0.000000e+00> : vector<1x64xf32>
    %566 = tpu.matmul %563, %565, %cst_336 {dimension_numbers = #tpu.dot_dimension_numbers<[1], [0], [0], [1], [0, 0, 1, 1], [], []>} : vector<1x64xf32>, vector<64x64xf32>, vector<1x64xf32> -> vector<1x64xf32>
    %c1_337 = arith.constant 1 : index
    %c0_338 = arith.constant 0 : index
    %c0_339 = arith.constant 0 : index
    %567 = vector.load %arg17[%c1_337, %c0_338, %c0_339] : memref<5x1x64xf32, #tpu.memory_space<vmem>>, vector<1x1x64xf32>
    %568 = vector.shape_cast %567 : vector<1x1x64xf32> to vector<1x64xf32>
    %569 = arith.addf %566, %568 : vector<1x64xf32>
    %cst_340 = arith.constant 5.000000e-01 : f32
    %570 = vector.broadcast %cst_340 : f32 to vector<1x64xf32>
    %571 = arith.mulf %570, %569 : vector<1x64xf32>
    %cst_341 = arith.constant 0.707106769 : f32
    %572 = vector.broadcast %cst_341 : f32 to vector<1x64xf32>
    %573 = arith.mulf %569, %572 : vector<1x64xf32>
    %cst_342 = arith.constant 0.000000e+00 : f32
    %574 = vector.broadcast %cst_342 : f32 to vector<1x64xf32>
    %575 = arith.cmpf oge, %573, %574 : vector<1x64xf32>
    %cst_343 = arith.constant 1.000000e+00 : f32
    %cst_344 = arith.constant -1.000000e+00 : f32
    %576 = vector.broadcast %cst_343 : f32 to vector<1x64xf32>
    %577 = vector.broadcast %cst_344 : f32 to vector<1x64xf32>
    %578 = arith.select %575, %576, %577 : vector<1x64xi1>, vector<1x64xf32>
    %579 = math.absf %573 : vector<1x64xf32>
    %cst_345 = arith.constant 0.327591091 : f32
    %580 = vector.broadcast %cst_345 : f32 to vector<1x64xf32>
    %581 = arith.mulf %580, %579 : vector<1x64xf32>
    %cst_346 = arith.constant 1.000000e+00 : f32
    %582 = vector.broadcast %cst_346 : f32 to vector<1x64xf32>
    %583 = arith.addf %582, %581 : vector<1x64xf32>
    %cst_347 = arith.constant 1.000000e+00 : f32
    %584 = vector.broadcast %cst_347 : f32 to vector<1x64xf32>
    %585 = arith.divf %584, %583 : vector<1x64xf32>
    %cst_348 = arith.constant 1.06140542 : f32
    %586 = vector.broadcast %cst_348 : f32 to vector<1x64xf32>
    %587 = arith.mulf %586, %585 : vector<1x64xf32>
    %cst_349 = arith.constant -1.45315206 : f32
    %588 = vector.broadcast %cst_349 : f32 to vector<1x64xf32>
    %589 = arith.addf %587, %588 : vector<1x64xf32>
    %590 = arith.mulf %589, %585 : vector<1x64xf32>
    %cst_350 = arith.constant 1.42141378 : f32
    %591 = vector.broadcast %cst_350 : f32 to vector<1x64xf32>
    %592 = arith.addf %590, %591 : vector<1x64xf32>
    %593 = arith.mulf %592, %585 : vector<1x64xf32>
    %cst_351 = arith.constant -0.284496725 : f32
    %594 = vector.broadcast %cst_351 : f32 to vector<1x64xf32>
    %595 = arith.addf %593, %594 : vector<1x64xf32>
    %596 = arith.mulf %595, %585 : vector<1x64xf32>
    %cst_352 = arith.constant 0.254829586 : f32
    %597 = vector.broadcast %cst_352 : f32 to vector<1x64xf32>
    %598 = arith.addf %596, %597 : vector<1x64xf32>
    %599 = arith.mulf %598, %585 : vector<1x64xf32>
    %cst_353 = arith.constant 0.000000e+00 : f32
    %600 = vector.broadcast %cst_353 : f32 to vector<1x64xf32>
    %601 = arith.subf %600, %579 : vector<1x64xf32>
    %602 = arith.mulf %601, %579 : vector<1x64xf32>
    %603 = math.exp %602 : vector<1x64xf32>
    %604 = arith.mulf %599, %603 : vector<1x64xf32>
    %cst_354 = arith.constant 1.000000e+00 : f32
    %605 = vector.broadcast %cst_354 : f32 to vector<1x64xf32>
    %606 = arith.subf %605, %604 : vector<1x64xf32>
    %607 = arith.mulf %578, %606 : vector<1x64xf32>
    %cst_355 = arith.constant 1.000000e+00 : f32
    %608 = vector.broadcast %cst_355 : f32 to vector<1x64xf32>
    %609 = arith.addf %608, %607 : vector<1x64xf32>
    %610 = arith.mulf %571, %609 : vector<1x64xf32>
    %c2_356 = arith.constant 2 : index
    %c0_357 = arith.constant 0 : index
    %c0_358 = arith.constant 0 : index
    %611 = vector.load %arg16[%c2_356, %c0_357, %c0_358] : memref<5x64x64xf32, #tpu.memory_space<vmem>>, vector<1x64x64xf32>
    %612 = vector.shape_cast %611 : vector<1x64x64xf32> to vector<64x64xf32>
    %cst_359 = arith.constant dense<0.000000e+00> : vector<1x64xf32>
    %613 = tpu.matmul %610, %612, %cst_359 {dimension_numbers = #tpu.dot_dimension_numbers<[1], [0], [0], [1], [0, 0, 1, 1], [], []>} : vector<1x64xf32>, vector<64x64xf32>, vector<1x64xf32> -> vector<1x64xf32>
    %c2_360 = arith.constant 2 : index
    %c0_361 = arith.constant 0 : index
    %c0_362 = arith.constant 0 : index
    %614 = vector.load %arg17[%c2_360, %c0_361, %c0_362] : memref<5x1x64xf32, #tpu.memory_space<vmem>>, vector<1x1x64xf32>
    %615 = vector.shape_cast %614 : vector<1x1x64xf32> to vector<1x64xf32>
    %616 = arith.addf %613, %615 : vector<1x64xf32>
    %cst_363 = arith.constant 5.000000e-01 : f32
    %617 = vector.broadcast %cst_363 : f32 to vector<1x64xf32>
    %618 = arith.mulf %617, %616 : vector<1x64xf32>
    %cst_364 = arith.constant 0.707106769 : f32
    %619 = vector.broadcast %cst_364 : f32 to vector<1x64xf32>
    %620 = arith.mulf %616, %619 : vector<1x64xf32>
    %cst_365 = arith.constant 0.000000e+00 : f32
    %621 = vector.broadcast %cst_365 : f32 to vector<1x64xf32>
    %622 = arith.cmpf oge, %620, %621 : vector<1x64xf32>
    %cst_366 = arith.constant 1.000000e+00 : f32
    %cst_367 = arith.constant -1.000000e+00 : f32
    %623 = vector.broadcast %cst_366 : f32 to vector<1x64xf32>
    %624 = vector.broadcast %cst_367 : f32 to vector<1x64xf32>
    %625 = arith.select %622, %623, %624 : vector<1x64xi1>, vector<1x64xf32>
    %626 = math.absf %620 : vector<1x64xf32>
    %cst_368 = arith.constant 0.327591091 : f32
    %627 = vector.broadcast %cst_368 : f32 to vector<1x64xf32>
    %628 = arith.mulf %627, %626 : vector<1x64xf32>
    %cst_369 = arith.constant 1.000000e+00 : f32
    %629 = vector.broadcast %cst_369 : f32 to vector<1x64xf32>
    %630 = arith.addf %629, %628 : vector<1x64xf32>
    %cst_370 = arith.constant 1.000000e+00 : f32
    %631 = vector.broadcast %cst_370 : f32 to vector<1x64xf32>
    %632 = arith.divf %631, %630 : vector<1x64xf32>
    %cst_371 = arith.constant 1.06140542 : f32
    %633 = vector.broadcast %cst_371 : f32 to vector<1x64xf32>
    %634 = arith.mulf %633, %632 : vector<1x64xf32>
    %cst_372 = arith.constant -1.45315206 : f32
    %635 = vector.broadcast %cst_372 : f32 to vector<1x64xf32>
    %636 = arith.addf %634, %635 : vector<1x64xf32>
    %637 = arith.mulf %636, %632 : vector<1x64xf32>
    %cst_373 = arith.constant 1.42141378 : f32
    %638 = vector.broadcast %cst_373 : f32 to vector<1x64xf32>
    %639 = arith.addf %637, %638 : vector<1x64xf32>
    %640 = arith.mulf %639, %632 : vector<1x64xf32>
    %cst_374 = arith.constant -0.284496725 : f32
    %641 = vector.broadcast %cst_374 : f32 to vector<1x64xf32>
    %642 = arith.addf %640, %641 : vector<1x64xf32>
    %643 = arith.mulf %642, %632 : vector<1x64xf32>
    %cst_375 = arith.constant 0.254829586 : f32
    %644 = vector.broadcast %cst_375 : f32 to vector<1x64xf32>
    %645 = arith.addf %643, %644 : vector<1x64xf32>
    %646 = arith.mulf %645, %632 : vector<1x64xf32>
    %cst_376 = arith.constant 0.000000e+00 : f32
    %647 = vector.broadcast %cst_376 : f32 to vector<1x64xf32>
    %648 = arith.subf %647, %626 : vector<1x64xf32>
    %649 = arith.mulf %648, %626 : vector<1x64xf32>
    %650 = math.exp %649 : vector<1x64xf32>
    %651 = arith.mulf %646, %650 : vector<1x64xf32>
    %cst_377 = arith.constant 1.000000e+00 : f32
    %652 = vector.broadcast %cst_377 : f32 to vector<1x64xf32>
    %653 = arith.subf %652, %651 : vector<1x64xf32>
    %654 = arith.mulf %625, %653 : vector<1x64xf32>
    %cst_378 = arith.constant 1.000000e+00 : f32
    %655 = vector.broadcast %cst_378 : f32 to vector<1x64xf32>
    %656 = arith.addf %655, %654 : vector<1x64xf32>
    %657 = arith.mulf %618, %656 : vector<1x64xf32>
    %c3_379 = arith.constant 3 : index
    %c0_380 = arith.constant 0 : index
    %c0_381 = arith.constant 0 : index
    %658 = vector.load %arg16[%c3_379, %c0_380, %c0_381] : memref<5x64x64xf32, #tpu.memory_space<vmem>>, vector<1x64x64xf32>
    %659 = vector.shape_cast %658 : vector<1x64x64xf32> to vector<64x64xf32>
    %cst_382 = arith.constant dense<0.000000e+00> : vector<1x64xf32>
    %660 = tpu.matmul %657, %659, %cst_382 {dimension_numbers = #tpu.dot_dimension_numbers<[1], [0], [0], [1], [0, 0, 1, 1], [], []>} : vector<1x64xf32>, vector<64x64xf32>, vector<1x64xf32> -> vector<1x64xf32>
    %c3_383 = arith.constant 3 : index
    %c0_384 = arith.constant 0 : index
    %c0_385 = arith.constant 0 : index
    %661 = vector.load %arg17[%c3_383, %c0_384, %c0_385] : memref<5x1x64xf32, #tpu.memory_space<vmem>>, vector<1x1x64xf32>
    %662 = vector.shape_cast %661 : vector<1x1x64xf32> to vector<1x64xf32>
    %663 = arith.addf %660, %662 : vector<1x64xf32>
    %cst_386 = arith.constant 5.000000e-01 : f32
    %664 = vector.broadcast %cst_386 : f32 to vector<1x64xf32>
    %665 = arith.mulf %664, %663 : vector<1x64xf32>
    %cst_387 = arith.constant 0.707106769 : f32
    %666 = vector.broadcast %cst_387 : f32 to vector<1x64xf32>
    %667 = arith.mulf %663, %666 : vector<1x64xf32>
    %cst_388 = arith.constant 0.000000e+00 : f32
    %668 = vector.broadcast %cst_388 : f32 to vector<1x64xf32>
    %669 = arith.cmpf oge, %667, %668 : vector<1x64xf32>
    %cst_389 = arith.constant 1.000000e+00 : f32
    %cst_390 = arith.constant -1.000000e+00 : f32
    %670 = vector.broadcast %cst_389 : f32 to vector<1x64xf32>
    %671 = vector.broadcast %cst_390 : f32 to vector<1x64xf32>
    %672 = arith.select %669, %670, %671 : vector<1x64xi1>, vector<1x64xf32>
    %673 = math.absf %667 : vector<1x64xf32>
    %cst_391 = arith.constant 0.327591091 : f32
    %674 = vector.broadcast %cst_391 : f32 to vector<1x64xf32>
    %675 = arith.mulf %674, %673 : vector<1x64xf32>
    %cst_392 = arith.constant 1.000000e+00 : f32
    %676 = vector.broadcast %cst_392 : f32 to vector<1x64xf32>
    %677 = arith.addf %676, %675 : vector<1x64xf32>
    %cst_393 = arith.constant 1.000000e+00 : f32
    %678 = vector.broadcast %cst_393 : f32 to vector<1x64xf32>
    %679 = arith.divf %678, %677 : vector<1x64xf32>
    %cst_394 = arith.constant 1.06140542 : f32
    %680 = vector.broadcast %cst_394 : f32 to vector<1x64xf32>
    %681 = arith.mulf %680, %679 : vector<1x64xf32>
    %cst_395 = arith.constant -1.45315206 : f32
    %682 = vector.broadcast %cst_395 : f32 to vector<1x64xf32>
    %683 = arith.addf %681, %682 : vector<1x64xf32>
    %684 = arith.mulf %683, %679 : vector<1x64xf32>
    %cst_396 = arith.constant 1.42141378 : f32
    %685 = vector.broadcast %cst_396 : f32 to vector<1x64xf32>
    %686 = arith.addf %684, %685 : vector<1x64xf32>
    %687 = arith.mulf %686, %679 : vector<1x64xf32>
    %cst_397 = arith.constant -0.284496725 : f32
    %688 = vector.broadcast %cst_397 : f32 to vector<1x64xf32>
    %689 = arith.addf %687, %688 : vector<1x64xf32>
    %690 = arith.mulf %689, %679 : vector<1x64xf32>
    %cst_398 = arith.constant 0.254829586 : f32
    %691 = vector.broadcast %cst_398 : f32 to vector<1x64xf32>
    %692 = arith.addf %690, %691 : vector<1x64xf32>
    %693 = arith.mulf %692, %679 : vector<1x64xf32>
    %cst_399 = arith.constant 0.000000e+00 : f32
    %694 = vector.broadcast %cst_399 : f32 to vector<1x64xf32>
    %695 = arith.subf %694, %673 : vector<1x64xf32>
    %696 = arith.mulf %695, %673 : vector<1x64xf32>
    %697 = math.exp %696 : vector<1x64xf32>
    %698 = arith.mulf %693, %697 : vector<1x64xf32>
    %cst_400 = arith.constant 1.000000e+00 : f32
    %699 = vector.broadcast %cst_400 : f32 to vector<1x64xf32>
    %700 = arith.subf %699, %698 : vector<1x64xf32>
    %701 = arith.mulf %672, %700 : vector<1x64xf32>
    %cst_401 = arith.constant 1.000000e+00 : f32
    %702 = vector.broadcast %cst_401 : f32 to vector<1x64xf32>
    %703 = arith.addf %702, %701 : vector<1x64xf32>
    %704 = arith.mulf %665, %703 : vector<1x64xf32>
    %c4_402 = arith.constant 4 : index
    %c0_403 = arith.constant 0 : index
    %c0_404 = arith.constant 0 : index
    %705 = vector.load %arg16[%c4_402, %c0_403, %c0_404] : memref<5x64x64xf32, #tpu.memory_space<vmem>>, vector<1x64x64xf32>
    %706 = vector.shape_cast %705 : vector<1x64x64xf32> to vector<64x64xf32>
    %cst_405 = arith.constant dense<0.000000e+00> : vector<1x64xf32>
    %707 = tpu.matmul %704, %706, %cst_405 {dimension_numbers = #tpu.dot_dimension_numbers<[1], [0], [0], [1], [0, 0, 1, 1], [], []>} : vector<1x64xf32>, vector<64x64xf32>, vector<1x64xf32> -> vector<1x64xf32>
    %c4_406 = arith.constant 4 : index
    %c0_407 = arith.constant 0 : index
    %c0_408 = arith.constant 0 : index
    %708 = vector.load %arg17[%c4_406, %c0_407, %c0_408] : memref<5x1x64xf32, #tpu.memory_space<vmem>>, vector<1x1x64xf32>
    %709 = vector.shape_cast %708 : vector<1x1x64xf32> to vector<1x64xf32>
    %710 = arith.addf %707, %709 : vector<1x64xf32>
    %711 = arith.mulf %710, %710 : vector<1x64xf32>
    %cst_409 = arith.constant dense<0.000000e+00> : vector<1xf32>
    %712 = vector.multi_reduction <add>, %711, %cst_409 [1] : vector<1x64xf32> to vector<1xf32>
    %713 = vector.shape_cast %712 : vector<1xf32> to vector<1x1xf32>
    %cst_410 = arith.constant 1.000000e-24 : f32
    %714 = vector.broadcast %cst_410 : f32 to vector<1x1xf32>
    %715 = arith.maximumf %713, %714 : vector<1x1xf32>
    %716 = math.rsqrt %715 : vector<1x1xf32>
    %717 = vector.broadcast %716 : vector<1x1xf32> to vector<1x64xf32>
    %718 = arith.mulf %710, %717 : vector<1x64xf32>
    %c0_411 = arith.constant 0 : index
    %c0_412 = arith.constant 0 : index
    %c0_413 = arith.constant 0 : index
    %719 = vector.load %arg18[%c0_411, %c0_412, %c0_413] : memref<3x64x16xf32, #tpu.memory_space<vmem>>, vector<1x64x16xf32>
    %720 = vector.shape_cast %719 : vector<1x64x16xf32> to vector<64x16xf32>
    %cst_414 = arith.constant dense<0.000000e+00> : vector<1x16xf32>
    %721 = tpu.matmul %718, %720, %cst_414 {dimension_numbers = #tpu.dot_dimension_numbers<[1], [0], [0], [1], [0, 0, 1, 1], [], []>} : vector<1x64xf32>, vector<64x16xf32>, vector<1x16xf32> -> vector<1x16xf32>
    %c1_415 = arith.constant 1 : index
    %c0_416 = arith.constant 0 : index
    %c0_417 = arith.constant 0 : index
    %722 = vector.load %arg18[%c1_415, %c0_416, %c0_417] : memref<3x64x16xf32, #tpu.memory_space<vmem>>, vector<1x64x16xf32>
    %723 = vector.shape_cast %722 : vector<1x64x16xf32> to vector<64x16xf32>
    %cst_418 = arith.constant dense<0.000000e+00> : vector<1x16xf32>
    %724 = tpu.matmul %718, %723, %cst_418 {dimension_numbers = #tpu.dot_dimension_numbers<[1], [0], [0], [1], [0, 0, 1, 1], [], []>} : vector<1x64xf32>, vector<64x16xf32>, vector<1x16xf32> -> vector<1x16xf32>
    %725 = arith.maximumf %721, %724 : vector<1x16xf32>
    %c2_419 = arith.constant 2 : index
    %c0_420 = arith.constant 0 : index
    %c0_421 = arith.constant 0 : index
    %726 = vector.load %arg18[%c2_419, %c0_420, %c0_421] : memref<3x64x16xf32, #tpu.memory_space<vmem>>, vector<1x64x16xf32>
    %727 = vector.shape_cast %726 : vector<1x64x16xf32> to vector<64x16xf32>
    %cst_422 = arith.constant dense<0.000000e+00> : vector<1x16xf32>
    %728 = tpu.matmul %718, %727, %cst_422 {dimension_numbers = #tpu.dot_dimension_numbers<[1], [0], [0], [1], [0, 0, 1, 1], [], []>} : vector<1x64xf32>, vector<64x16xf32>, vector<1x16xf32> -> vector<1x16xf32>
    %729 = arith.maximumf %725, %728 : vector<1x16xf32>
    %730 = arith.index_cast %1 : i32 to index
    %c0_423 = arith.constant 0 : index
    %731 = memref.load %arg19[%730, %c0_423] : memref<2x4xf32, #tpu.memory_space<smem>>
    %732 = arith.index_cast %1 : i32 to index
    %c1_424 = arith.constant 1 : index
    %733 = memref.load %arg19[%732, %c1_424] : memref<2x4xf32, #tpu.memory_space<smem>>
    %734 = arith.index_cast %1 : i32 to index
    %c2_425 = arith.constant 2 : index
    %735 = memref.load %arg19[%734, %c2_425] : memref<2x4xf32, #tpu.memory_space<smem>>
    %736 = arith.index_cast %1 : i32 to index
    %c3_426 = arith.constant 3 : index
    %737 = memref.load %arg19[%736, %c3_426] : memref<2x4xf32, #tpu.memory_space<smem>>
    %738 = arith.index_cast %1 : i32 to index
    %739 = memref.load %arg20[%738] : memref<2xi32, #tpu.memory_space<smem>>
    %740 = tpu.iota {dimensions = array<i32: 1>} : vector<1x16xi32>
    %741 = vector.broadcast %739 : i32 to vector<1x16xi32>
    %742 = arith.cmpi eq, %740, %741 : vector<1x16xi32>
    %743 = arith.extui %742 : vector<1x16xi1> to vector<1x16xi32>
    %744 = arith.sitofp %743 : vector<1x16xi32> to vector<1x16xf32>
    %745 = arith.mulf %729, %729 : vector<1x16xf32>
    %cst_427 = arith.constant 1.000000e+00 : f32
    %746 = vector.broadcast %cst_427 : f32 to vector<1x16xf32>
    %747 = arith.subf %746, %745 : vector<1x16xf32>
    %cst_428 = arith.constant 0.000000e+00 : f32
    %748 = vector.broadcast %cst_428 : f32 to vector<1x16xf32>
    %749 = arith.maximumf %747, %748 : vector<1x16xf32>
    %750 = math.sqrt %749 : vector<1x16xf32>
    %751 = vector.broadcast %731 : f32 to vector<1x16xf32>
    %752 = arith.mulf %729, %751 : vector<1x16xf32>
    %753 = vector.broadcast %733 : f32 to vector<1x16xf32>
    %754 = arith.mulf %750, %753 : vector<1x16xf32>
    %755 = arith.subf %752, %754 : vector<1x16xf32>
    %756 = vector.broadcast %735 : f32 to vector<1x16xf32>
    %757 = arith.cmpf ogt, %729, %756 : vector<1x16xf32>
    %758 = vector.broadcast %737 : f32 to vector<1x16xf32>
    %759 = arith.subf %729, %758 : vector<1x16xf32>
    %760 = arith.select %757, %755, %759 : vector<1x16xi1>, vector<1x16xf32>
    %761 = arith.mulf %744, %760 : vector<1x16xf32>
    %cst_429 = arith.constant 1.000000e+00 : f32
    %762 = vector.broadcast %cst_429 : f32 to vector<1x16xf32>
    %763 = arith.subf %762, %744 : vector<1x16xf32>
    %764 = arith.mulf %763, %729 : vector<1x16xf32>
    %765 = arith.addf %761, %764 : vector<1x16xf32>
    %cst_430 = arith.constant 4.500000e+01 : f32
    %766 = vector.broadcast %cst_430 : f32 to vector<1x16xf32>
    %767 = arith.mulf %765, %766 : vector<1x16xf32>
    %c0_431 = arith.constant 0 : index
    %c0_432 = arith.constant 0 : index
    %c0_433 = arith.constant 0 : index
    %768 = vector.load %arg21[%c0_431, %c0_432, %c0_433] : memref<1x1x16xf32, #tpu.memory_space<vmem>>, vector<1x1x16xf32>
    %769 = vector.shape_cast %768 : vector<1x1x16xf32> to vector<1x16xf32>
    %770 = vector.shape_cast %767 : vector<1x16xf32> to vector<1x1x16xf32>
    tpu.vector_store %arg21[%c0_431, %c0_432, %c0_433], %770 {strides = array<i32>} : memref<1x1x16xf32, #tpu.memory_space<vmem>>, vector<1x1x16xf32>,
    return
  }
  func.func @transform_0(%arg0: i32) -> (i32, i32, i32) {
    %c0_i32 = arith.constant 0 : i32
    %c0_i32_0 = arith.constant 0 : i32
    %c0_i32_1 = arith.constant 0 : i32
    return %arg0, %c0_i32, %c0_i32_0 : i32, i32, i32
  }
  func.func @transform_1(%arg0: i32) -> (i32, i32) {
    %c0_i32 = arith.constant 0 : i32
    %c0_i32_0 = arith.constant 0 : i32
    %c0_i32_1 = arith.constant 0 : i32
    return %c0_i32, %c0_i32_0 : i32, i32
  }
  func.func @transform_2(%arg0: i32) -> (i32, i32) {
    %c0_i32 = arith.constant 0 : i32
    %c0_i32_0 = arith.constant 0 : i32
    %c0_i32_1 = arith.constant 0 : i32
    return %c0_i32, %c0_i32_0 : i32, i32
  }
  func.func @transform_3(%arg0: i32) -> (i32, i32) {
    %c0_i32 = arith.constant 0 : i32
    %c0_i32_0 = arith.constant 0 : i32
    %c0_i32_1 = arith.constant 0 : i32
    return %c0_i32, %c0_i32_0 : i32, i32
  }
  func.func @transform_4(%arg0: i32) -> (i32, i32, i32) {
    %c0_i32 = arith.constant 0 : i32
    %c0_i32_0 = arith.constant 0 : i32
    %c0_i32_1 = arith.constant 0 : i32
    %c0_i32_2 = arith.constant 0 : i32
    return %c0_i32, %c0_i32_0, %c0_i32_1 : i32, i32, i32
  }
  func.func @transform_5(%arg0: i32) -> (i32, i32, i32) {
    %c0_i32 = arith.constant 0 : i32
    %c0_i32_0 = arith.constant 0 : i32
    %c0_i32_1 = arith.constant 0 : i32
    %c0_i32_2 = arith.constant 0 : i32
    return %c0_i32, %c0_i32_0, %c0_i32_1 : i32, i32, i32
  }
  func.func @transform_6(%arg0: i32) -> (i32, i32, i32) {
    %c0_i32 = arith.constant 0 : i32
    %c0_i32_0 = arith.constant 0 : i32
    %c0_i32_1 = arith.constant 0 : i32
    %c0_i32_2 = arith.constant 0 : i32
    return %c0_i32, %c0_i32_0, %c0_i32_1 : i32, i32, i32
  }
  func.func @transform_7(%arg0: i32) -> (i32, i32, i32) {
    %c0_i32 = arith.constant 0 : i32
    %c0_i32_0 = arith.constant 0 : i32
    %c0_i32_1 = arith.constant 0 : i32
    %c0_i32_2 = arith.constant 0 : i32
    return %c0_i32, %c0_i32_0, %c0_i32_1 : i32, i32, i32
  }
  func.func @transform_8(%arg0: i32) -> (i32, i32, i32) {
    %c0_i32 = arith.constant 0 : i32
    %c0_i32_0 = arith.constant 0 : i32
    %c0_i32_1 = arith.constant 0 : i32
    %c0_i32_2 = arith.constant 0 : i32
    return %c0_i32, %c0_i32_0, %c0_i32_1 : i32, i32, i32
  }
  func.func @transform_9(%arg0: i32) -> (i32, i32, i32) {
    %c0_i32 = arith.constant 0 : i32
    %c0_i32_0 = arith.constant 0 : i32
    %c0_i32_1 = arith.constant 0 : i32
    %c0_i32_2 = arith.constant 0 : i32
    return %c0_i32, %c0_i32_0, %c0_i32_1 : i32, i32, i32
  }
  func.func @transform_10(%arg0: i32) -> (i32, i32, i32) {
    %c0_i32 = arith.constant 0 : i32
    %c0_i32_0 = arith.constant 0 : i32
    %c0_i32_1 = arith.constant 0 : i32
    %c0_i32_2 = arith.constant 0 : i32
    return %c0_i32, %c0_i32_0, %c0_i32_1 : i32, i32, i32
  }
  func.func @transform_11(%arg0: i32) -> (i32, i32, i32) {
    %c0_i32 = arith.constant 0 : i32
    %c0_i32_0 = arith.constant 0 : i32
    %c0_i32_1 = arith.constant 0 : i32
    %c0_i32_2 = arith.constant 0 : i32
    return %c0_i32, %c0_i32_0, %c0_i32_1 : i32, i32, i32
  }
  func.func @transform_12(%arg0: i32) -> (i32, i32, i32) {
    %c0_i32 = arith.constant 0 : i32
    %c0_i32_0 = arith.constant 0 : i32
    %c0_i32_1 = arith.constant 0 : i32
    %c0_i32_2 = arith.constant 0 : i32
    return %c0_i32, %c0_i32_0, %c0_i32_1 : i32, i32, i32
  }
  func.func @transform_13(%arg0: i32) -> (i32, i32) {
    %c0_i32 = arith.constant 0 : i32
    %c0_i32_0 = arith.constant 0 : i32
    %c0_i32_1 = arith.constant 0 : i32
    return %c0_i32, %c0_i32_0 : i32, i32
  }
  func.func @transform_14(%arg0: i32) -> (i32, i32) {
    %c0_i32 = arith.constant 0 : i32
    %c0_i32_0 = arith.constant 0 : i32
    %c0_i32_1 = arith.constant 0 : i32
    return %c0_i32, %c0_i32_0 : i32, i32
  }
  func.func @transform_15(%arg0: i32) -> (i32, i32, i32) {
    %c0_i32 = arith.constant 0 : i32
    %c0_i32_0 = arith.constant 0 : i32
    %c0_i32_1 = arith.constant 0 : i32
    %c0_i32_2 = arith.constant 0 : i32
    return %c0_i32, %c0_i32_0, %c0_i32_1 : i32, i32, i32
  }
  func.func @transform_16(%arg0: i32) -> (i32, i32, i32) {
    %c0_i32 = arith.constant 0 : i32
    %c0_i32_0 = arith.constant 0 : i32
    %c0_i32_1 = arith.constant 0 : i32
    %c0_i32_2 = arith.constant 0 : i32
    return %c0_i32, %c0_i32_0, %c0_i32_1 : i32, i32, i32
  }
  func.func @transform_17(%arg0: i32) -> (i32, i32, i32) {
    %c0_i32 = arith.constant 0 : i32
    %c0_i32_0 = arith.constant 0 : i32
    %c0_i32_1 = arith.constant 0 : i32
    %c0_i32_2 = arith.constant 0 : i32
    return %c0_i32, %c0_i32_0, %c0_i32_1 : i32, i32, i32
  }
  func.func @transform_18(%arg0: i32) -> (i32, i32) {
    %c0_i32 = arith.constant 0 : i32
    %c0_i32_0 = arith.constant 0 : i32
    %c0_i32_1 = arith.constant 0 : i32
    return %c0_i32, %c0_i32_0 : i32, i32
  }
  func.func @transform_19(%arg0: i32) -> i32 {
    %c0_i32 = arith.constant 0 : i32
    %c0_i32_0 = arith.constant 0 : i32
    return %c0_i32 : i32
  }
  func.func @transform_20(%arg0: i32) -> (i32, i32, i32) {
    %c0_i32 = arith.constant 0 : i32
    %c0_i32_0 = arith.constant 0 : i32
    %c0_i32_1 = arith.constant 0 : i32
    return %arg0, %c0_i32, %c0_i32_0 : i32, i32, i32
  }
}

</mosaic_0001>

<bundles_post_ra>
// kernel: clipvitl_model3_forward.1
= control target key start
LH: loop header
LB: loop body
LE: loop exit
PB: predicated region body
PF: predicated region fallthrough
CT: control target
= control target key end

     0   :  { %s9312_s0 = inlined_call_operand.vmem [shape: f32[2,5,192], index: 0, kind: input, shape index: {}]   ;;  %s9313_s1 = inlined_call_operand.vmem [shape: f32[192,32], index: 1, kind: input, shape index: {}]   ;;  %s9314_s2 = inlined_call_operand.vmem [shape: f32[5,32], index: 2, kind: input, shape index: {}]   ;;  %s9315_s3 = inlined_call_operand.vmem [shape: f32[2,32], index: 3, kind: input, shape index: {}]   ;;  %s9316_s4 = inlined_call_operand.vmem [shape: f32[4,2,32], index: 4, kind: input, shape index: {}]   ;;  %s9317_s5 = inlined_call_operand.vmem [shape: f32[24,32,8], index: 5, kind: input, shape index: {}]   ;;  %s9318_s6 = inlined_call_operand.vmem [shape: f32[24,1,8], index: 6, kind: input, shape index: {}]   ;;  %s9319_s7 = inlined_call_operand.vmem [shape: f32[8,8,32], index: 7, kind: input, shape index: {}]   ;;  %s9320_s8 = inlined_call_operand.vmem [shape: f32[2,1,32], index: 8, kind: input, shape index: {}]   ;;  %s9321_s9 = inlined_call_operand.vmem [shape: f32[2,32,128], index: 9, kind: input, shape index: {}]   ;;  %s9322_s10 = inlined_call_operand.vmem [shape: f32[2,1,128], index: 10, kind: input, shape index: {}]   ;;  %s9323_s11 = inlined_call_operand.vmem [shape: f32[2,128,32], index: 11, kind: input, shape index: {}]   ;;  %s9324_s12 = inlined_call_operand.vmem [shape: f32[2,1,32], index: 12, kind: input, shape index: {}]   ;;  %s9325_s13 = inlined_call_operand.vmem [shape: f32[2,32], index: 13, kind: input, shape index: {}]   ;;  %s9326_s14 = inlined_call_operand.vmem [shape: f32[32,64], index: 14, kind: input, shape index: {}]   ;;  %s9327_s15 = inlined_call_operand.vmem [shape: f32[5,64,64], index: 15, kind: input, shape index: {}]   ;;  %s9328_s16 = inlined_call_operand.vmem [shape: f32[5,1,64], index: 16, kind: input, shape index: {}]   ;;  %s9329_s17 = inlined_call_operand.vmem [shape: f32[3,64,16], index: 17, kind: input, shape index: {}]   ;;  %s9330_s18 = inlined_call_operand.vmem [shape: f32[2,4], index: 18, kind: input, shape index: {}]   ;;  %s9331_s19 = inlined_call_operand.vmem [shape: s32[2], index: 19, kind: input, shape index: {}]   ;;  %s9332_s20 = inlined_call_operand.hbm [shape: f32[2,1,16], index: 20, kind: output, shape index: {}]  }
   0x1   :  { %9341 = sst [smem:[#allocation14_spill]] %s9312_s0 }
   0x2   :  { %9342 = sst [smem:[#allocation15_spill]] %s9313_s1 }
   0x3   :  { %9343 = sst [smem:[#allocation16_spill]] %s9314_s2 }
   0x4   :  { %9344 = sst [smem:[#allocation17_spill]] %s9315_s3 }
   0x5   :  { %9345 = sst [smem:[#allocation18_spill]] %s9316_s4 }
   0x6   :  { %9346 = sst [smem:[#allocation19_spill]] %s9317_s5 }
   0x7   :  { %9347 = sst [smem:[#allocation20_spill]] %s9318_s6 }
   0x8   :  { %9348 = sst [smem:[#allocation21_spill]] %s9319_s7 }
   0x9   :  { %9349 = sst [smem:[#allocation22_spill]] %s9330_s18 }
   0xa   :  { %9350 = sst [smem:[#allocation23_spill]] %s9331_s19 }
   0xb   :  { %25 = vsyncpa [#allocation4], 0 }
   0xc   :  { %26 = vsyncpa [#allocation6], 0 }
   0xd   :  { %27 = vsyncpa [#allocation3], 0 }
   0xe   :  { %29 = vsyncpa [#allocation3 + $0x1], 0  ;;  %s7793_s1 = smov 0   ;;  %s7795_s22 = smov 0  }
   0xf   :  { %s7797_s23 = smov 0   ;;  %s7799_s24 = smov 0  }
  0x10 LB: > { %9351 = sst [smem:[#allocation11_spill]] %s7676_s23  ;;  %s7814_s2 = sadd.s32 4294967295, %s7680_s24   ;;  %s7680_s24 = sphi %s7799_s24, %s9376_s24   ;;  %s7676_s23 = sphi %s7797_s23, %s9378_s23   ;;  %s7672_s22 = sphi %s7795_s22, %s9380_s22   ;;  %s7668_s1 = sphi %s7793_s1, %s9379_s1  }
  0x11   : > { %s6195_s25 = sadd.s32 4294967294, %s7680_s24   ;;  %s7818_s3 = sadd.s32 1, %s7680_s24  }
  0x12   : > { %9352 = sst [smem:[#allocation12_spill]] %s7818_s3  ;;  %s467_s26 = sadd.s32 1, %s7676_s23 }
  0x13   : > { %s464_s27 = ssub.s32 %s7680_s24, %s7818_s3  ;;  %p477_p0 = scmp.ne.s32.totalorder %s7676_s23, %s7672_s22 }
  0x14   : > { %p465_p1 = scmp.eq.s32.totalorder %s464_s27, 0  ;;  %p478_p2 = scmp.eq.s32.totalorder %s7814_s2, 1 }
  0x15   : > { %p483_p3 = scmp.ne.s32.totalorder %s7672_s22, %s7668_s1  ;;  %p484_p4 = scmp.eq.s32.totalorder %s6195_s25, 1 }
  0x16   : > { %s7829_s28 = scalar_select %p465_p1, %s7676_s23, %s467_s26  }
  0x17   : > { %p7831_p5 = por %p478_p2, %p477_p0  ;;  %p7835_p6 = por %p484_p4, %p483_p3 }
  0x18   : > { %9353 = sst [smem:[#allocation13_spill]] %s7829_s28  ;;  %p6196_p7 = scmp.ge.s32.totalorder %s7680_s24, 1 }
  0x19   : > { %s9354_s4 = scalar_select %p7831_p5, 1, 0 }
  0x1a   : > { %s9355_s29 = scalar_select %p7835_p6, 1, 0 }
  0x1b   : > { %p491_p8 = scmp.lt.s32.totalorder %s7680_s24, 3  ;;  %p9338_p9 = scmp.eq.s32.totalorder %s7814_s2, 0 }
  0x1c   : > { %s9357_s18 = sld [smem:[#allocation22_spill]] }
  0x1d   : > { %p7842_p10 = pnand %p6196_p7, %p491_p8  ;;  %s9358_s19 = sld [smem:[#allocation23_spill]] }
  0x1f   : > { %s9356_s30 = scalar_select %p7842_p10, 1, 0 }
  0x20   : > { %p7457_p11 = pneg %p7842_p10 }
  0x22   : > { %s555_s25 = sshll.u32 %s9357_s18, 4  ;;  %p7856_p12 = pnand %p9338_p9, %p7457_p11  ;;  %s556_s25 = int_to_ptr.vmem [resolvable:$true] %s555_s25 }
  0x23   : > { %s566_s28 = sshll.u32 %s9358_s19, 4  ;;  %s7582_s3 = scalar_lea.vmem %s556_s25, 32  ;;  %s567_s28 = int_to_ptr.vmem [resolvable:$true] %s566_s28 }
  0x24   : > { %p7583_p13 = scmp.ne.s32.totalorder %s556_s25, %s7582_s3  ;;  %p7584_p0 = pneg %p7856_p12 }
  0x25   : > { %p7590_p3 = scmp.lt.s32.totalorder %s556_s25, %s556_s25  ;;  %p7591_p4 = scmp.lt.s32.totalorder %s7582_s3, %s7582_s3 }
  0x26   : > { %p7585_p1 = pnand %p7584_p0, %p7583_p13 }
  0x27   : > { %p7592_p7 = por %p7591_p4, %p7590_p3 }
  0x28   : > { %p7586_p2 = pneg %p7585_p1 }
  0x2a   : > { %p7593_p8 = pnand %p7592_p7, %p7586_p2 }
  0x2c   : > { %7596 = shalt.err (!%p7593_p8)
}
  0x2d   : > { %s7682_s0 = smov [#allocation2]   ;;  %s7597_s21 = scalar_lea.vmem %s567_s28, 16 }
  0x2e   : > { %7460 = dma.vmem_to_smem (!%p7856_p12), %s556_s25, 32, %s7682_s0, [#allocation4]  }
  0x2f   : > { %p7598_p11 = scmp.ne.s32.totalorder %s567_s28, %s7597_s21  ;;  %p7605_p5 = scmp.lt.s32.totalorder %s567_s28, %s567_s28 }
  0x30   : > { %p7606_p10 = scmp.lt.s32.totalorder %s7597_s21, %s7597_s21 }
  0x31   : > { %p7600_p9 = pnand %p7598_p11, %p7584_p0 }
  0x32   : > { %p7607_p13 = por %p7606_p10, %p7605_p5 }
  0x33   : > { %p7601_p6 = pneg %p7600_p9 }
  0x35   : > { %p7608_p1 = pnand %p7607_p13, %p7601_p6 }
  0x37   : > { %7611 = shalt.err (!%p7608_p1)
}
  0x38   : > { %s7683_s26 = smov [#allocation5]   ;;  %p9360_p2 = scmp.ne.s32.totalorder %s9356_s30, 0 }
  0x39   : > { %7463 = dma.vmem_to_smem (!%p7856_p12), %s567_s28, 16, %s7683_s26, [#allocation6]  }
  0x3a   : > { %587 = sbr.rel (%p9360_p2) target bundleno = 12071 (0x2f27), region = 100  ;;  %p9361_p3 = scmp.eq.s32.totalorder (!%p9360_p2), %s7814_s2, 0 }
  0x3f   : > { %7655 = dma.done.wait (%p9361_p3), [#allocation4], 32   ;;  %p9362_p4 = pmov %p9361_p3 }
  0x40   : > { %p9363_p9 = pmov %p9361_p3 }
  0x41   : > { %7657 = vsyncadd (%p9362_p4), [#allocation4], 4294967264 }
  0x42   : > { %7659 = dma.done.wait (%p9363_p9), [#allocation6], 16   ;;  %p9364_p5 = pmov %p9361_p3 }
  0x44   : > { %7661 = vsyncadd (%p9364_p5), [#allocation6], 4294967280 }
  0x45   : > { %597 = sfence }
  0x46   : > { %s9365_s23 = sld [smem:[#allocation15_spill]]  ;;  %p649_p6 = scmp.lt.s32.totalorder %s7814_s2, 1  ;;  %v7684_v1 = vmov 0.0   ;;  %vm681_vm0 = vcmask 523264   ;;  %vm756_vm1 = vcmask 258048   ;;  %v771_v40 = vlaneseq }
  0x47   : > { %685 = vmatprep.subr.mxu0 %v7684_v1  ;;  %6808 = vmatprep.subr.mxu1 %v7684_v1  ;;  %s9367_s18 = sld [smem:[#allocation14_spill]]  ;;  %vm7685_vm2 = vmmov 0   ;;  %vm816_vm3 = vcmask 261120   ;;  %vm1056_vm4 = vcmask 64512   ;;  %vm1150_vm5 = vcmask 1044480   ;;  %s647_s25 = sand.u32 1, %s7672_s22  }
  0x48   : > { %s650_s0 = scalar_select %p649_p6, %s7814_s2, 1  ;;  %v772_v41 = vshrl.u32 %v771_v40, 7  ;;  %6816 = vmatprep.mubr.msk.f32.mxu1 %vm7685_vm2, %v7684_v1  ;;  %vm1134_vm6 = vcmask 36864   ;;  %vm1146_vm7 = vcmask 39936   ;;  %vm5192_vm8 = vcmask 253952  }
  0x49   : > { %s9369_s30 = sld [smem:[#allocation17_spill]]  ;;  %vm5815_vm13 = vcmask 516096   ;;  %p9374_p12 = scmp.ne.s32.totalorder %s9354_s4, 0 }
  0x4a   : > { %s6518_s3 = sshll.u32 %s650_s0, 4  ;;  %v7990_v42 = vsub.s32 0, %v772_v41  ;;  %v7995_v44 = vsub.s32 1, %v772_v41  ;;  %s9370_s5 = sld [smem:[#allocation19_spill]] }
  0x4b   : > { %s9371_s21 = sld [smem:[#allocation18_spill]] }
  0x4c   : > { %s9366_s27 = smov %s9365_s23  ;;  %v671_v0 = vld [vmem:[%s9365_s23 + $0x78] sm:$0xff]  ;;  %s9368_s23 = sld [smem:[#allocation16_spill]] }
  0x4d   : > { %v670_v2 = vld [vmem:[%s9366_s27 + $0x70] sm:$0xff]  ;;  %686 = vmatpush1.msra.mxu0 %v671_v0  ;;  %v669_v3 = vld [vmem:[%s9366_s27 + $0x68] sm:$0xff]  ;;  %v668_v4 = vld [vmem:[%s9366_s27 + $0x60] sm:$0xff]  ;;  %s7897_s19 = scalar_lea.vmem %s9367_s18, %s6518_s3  ;;  %s9372_s6 = sld [smem:[#allocation20_spill]] }
  0x4e   : > { %687 = vmatprep.subr.mxu0 %v7684_v1  ;;  %v667_v5 = vld [vmem:[%s9366_s27 + $0x58] sm:$0xff]  ;;  %v655_v6 = vld [vmem:[%s7897_s19 + $0x8] sm:$0x1f]  ;;  %v666_v7 = vld [vmem:[%s9366_s27 + $0x50] sm:$0xff]  ;;  %s9373_s7 = sld [smem:[#allocation21_spill]]  ;;  %s6513_s3 = sshll.u32 %s7814_s2, 7 }
  0x4f   : > { %688 = vmatpush1.msra.mxu0 %v670_v2  ;;  %6205 = vmatprep.mubr.msk.f32.mxu0 %vm681_vm0, %v655_v6  ;;  %v665_v8 = vld [vmem:[%s9366_s27 + $0x48] sm:$0xff]  ;;  %v664_v9 = vld [vmem:[%s9366_s27 + $0x40] sm:$0xff]  ;;  %v663_v10 = vld [vmem:[%s9366_s27 + $0x38] sm:$0xff]  ;;  %s6071_s18 = sld [smem:[#allocation5 + %s7814_s2]]  ;;  %s6069_s28 = sadd.s32 3, %s6513_s3 }
  0x50   : > { %689 = vmatprep.subr.mxu0 %v7684_v1  ;;  %v662_v11 = vld [vmem:[%s9366_s27 + $0x30] sm:$0xff]  ;;  %v661_v12 = vld [vmem:[%s9366_s27 + $0x28] sm:$0xff]  ;;  %v660_v13 = vld [vmem:[%s9366_s27 + $0x20] sm:$0xff]  ;;  %s6067_s26 = sadd.s32 2, %s6513_s3 }
  0x51   : > { %690 = vmatpush1.msra.mxu0 %v669_v3  ;;  %v659_v14 = vld [vmem:[%s9366_s27 + $0x18] sm:$0xff]  ;;  %v658_v15 = vld [vmem:[%s9366_s27 + $0x10] sm:$0xff]  ;;  %v657_v16 = vld [vmem:[%s9366_s27 + $0x8] sm:$0xff]  ;;  %s6068_s0 = sld [smem:[#allocation2 + %s6067_s26]]  ;;  %s6106_s26 = scalar_lea.sflag [#allocation3], %s647_s25 }
  0x52   : > { %691 = vmatprep.subr.mxu0 %v7684_v1  ;;  %v656_v17 = vld [vmem:[%s9366_s27] sm:$0xff]  ;;  %v679_v18 = vld [vmem:[%s9366_s27 + $0xb8] sm:$0xff]  ;;  %v678_v19 = vld [vmem:[%s9366_s27 + $0xb0] sm:$0xff] }
  0x53   : > { %692 = vmatpush1.msra.mxu0 %v668_v4  ;;  %v677_v20 = vld [vmem:[%s9366_s27 + $0xa8] sm:$0xff]  ;;  %v676_v21 = vld [vmem:[%s9366_s27 + $0xa0] sm:$0xff]  ;;  %v675_v22 = vld [vmem:[%s9366_s27 + $0x98] sm:$0xff] }
  0x54   : > { %693 = vmatprep.subr.mxu0 %v7684_v1  ;;  %v674_v23 = vld [vmem:[%s9366_s27 + $0x90] sm:$0xff]  ;;  %v673_v24 = vld [vmem:[%s9366_s27 + $0x88] sm:$0xff]  ;;  %v672_v25 = vld [vmem:[%s9366_s27 + $0x80] sm:$0xff] }
  0x55   : > { %694 = vmatpush1.msra.mxu0 %v667_v5  ;;  %v654_v26 = vld [vmem:[%s7897_s19] sm:$0x1f]  ;;  %v808_v57 = vld [vmem:[%s9370_s5 + $0x18] sm:$0xff]  ;;  %v807_v58 = vld [vmem:[%s9370_s5 + $0x10] sm:$0xff]  ;;  %s6064_s19 = sld [smem:[#allocation2 + %s6513_s3]] }
  0x56   : > { %695 = vmatprep.subr.mxu0 %v7684_v1  ;;  %v680_v27 = vld [vmem:[%s9368_s23] sm:$0x1f]  ;;  %6809 = vmatpush3.msra.mxu1 %v808_v57  ;;  %v806_v59 = vld [vmem:[%s9370_s5 + $0x8] sm:$0xff]  ;;  %v6229_v41 = vld [vmem:[%s9370_s5 + $0x38] sm:$0xff]  ;;  %s6065_s23 = sadd.s32 1, %s6513_s3  ;;  %s648_s3 = scalar_lea.vmem [#allocation7], %s647_s25 }
  0x57   : > { %696 = vmatpush1.msra.mxu0 %v666_v7  ;;  %v755_v43 = vld [vmem:[%s9369_s30] sm:$0x3]  ;;  %6810 = vmatprep.subr.mxu1 %v7684_v1  ;;  %s6066_s30 = sld [smem:[#allocation2 + %s6065_s23]]  ;;  %s6118_s23 = sshll.u32 %s648_s3, 4  ;;  %s6119_s23 = int_to_ptr.vmem [resolvable:$true] %s6118_s23 }
  0x58   : > { %697 = vmatprep.subr.mxu0 %v7684_v1  ;;  %v774_v45 = vrot.slane %v755_v43, %v7990_v42  ;;  %v779_v48 = vrot.slane %v755_v43, %v7995_v44  ;;  %6811 = vmatpush3.msra.mxu1 %v807_v58  ;;  %v805_v60 = vld [vmem:[%s9370_s5] sm:$0xff]  ;;  %v6228_v43 = vld [vmem:[%s9370_s5 + $0x30] sm:$0xff] }
  0x59   : > { %698 = vmatpush1.msra.mxu0 %v665_v8  ;;  %6812 = vmatprep.subr.mxu1 %v7684_v1  ;;  %v781_v0 = vld [vmem:[%s9371_s21] sm:$0x3]  ;;  %v6211_v8 = vld [vmem:[%s9370_s5 + $0x98] sm:$0xff] }
  0x5a   : > { %699 = vmatprep.subr.mxu0 %v7684_v1  ;;  %6813 = vmatpush3.msra.mxu1 %v806_v59  ;;  %v798_v2 = vrot.slane %v781_v0, %v7990_v42  ;;  %v803_v4 = vrot.slane %v781_v0, %v7995_v44 }
  0x5b   : > { %700 = vmatpush1.msra.mxu0 %v664_v9  ;;  %6814 = vmatprep.subr.mxu1 %v7684_v1  ;;  %v6210_v9 = vld [vmem:[%s9370_s5 + $0x90] sm:$0xff] }
  0x5c   : > { %701 = vmatprep.subr.mxu0 %v7684_v1  ;;  %6815 = vmatpush3.msra.mxu1 %v805_v60  ;;  %v6238_v60 = vld [vmem:[%s9372_s6 + $0x5] ss:$0 sm:$0xff] }
  0x5d   : > { %702 = vmatpush1.msra.mxu0 %v663_v10  ;;  %6819 = vmatprep.subr.mxu1 %v7684_v1  ;;  %v6209_v10 = vld [vmem:[%s9370_s5 + $0x88] sm:$0xff] }
  0x5e   : > { %703 = vmatprep.subr.mxu0 %v7684_v1 }
  0x5f   : > { %704 = vmatpush1.msra.mxu0 %v662_v11  ;;  %v6208_v11 = vld [vmem:[%s9370_s5 + $0x80] sm:$0xff] }
  0x60   : > { %705 = vmatprep.subr.mxu0 %v7684_v1 }
  0x61   : > { %706 = vmatpush1.msra.mxu0 %v661_v12  ;;  %v6218_v12 = vld [vmem:[%s9370_s5 + $0x118] sm:$0xff] }
  0x62   : > { %707 = vmatprep.subr.mxu0 %v7684_v1 }
  0x63   : > { %708 = vmatpush1.msra.mxu0 %v660_v13  ;;  %v6217_v13 = vld [vmem:[%s9370_s5 + $0x110] sm:$0xff] }
  0x64   : > { %709 = vmatprep.subr.mxu0 %v7684_v1 }
  0x65   : > { %710 = vmatpush1.msra.mxu0 %v659_v14  ;;  %v6216_v14 = vld [vmem:[%s9370_s5 + $0x108] sm:$0xff] }
  0x66   : > { %711 = vmatprep.subr.mxu0 %v7684_v1 }
  0x67   : > { %712 = vmatpush1.msra.mxu0 %v658_v15  ;;  %v6215_v15 = vld [vmem:[%s9370_s5 + $0x100] sm:$0xff] }
  0x68   : > { %713 = vmatprep.subr.mxu0 %v7684_v1 }
  0x69   : > { %714 = vmatpush1.msra.mxu0 %v657_v16 }
  0x6a   : > { %715 = vmatprep.subr.mxu0 %v7684_v1 }
  0x6b   : > { %716 = vmatpush1.msra.mxu0 %v656_v17 }
  0x6c   : > { %733 = vmatprep.subr.mxu0 %v7684_v1 }
  0x6d   : > { %734 = vmatpush2.msra.mxu0 %v679_v18  ;;  %v6213_v18 = vld [vmem:[%s9372_s6 + $0x4] ss:$0 sm:$0xff] }
  0x6e   : > { %735 = vmatprep.subr.mxu0 %v7684_v1 }
  0x6f   : > { %736 = vmatpush2.msra.mxu0 %v678_v19 }
  0x70   : > { %737 = vmatprep.subr.mxu0 %v7684_v1 }
  0x71   : > { %738 = vmatpush2.msra.mxu0 %v677_v20  ;;  %v6206_v20 = vld [vmem:[%s9372_s6] ss:$0 sm:$0xff] }
  0x72   : > { %739 = vmatprep.subr.mxu0 %v7684_v1 }
  0x73   : > { %740 = vmatpush2.msra.mxu0 %v676_v21 }
  0x74   : > { %741 = vmatprep.subr.mxu0 %v7684_v1 }
  0x75   : > { %742 = vmatpush2.msra.mxu0 %v675_v22 }
  0x76   : > { %743 = vmatprep.subr.mxu0 %v7684_v1 }
  0x77   : > { %744 = vmatpush2.msra.mxu0 %v674_v23 }
  0x78   : > { %745 = vmatprep.subr.mxu0 %v7684_v1 }
  0x79   : > { %746 = vmatpush2.msra.mxu0 %v673_v24  ;;  %v6220_v24 = vld [vmem:[%s9372_s6 + $0x8] ss:$0 sm:$0xff] }
  0x7a   : > { %747 = vmatprep.subr.mxu0 %v7684_v1 }
  0x7b   : > { %748 = vmatpush2.msra.mxu0 %v672_v25 }
  0x7c   : > { %750 = vmatmul.mubr.f32.vlgmr.msra.gmra.mxu0 %v654_v26  ;;  %6894 = vmatprep.subr.mxu0 %v7684_v1 }
  0x7d   : > { %6896 = vmatprep.mubr.msk.f32.mxu0 %vm7685_vm2, %v7684_v1 }
 0x13c   : > { %v751_v28 = vpop.f32.mrf.mxu0 }
 0x13d   : > { %v752_v29 = vadd.f32 %v751_v28, %v680_v27 }
 0x13e   : > { %v753_v30 = vpop.f32.mrf.mxu0 }
 0x13f   : > { %v757_v31 = vsel %vm756_vm1, %v752_v29, 0.0 }
 0x140   : > { %758 = vadd.xlane.f32.xlu0 %v757_v31 }
 0x1c9   : > { %v759_v32 = vpop.xlane.xlu0 %758 }
 0x1ca   : > { %v761_v33 = vmul.f32 0.03125, %v759_v32 }
 0x1cc   : > { %v762_v34 = vsub.f32 %v752_v29, %v761_v33 }
 0x1ce   : > { %v763_v35 = vmul.f32 %v762_v34, %v762_v34 }
 0x1d0   : > { %v764_v36 = vsel %vm756_vm1, %v763_v35, 0.0 }
 0x1d1   : > { %765 = vadd.xlane.f32.xlu0 %v764_v36 }
 0x25a   : > { %v766_v37 = vpop.xlane.xlu0 %765 }
 0x25b   : > { %v767_v38 = vmul.f32 0.03125, %v766_v37 }
 0x25d   : > { %v768_v39 = vadd.f32 1e-05, %v767_v38 }
 0x25f   : > { %7510 = vrsqrt.f32 %v768_v39 }
 0x26c   : > { %v7511_v46 = vpop.eup %7510 }
 0x26d   : > { %v770_v47 = vmul.f32 %v7511_v46, %v762_v34  ;;  %v6226_v46 = vld [vmem:[%s9370_s5 + $0x20] sm:$0xff] }
 0x26f   : > { %v775_v49 = vmul.f32 %v774_v45, %v770_v47  ;;  %v6227_v45 = vld [vmem:[%s9370_s5 + $0x28] sm:$0xff]  ;;  %v6236_v47 = vld [vmem:[%s9370_s5 + $0xb8] sm:$0xff] }
 0x271   : > { %v7999_v50 = vadd.f32 %v779_v48, %v775_v49  ;;  %v6235_v48 = vld [vmem:[%s9370_s5 + $0xb0] sm:$0xff]  ;;  %v6234_v49 = vld [vmem:[%s9370_s5 + $0xa8] sm:$0xff] }
 0x273   : > { %v782_v51 = vsel %vm756_vm1, %v7999_v50, 0.0 }
 0x274   : > { %783 = vadd.xlane.f32.xlu1 %v782_v51  ;;  %v6233_v51 = vld [vmem:[%s9370_s5 + $0xa0] sm:$0xff] }
 0x2fd   : > { %v784_v52 = vpop.xlane.xlu1 %783 }
 0x2fe   : > { %v785_v53 = vmul.f32 0.03125, %v784_v52  ;;  %v6243_v52 = vld [vmem:[%s9370_s5 + $0x138] sm:$0xff] }
 0x300   : > { %v786_v54 = vsub.f32 %v7999_v50, %v785_v53  ;;  %v6242_v53 = vld [vmem:[%s9370_s5 + $0x130] sm:$0xff] }
 0x302   : > { %v787_v55 = vmul.f32 %v786_v54, %v786_v54 }
 0x304   : > { %v788_v56 = vsel %vm756_vm1, %v787_v55, 0.0  ;;  %v6240_v55 = vld [vmem:[%s9370_s5 + $0x120] sm:$0xff] }
 0x305   : > { %789 = vadd.xlane.f32.xlu1 %v788_v56 }
 0x38e   : > { %v790_v61 = vpop.xlane.xlu1 %789 }
 0x38f   : > { %v791_v62 = vmul.f32 0.03125, %v790_v61 }
 0x391   : > { %v792_v63 = vadd.f32 1e-05, %v791_v62  ;;  %v6231_v62 = vld [vmem:[%s9372_s6 + $0x1] ss:$0 sm:$0xff] }
 0x393   : > { %7512 = vrsqrt.f32 %v792_v63 }
 0x3a0   : > { %v7513_v3 = vpop.eup %7512 }
 0x3a1   : > { %v794_v5 = vmul.f32 %v7513_v3, %v786_v54  ;;  %v6241_v54 = vld [vmem:[%s9370_s5 + $0x128] sm:$0xff] }
 0x3a2   : > { %v6245_v3 = vld [vmem:[%s9372_s6 + $0x9] ss:$0 sm:$0xff] }
 0x3a3   : > { %v799_v6 = vmul.f32 %v798_v2, %v794_v5 }
 0x3a5   : > { %v8030_v7 = vadd.f32 %v803_v4, %v799_v6 }
 0x3a7   : > { %6817 = vmatmul.mubr.msk.f32.vlgmr.msra.gmra.mxu1 %vm816_vm3, %v8030_v7 }
 0x3a8   : > { %6820 = vmatpush3.msra.mxu1 %v6211_v8  ;;  %6827 = vmatprep.mubr.msk.f32.mxu1 %vm7685_vm2, %v7684_v1 }
 0x3a9   : > { %6821 = vmatprep.subr.mxu1 %v7684_v1 }
 0x3aa   : > { %6822 = vmatpush3.msra.mxu1 %v6210_v9 }
 0x3ab   : > { %6823 = vmatprep.subr.mxu1 %v7684_v1 }
 0x3ac   : > { %6824 = vmatpush3.msra.mxu1 %v6209_v10 }
 0x3ad   : > { %6825 = vmatprep.subr.mxu1 %v7684_v1 }
 0x3ae   : > { %6826 = vmatpush3.msra.mxu1 %v6208_v11 }
 0x3af   : > { %6828 = vmatmul.mubr.msk.f32.vlgmr.msra.gmra.mxu1 %vm816_vm3, %v8030_v7  ;;  %6830 = vmatprep.subr.mxu1 %v7684_v1 }
 0x3b0   : > { %6831 = vmatpush3.msra.mxu1 %v6218_v12  ;;  %6838 = vmatprep.mubr.msk.f32.mxu1 %vm7685_vm2, %v7684_v1 }
 0x3b1   : > { %6832 = vmatprep.subr.mxu1 %v7684_v1 }
 0x3b2   : > { %6833 = vmatpush3.msra.mxu1 %v6217_v13 }
 0x3b3   : > { %6834 = vmatprep.subr.mxu1 %v7684_v1 }
 0x3b4   : > { %6835 = vmatpush3.msra.mxu1 %v6216_v14 }
 0x3b5   : > { %6836 = vmatprep.subr.mxu1 %v7684_v1 }
 0x3b6   : > { %6837 = vmatpush3.msra.mxu1 %v6215_v15 }
 0x3b7   : > { %6839 = vmatmul.mubr.msk.f32.vlgmr.msra.gmra.mxu1 %vm816_vm3, %v8030_v7  ;;  %6841 = vmatprep.subr.mxu1 %v7684_v1 }
 0x3b8   : > { %6843 = vmatprep.mubr.msk.f32.mxu1 %vm7685_vm2, %v7684_v1 }
 0x467   : > { %v886_v16 = vpop.f32.mrf.mxu1 }
 0x468   : > { %v887_v23 = vadd.f32 %v6206_v20, %v886_v16 }
 0x469   : > { %v6818_v17 = vpop.f32.mrf.mxu1 }
 0x46a   : > { %v6251_v17 = vld [vmem:[%s9373_s7 + $0x8] sm:$0xff] }
 0x46b   : > { %6895 = vmatpush3.msra.mxu0 %v6251_v17  ;;  %v6290_v17 = vld [vmem:[%s9370_s5 + $0xf0] sm:$0xff] }
 0x46c   : > { %6904 = vmatprep.subr.mxu0 %v7684_v1 }
 0x46f   : > { %v969_v19 = vpop.f32.mrf.mxu1 }
 0x470   : > { %v970_v21 = vadd.f32 %v6213_v18, %v969_v19 }
 0x471   : > { %v6829_v22 = vpop.f32.mrf.mxu1 }
 0x472   : > { %6842 = vmatpush3.xpose.msk.msra.mxu1 %vm1056_vm4, %v970_v21  ;;  %v1224_v21 = vld [vmem:[%s9373_s7] sm:$0xff]  ;;  %v6264_v22 = vld [vmem:[%s9370_s5 + $0xd8] sm:$0xff] }
 0x473   : > { %6846 = vmatprep.subr.mxu1 %v7684_v1 }
 0x475   : > { %6844 = vmatmul.mubr.msk.f32.vlgmr.msra.gmra.mxu1 %vm1056_vm4, %v887_v23  ;;  %v6263_v23 = vld [vmem:[%s9370_s5 + $0xd0] sm:$0xff] }
 0x476   : > { %6848 = vmatprep.mubr.msk.f32.mxu1 %vm7685_vm2, %v7684_v1 }
 0x477   : > { %v1052_v25 = vpop.f32.mrf.mxu1 }
 0x478   : > { %v1053_v26 = vadd.f32 %v6220_v24, %v1052_v25  ;;  %v6262_v24 = vld [vmem:[%s9370_s5 + $0xc8] sm:$0xff]  ;;  %v6261_v25 = vld [vmem:[%s9370_s5 + $0xc0] sm:$0xff] }
 0x479   : > { %v6840_v27 = vpop.f32.mrf.mxu1 }
 0x47a   : > { %6847 = vmatpush3.msk.msra.mxu1 %vm1150_vm5, %v1053_v26  ;;  %v6257_v26 = vld [vmem:[%s9370_s5 + $0x58] sm:$0xff] }
 0x47b   : > { %6851 = vmatprep.subr.mxu1 %v7684_v1 }
 0x535   : > { %v1129_v28 = vpop.f32.mrf.mxu1 }
 0x536   : > { %v1133_v29 = vmul.f32 0.35355338, %v1129_v28  ;;  %v6256_v28 = vld [vmem:[%s9370_s5 + $0x50] sm:$0xff] }
 0x537   : > { %v6845_v30 = vpop.f32.mrf.mxu1 }
 0x538   : > { %v1135_v31 = vsel %vm1134_vm6, %v1133_v29, -inf  ;;  %v6255_v30 = vld [vmem:[%s9370_s5 + $0x48] sm:$0xff] }
 0x539   : > { %1136 = vmax.xlane.f32.xlu0 %v1135_v31 }
 0x5c2   : > { %v1137_v32 = vpop.xlane.xlu0 %1136 }
 0x5c3   : > { %v1138_v33 = vsub.f32 %v1133_v29, %v1137_v32  ;;  %v6254_v32 = vld [vmem:[%s9370_s5 + $0x40] sm:$0xff] }
 0x5c5   : > { %v1139_v34 = vmul.f32 1.442695, %v1138_v33 }
 0x5c7   : > { %7514 = vpow2.f32 %v1139_v34  ;;  %v6271_v34 = vld [vmem:[%s9370_s5 + $0x158] sm:$0xff] }
 0x5d4   : > { %v7515_v35 = vpop.eup %7514 }
 0x5d5   : > { %v1141_v36 = vsel %vm1134_vm6, %v7515_v35, 0.0 }
 0x5d6   : > { %1142 = vadd.xlane.f32.xlu1 %v1141_v36  ;;  %v6266_v36 = vld [vmem:[%s9372_s6 + $0x6] ss:$0 sm:$0xff] }
 0x65f   : > { %v1143_v37 = vpop.xlane.xlu1 %1142 }
 0x660   : > { %7516 = vrcp.f32 %v1143_v37  ;;  %v6269_v37 = vld [vmem:[%s9370_s5 + $0x148] sm:$0xff] }
 0x66d   : > { %v7517_v38 = vpop.eup %7516 }
 0x66e   : > { %v1145_v39 = vmul.f32 %v7517_v38, %v7515_v35  ;;  %v6270_v35 = vld [vmem:[%s9370_s5 + $0x150] sm:$0xff] }
 0x670   : > { %6849 = vmatmul.mubr.msk.f32.vlgmr.msra.gmra.mxu1 %vm1146_vm7, %v1145_v39 }
 0x671   : > { %6852 = vmatpush3.msra.mxu1 %v6229_v41  ;;  %6859 = vmatprep.mubr.msk.f32.mxu1 %vm7685_vm2, %v7684_v1  ;;  %v6268_v41 = vld [vmem:[%s9370_s5 + $0x140] sm:$0xff] }
 0x672   : > { %6853 = vmatprep.subr.mxu1 %v7684_v1 }
 0x673   : > { %6854 = vmatpush3.msra.mxu1 %v6228_v43 }
 0x674   : > { %6855 = vmatprep.subr.mxu1 %v7684_v1 }
 0x675   : > { %6856 = vmatpush3.msra.mxu1 %v6227_v45 }
 0x676   : > { %6857 = vmatprep.subr.mxu1 %v7684_v1 }
 0x677   : > { %6858 = vmatpush3.msra.mxu1 %v6226_v46 }
 0x678   : > { %6860 = vmatmul.mubr.msk.f32.vlgmr.msra.gmra.mxu1 %vm816_vm3, %v8030_v7  ;;  %6862 = vmatprep.subr.mxu1 %v7684_v1 }
 0x679   : > { %6863 = vmatpush3.msra.mxu1 %v6236_v47  ;;  %6870 = vmatprep.mubr.msk.f32.mxu1 %vm7685_vm2, %v7684_v1  ;;  %v6259_v47 = vld [vmem:[%s9372_s6 + $0x2] ss:$0 sm:$0xff] }
 0x67a   : > { %6864 = vmatprep.subr.mxu1 %v7684_v1 }
 0x67b   : > { %6865 = vmatpush3.msra.mxu1 %v6235_v48 }
 0x67c   : > { %6866 = vmatprep.subr.mxu1 %v7684_v1 }
 0x67d   : > { %6867 = vmatpush3.msra.mxu1 %v6234_v49 }
 0x67e   : > { %6868 = vmatprep.subr.mxu1 %v7684_v1 }
 0x67f   : > { %6869 = vmatpush3.msra.mxu1 %v6233_v51 }
 0x680   : > { %6871 = vmatmul.mubr.msk.f32.vlgmr.msra.gmra.mxu1 %vm816_vm3, %v8030_v7  ;;  %6873 = vmatprep.subr.mxu1 %v7684_v1 }
 0x681   : > { %6874 = vmatpush3.msra.mxu1 %v6243_v52  ;;  %6881 = vmatprep.mubr.msk.f32.mxu1 %vm7685_vm2, %v7684_v1  ;;  %v6273_v52 = vld [vmem:[%s9372_s6 + $0xa] ss:$0 sm:$0xff] }
 0x682   : > { %6875 = vmatprep.subr.mxu1 %v7684_v1 }
 0x683   : > { %6876 = vmatpush3.msra.mxu1 %v6242_v53 }
 0x684   : > { %6877 = vmatprep.subr.mxu1 %v7684_v1 }
 0x685   : > { %6878 = vmatpush3.msra.mxu1 %v6241_v54 }
 0x686   : > { %6879 = vmatprep.subr.mxu1 %v7684_v1 }
 0x687   : > { %6880 = vmatpush3.msra.mxu1 %v6240_v55 }
 0x688   : > { %6882 = vmatmul.mubr.msk.f32.vlgmr.msra.gmra.mxu1 %vm816_vm3, %v8030_v7  ;;  %6884 = vmatprep.subr.mxu1 %v7684_v1 }
 0x689   : > { %6886 = vmatprep.mubr.msk.f32.mxu1 %vm7685_vm2, %v7684_v1 }
 0x730   : > { %v1220_v56 = vpop.f32.mrf.mxu1 }
 0x732   : > { %v6850_v57 = vpop.f32.mrf.mxu1 }
 0x738   : > { %v1304_v58 = vpop.f32.mrf.mxu1 }
 0x739   : > { %v1305_v2 = vadd.f32 %v6231_v62, %v1304_v58 }
 0x73a   : > { %v6861_v59 = vpop.f32.mrf.mxu1 }
 0x740   : > { %v1387_v61 = vpop.f32.mrf.mxu1 }
 0x741   : > { %v1388_v63 = vadd.f32 %v6238_v60, %v1387_v61 }
 0x742   : > { %v6872_v0 = vpop.f32.mrf.mxu1 }
 0x743   : > { %6885 = vmatpush3.xpose.msk.msra.mxu1 %vm1056_vm4, %v1388_v63 }
 0x744   : > { %6889 = vmatprep.subr.mxu1 %v7684_v1 }
 0x746   : > { %6887 = vmatmul.mubr.msk.f32.vlgmr.msra.gmra.mxu1 %vm1056_vm4, %v1305_v2  ;;  %v6279_v2 = vld [vmem:[%s9373_s7 + $0x10] sm:$0xff] }
 0x747   : > { %6891 = vmatprep.mubr.msk.f32.mxu1 %vm7685_vm2, %v7684_v1 }
 0x748   : > { %v1470_v4 = vpop.f32.mrf.mxu1 }
 0x749   : > { %v1471_v5 = vadd.f32 %v6245_v3, %v1470_v4 }
 0x74a   : > { %v6883_v6 = vpop.f32.mrf.mxu1 }
 0x74b   : > { %6890 = vmatpush3.msk.msra.mxu1 %vm1150_vm5, %v1471_v5  ;;  %v6284_v6 = vld [vmem:[%s9370_s5 + $0x78] sm:$0xff] }
 0x74c   : > { %6899 = vmatprep.subr.mxu1 %v7684_v1 }
 0x806   : > { %v1546_v8 = vpop.f32.mrf.mxu1 }
 0x807   : > { %v1550_v9 = vmul.f32 0.35355338, %v1546_v8  ;;  %v6283_v8 = vld [vmem:[%s9370_s5 + $0x70] sm:$0xff] }
 0x808   : > { %v6888_v10 = vpop.f32.mrf.mxu1 }
 0x809   : > { %v1551_v11 = vsel %vm1134_vm6, %v1550_v9, -inf  ;;  %v6281_v10 = vld [vmem:[%s9370_s5 + $0x60] sm:$0xff] }
 0x80a   : > { %1552 = vmax.xlane.f32.xlu0 %v1551_v11  ;;  %v6298_v11 = vld [vmem:[%s9370_s5 + $0x178] sm:$0xff] }
 0x893   : > { %v1553_v12 = vpop.xlane.xlu0 %1552 }
 0x894   : > { %v1554_v13 = vsub.f32 %v1550_v9, %v1553_v12  ;;  %v6282_v9 = vld [vmem:[%s9370_s5 + $0x68] sm:$0xff]  ;;  %v6297_v12 = vld [vmem:[%s9370_s5 + $0x170] sm:$0xff] }
 0x896   : > { %v1555_v14 = vmul.f32 1.442695, %v1554_v13  ;;  %v6296_v13 = vld [vmem:[%s9370_s5 + $0x168] sm:$0xff] }
 0x898   : > { %7518 = vpow2.f32 %v1555_v14  ;;  %v6295_v14 = vld [vmem:[%s9370_s5 + $0x160] sm:$0xff] }
 0x8a5   : > { %v7519_v15 = vpop.eup %7518 }
 0x8a6   : > { %v1557_v16 = vsel %vm1134_vm6, %v7519_v15, 0.0 }
 0x8a7   : > { %1558 = vadd.xlane.f32.xlu1 %v1557_v16 }
 0x930   : > { %v1559_v18 = vpop.xlane.xlu1 %1558 }
 0x931   : > { %7520 = vrcp.f32 %v1559_v18 }
 0x93e   : > { %v7521_v19 = vpop.eup %7520 }
 0x93f   : > { %v1561_v20 = vmul.f32 %v7521_v19, %v7519_v15  ;;  %v6291_v15 = vld [vmem:[%s9370_s5 + $0xf8] sm:$0xff]  ;;  %v6289_v19 = vld [vmem:[%s9370_s5 + $0xe8] sm:$0xff] }
 0x941   : > { %6892 = vmatmul.mubr.msk.f32.vlgmr.msra.gmra.mxu1 %vm1146_vm7, %v1561_v20  ;;  %v6288_v20 = vld [vmem:[%s9370_s5 + $0xe0] sm:$0xff] }
 0x942   : > { %6900 = vmatpush3.msra.mxu1 %v1224_v21  ;;  %6901 = vmatprep.mubr.msk.f32.mxu1 %vm7685_vm2, %v7684_v1 }
 0x943   : > { %6915 = vmatprep.subr.mxu1 %v7684_v1 }
 0x945   : > { %6902 = vmatmul.mubr.msk.f32.vlgmr.msra.gmra.mxu1 %vm1056_vm4, %v1220_v56 }
 0x946   : > { %6916 = vmatpush3.msra.mxu1 %v6264_v22  ;;  %6923 = vmatprep.mubr.msk.f32.mxu1 %vm7685_vm2, %v7684_v1 }
 0x947   : > { %6917 = vmatprep.subr.mxu1 %v7684_v1 }
 0x948   : > { %6918 = vmatpush3.msra.mxu1 %v6263_v23 }
 0x949   : > { %6919 = vmatprep.subr.mxu1 %v7684_v1 }
 0x94a   : > { %6920 = vmatpush3.msra.mxu1 %v6262_v24 }
 0x94b   : > { %6921 = vmatprep.subr.mxu1 %v7684_v1 }
 0x94c   : > { %6922 = vmatpush3.msra.mxu1 %v6261_v25 }
 0x94d   : > { %6924 = vmatmul.mubr.msk.f32.vlgmr.msra.gmra.mxu1 %vm816_vm3, %v8030_v7  ;;  %6937 = vmatprep.subr.mxu1 %v7684_v1 }
 0x94e   : > { %6939 = vmatprep.mubr.msk.f32.mxu1 %vm7685_vm2, %v7684_v1 }
 0xa01   : > { %v1634_v27 = vpop.f32.mrf.mxu1 }
 0xa02   : > { %6897 = vmatmul.mubr.msk.f32.vlgmr.msra.gmra.mxu0 %vm1056_vm4, %v1634_v27 }
 0xa03   : > { %6905 = vmatpush3.msra.mxu0 %v6257_v26  ;;  %v6893_v29 = vpop.f32.mrf.mxu1  ;;  %6912 = vmatprep.mubr.msk.f32.mxu0 %vm7685_vm2, %v7684_v1 }
 0xa04   : > { %6906 = vmatprep.subr.mxu0 %v7684_v1  ;;  %v6293_v29 = vld [vmem:[%s9372_s6 + $0x7] ss:$0 sm:$0xff] }
 0xa05   : > { %6907 = vmatpush3.msra.mxu0 %v6256_v28  ;;  %v8222_v31 = vpop.f32.mrf.mxu1 }
 0xa06   : > { %6908 = vmatprep.subr.mxu0 %v7684_v1 }
 0xa07   : > { %6909 = vmatpush3.msra.mxu0 %v6255_v30  ;;  %v6903_v33 = vpop.f32.mrf.mxu1 }
 0xa08   : > { %6910 = vmatprep.subr.mxu0 %v7684_v1  ;;  %v6300_v33 = vld [vmem:[%s9372_s6 + $0xb] ss:$0 sm:$0xff] }
 0xa09   : > { %6911 = vmatpush3.msra.mxu0 %v6254_v32 }
 0xa0a   : > { %6913 = vmatmul.mubr.msk.f32.vlgmr.msra.gmra.mxu0 %vm816_vm3, %v8030_v7  ;;  %6926 = vmatprep.subr.mxu0 %v7684_v1 }
 0xa0b   : > { %6927 = vmatpush3.msra.mxu0 %v6271_v34  ;;  %6934 = vmatprep.mubr.msk.f32.mxu0 %vm7685_vm2, %v7684_v1 }
 0xa0c   : > { %6928 = vmatprep.subr.mxu0 %v7684_v1 }
 0xa0d   : > { %v1948_v38 = vpop.f32.mrf.mxu1  ;;  %6929 = vmatpush3.msra.mxu0 %v6270_v35 }
 0xa0e   : > { %v1949_v39 = vadd.f32 %v6266_v36, %v1948_v38  ;;  %6930 = vmatprep.subr.mxu0 %v7684_v1 }
 0xa0f   : > { %v6925_v43 = vpop.f32.mrf.mxu1  ;;  %6931 = vmatpush3.msra.mxu0 %v6269_v37 }
 0xa10   : > { %6932 = vmatprep.subr.mxu0 %v7684_v1  ;;  %6938 = vmatpush3.xpose.msk.msra.mxu1 %vm1056_vm4, %v1949_v39 }
 0xa11   : > { %6933 = vmatpush3.msra.mxu0 %v6268_v41  ;;  %6942 = vmatprep.subr.mxu1 %v7684_v1 }
 0xa12   : > { %6935 = vmatmul.mubr.msk.f32.vlgmr.msra.gmra.mxu0 %vm816_vm3, %v8030_v7  ;;  %6947 = vmatprep.subr.mxu0 %v7684_v1 }
 0xa13   : > { %6949 = vmatprep.mubr.msk.f32.mxu0 %vm7685_vm2, %v7684_v1  ;;  %6948 = vmatpush3.msra.mxu0 %v6279_v2 }
 0xa14   : > { %6963 = vmatprep.subr.mxu0 %v7684_v1 }
 0xac2   : > { %v8259_v45 = vpop.f32.mrf.mxu0 }
 0xac3   : > { %v1783_v25 = vadd.f32 %v8222_v31, %v8259_v45 }
 0xac4   : > { %v6898_v46 = vpop.f32.mrf.mxu0 }
 0xaca   : > { %v1865_v48 = vpop.f32.mrf.mxu0 }
 0xacb   : > { %v1866_v49 = vadd.f32 %v6259_v47, %v1865_v48  ;;  %v6306_v48 = vld [vmem:[%s9373_s7 + $0x18] sm:$0xff] }
 0xacc   : > { %v6914_v51 = vpop.f32.mrf.mxu0 }
 0xacd   : > { %6940 = vmatmul.mubr.msk.f32.vlgmr.msra.gmra.mxu1 %vm1056_vm4, %v1866_v49 }
 0xace   : > { %6944 = vmatprep.mubr.msk.f32.mxu1 %vm7685_vm2, %v7684_v1 }
 0xad2   : > { %v2031_v53 = vpop.f32.mrf.mxu0 }
 0xad3   : > { %v2032_v54 = vadd.f32 %v6273_v52, %v2031_v53 }
 0xad4   : > { %v6936_v55 = vpop.f32.mrf.mxu0 }
 0xad5   : > { %6943 = vmatpush3.msk.msra.mxu1 %vm1150_vm5, %v2032_v54 }
 0xad6   : > { %6952 = vmatprep.subr.mxu1 %v7684_v1 }
 0xb8d   : > { %v2107_v56 = vpop.f32.mrf.mxu1 }
 0xb8e   : > { %v2111_v57 = vmul.f32 0.35355338, %v2107_v56 }
 0xb8f   : > { %v6941_v58 = vpop.f32.mrf.mxu1 }
 0xb90   : > { %v2112_v59 = vsel %vm1134_vm6, %v2111_v57, -inf }
 0xb91   : > { %2113 = vmax.xlane.f32.xlu0 %v2112_v59 }
 0xc1a   : > { %v2114_v60 = vpop.xlane.xlu0 %2113 }
 0xc1b   : > { %v2115_v61 = vsub.f32 %v2111_v57, %v2114_v60  ;;  %v6308_v57 = vld [vmem:[%s9320_s8] ss:$0 sm:$0xff] }
 0xc1d   : > { %v2116_v62 = vmul.f32 1.442695, %v2115_v61 }
 0xc1f   : > { %7522 = vpow2.f32 %v2116_v62 }
 0xc2c   : > { %v7523_v63 = vpop.eup %7522 }
 0xc2d   : > { %v2118_v0 = vsel %vm1134_vm6, %v7523_v63, 0.0 }
 0xc2e   : > { %2119 = vadd.xlane.f32.xlu1 %v2118_v0 }
 0xcb7   : > { %v2120_v3 = vpop.xlane.xlu1 %2119 }
 0xcb8   : > { %7524 = vrcp.f32 %v2120_v3 }
 0xcc5   : > { %v7525_v4 = vpop.eup %7524 }
 0xcc6   : > { %v2122_v5 = vmul.f32 %v7525_v4, %v7523_v63  ;;  %v2801_v4 = vld [vmem:[%s9321_s9 + $0x18] sm:$0xff] }
 0xcc8   : > { %6945 = vmatmul.mubr.msk.f32.vlgmr.msra.gmra.mxu1 %vm1146_vm7, %v2122_v5  ;;  %v2799_v5 = vld [vmem:[%s9321_s9 + $0x8] sm:$0xff] }
 0xcc9   : > { %6953 = vmatpush3.msra.mxu1 %v6284_v6  ;;  %6960 = vmatprep.mubr.msk.f32.mxu1 %vm7685_vm2, %v7684_v1  ;;  %v2798_v6 = vld [vmem:[%s9321_s9] sm:$0xff] }
 0xcca   : > { %6954 = vmatprep.subr.mxu1 %v7684_v1 }
 0xccb   : > { %6955 = vmatpush3.msra.mxu1 %v6283_v8 }
 0xccc   : > { %6956 = vmatprep.subr.mxu1 %v7684_v1 }
 0xccd   : > { %6957 = vmatpush3.msra.mxu1 %v6282_v9 }
 0xcce   : > { %6958 = vmatprep.subr.mxu1 %v7684_v1 }
 0xccf   : > { %6959 = vmatpush3.msra.mxu1 %v6281_v10 }
 0xcd0   : > { %6961 = vmatmul.mubr.msk.f32.vlgmr.msra.gmra.mxu1 %vm816_vm3, %v8030_v7  ;;  %6974 = vmatprep.subr.mxu1 %v7684_v1 }
 0xcd1   : > { %6975 = vmatpush3.msra.mxu1 %v6298_v11  ;;  %6982 = vmatprep.mubr.msk.f32.mxu1 %vm7685_vm2, %v7684_v1  ;;  %v6309_v11 = vld [vmem:[%s9371_s21 + $0x2] sm:$0x3] }
 0xcd2   : > { %6976 = vmatprep.subr.mxu1 %v7684_v1 }
 0xcd3   : > { %6977 = vmatpush3.msra.mxu1 %v6297_v12  ;;  %v2791_v12 = vrot.slane %v6309_v11, %v7990_v42 }
 0xcd4   : > { %6978 = vmatprep.subr.mxu1 %v7684_v1 }
 0xcd5   : > { %6979 = vmatpush3.msra.mxu1 %v6296_v13 }
 0xcd6   : > { %6980 = vmatprep.subr.mxu1 %v7684_v1 }
 0xcd7   : > { %6981 = vmatpush3.msra.mxu1 %v6295_v14 }
 0xcd8   : > { %6983 = vmatmul.mubr.msk.f32.vlgmr.msra.gmra.mxu1 %vm816_vm3, %v8030_v7  ;;  %6995 = vmatprep.subr.mxu1 %v7684_v1 }
 0xcd9   : > { %6997 = vmatprep.mubr.msk.f32.mxu1 %vm7685_vm2, %v7684_v1  ;;  %6996 = vmatpush3.msra.mxu1 %v6306_v48 }
 0xcda   : > { %7011 = vmatprep.subr.mxu1 %v7684_v1 }
 0xd88   : > { %v2195_v16 = vpop.f32.mrf.mxu1 }
 0xd89   : > { %6950 = vmatmul.mubr.msk.f32.vlgmr.msra.gmra.mxu0 %vm1056_vm4, %v2195_v16 }
 0xd8a   : > { %6964 = vmatpush3.msra.mxu0 %v6291_v15  ;;  %v6946_v18 = vpop.f32.mrf.mxu1  ;;  %6971 = vmatprep.mubr.msk.f32.mxu0 %vm7685_vm2, %v7684_v1  ;;  %v2796_v15 = vrot.slane %v6309_v11, %v7995_v44  ;;  %v6323_v11 = vld [vmem:[%s9370_s5 + $0x208] sm:$0xff] }
 0xd8b   : > { %6965 = vmatprep.subr.mxu0 %v7684_v1  ;;  %v2905_v18 = vld [vmem:[%s9323_s11 + $0x78] sm:$0xff] }
 0xd8c   : > { %6966 = vmatpush3.msra.mxu0 %v6290_v17 }
 0xd8d   : > { %6967 = vmatprep.subr.mxu0 %v7684_v1 }
 0xd8e   : > { %6968 = vmatpush3.msra.mxu0 %v6289_v19  ;;  %v2904_v19 = vld [vmem:[%s9323_s11 + $0x70] sm:$0xff] }
 0xd8f   : > { %6969 = vmatprep.subr.mxu0 %v7684_v1 }
 0xd90   : > { %v2354_v21 = vpop.f32.mrf.mxu1  ;;  %6970 = vmatpush3.msra.mxu0 %v6288_v20  ;;  %v2903_v20 = vld [vmem:[%s9323_s11 + $0x68] sm:$0xff] }
 0xd91   : > { %6972 = vmatmul.mubr.msk.f32.vlgmr.msra.gmra.mxu0 %vm816_vm3, %v8030_v7  ;;  %6985 = vmatprep.subr.mxu0 %v7684_v1  ;;  %v6286_v7 = vld [vmem:[%s9372_s6 + $0x3] ss:$0 sm:$0xff] }
 0xd92   : > { %v6962_v22 = vpop.f32.mrf.mxu1  ;;  %6987 = vmatprep.mubr.msk.f32.mxu0 %vm7685_vm2, %v7684_v1  ;;  %v2355_v31 = vadd.f32 %v6286_v7, %v2354_v21  ;;  %v2902_v21 = vld [vmem:[%s9323_s11 + $0x60] sm:$0xff]  ;;  %v2892_v7 = vld [vmem:[%s9323_s11 + $0x10] sm:$0xff] }
 0xd93   : > { %v2901_v22 = vld [vmem:[%s9323_s11 + $0x58] sm:$0xff] }
 0xd98   : > { %v2520_v23 = vpop.f32.mrf.mxu1 }
 0xd99   : > { %v2521_v35 = vadd.f32 %v6300_v33, %v2520_v23  ;;  %v2900_v23 = vld [vmem:[%s9323_s11 + $0x50] sm:$0xff]  ;;  %v2890_v33 = vld [vmem:[%s9323_s11] sm:$0xff] }
 0xd9a   : > { %v6984_v24 = vpop.f32.mrf.mxu1 }
 0xd9b   : > { %v2899_v24 = vld [vmem:[%s9323_s11 + $0x48] sm:$0xff] }
 0xe49   : > { %v2270_v26 = vpop.f32.mrf.mxu0 }
 0xe4a   : > { %v2274_v27 = vadd.f32 %v2270_v26, %v1783_v25  ;;  %v2898_v25 = vld [vmem:[%s9323_s11 + $0x40] sm:$0xff]  ;;  %v2897_v26 = vld [vmem:[%s9323_s11 + $0x38] sm:$0xff] }
 0xe4b   : > { %v6951_v28 = vpop.f32.mrf.mxu0 }
 0xe4c   : > { %v2895_v28 = vld [vmem:[%s9323_s11 + $0x28] sm:$0xff] }
 0xe51   : > { %v2437_v30 = vpop.f32.mrf.mxu0 }
 0xe52   : > { %v2438_v32 = vadd.f32 %v6293_v29, %v2437_v30  ;;  %v2894_v29 = vld [vmem:[%s9323_s11 + $0x20] sm:$0xff]  ;;  %v2893_v30 = vld [vmem:[%s9323_s11 + $0x18] sm:$0xff] }
 0xe53   : > { %v6973_v34 = vpop.f32.mrf.mxu0 }
 0xe54   : > { %6986 = vmatpush3.xpose.msk.msra.mxu0 %vm1056_vm4, %v2438_v32  ;;  %v2891_v32 = vld [vmem:[%s9323_s11 + $0x8] sm:$0xff]  ;;  %v6310_v34 = vld [vmem:[%s9322_s10] ss:$0 sm:$0xff] }
 0xe55   : > { %6990 = vmatprep.subr.mxu0 %v7684_v1 }
 0xe57   : > { %6988 = vmatmul.mubr.msk.f32.vlgmr.msra.gmra.mxu0 %vm1056_vm4, %v2355_v31 }
 0xe58   : > { %6991 = vmatpush3.msk.msra.mxu0 %vm1150_vm5, %v2521_v35  ;;  %6992 = vmatprep.mubr.msk.f32.mxu0 %vm7685_vm2, %v7684_v1 }
 0xe59   : > { %7000 = vmatprep.subr.mxu0 %v7684_v1 }
 0xf17   : > { %v2596_v36 = vpop.f32.mrf.mxu0 }
 0xf18   : > { %v2600_v37 = vmul.f32 0.35355338, %v2596_v36 }
 0xf19   : > { %v6989_v38 = vpop.f32.mrf.mxu0 }
 0xf1a   : > { %v2601_v39 = vsel %vm1134_vm6, %v2600_v37, -inf }
 0xf1b   : > { %2602 = vmax.xlane.f32.xlu0 %v2601_v39 }
 0xfa4   : > { %v2603_v41 = vpop.xlane.xlu0 %2602 }
 0xfa5   : > { %v2604_v43 = vsub.f32 %v2600_v37, %v2603_v41 }
 0xfa7   : > { %v2605_v45 = vmul.f32 1.442695, %v2604_v43 }
 0xfa9   : > { %7526 = vpow2.f32 %v2605_v45 }
 0xfb6   : > { %v7527_v46 = vpop.eup %7526 }
 0xfb7   : > { %v2607_v47 = vsel %vm1134_vm6, %v7527_v46, 0.0 }
 0xfb8   : > { %2608 = vadd.xlane.f32.xlu1 %v2607_v47 }
0x1041   : > { %v2609_v49 = vpop.xlane.xlu1 %2608 }
0x1042   : > { %7528 = vrcp.f32 %v2609_v49 }
0x104f   : > { %v7529_v51 = vpop.eup %7528 }
0x1050   : > { %v2611_v52 = vmul.f32 %v7529_v51, %v7527_v46  ;;  %v6313_v46 = vld [vmem:[%s9324_s12] ss:$0 sm:$0xff] }
0x1052   : > { %6993 = vmatmul.mubr.msk.f32.vlgmr.msra.gmra.mxu0 %vm1146_vm7, %v2611_v52 }
0x1053   : > { %7008 = vmatprep.mubr.msk.f32.mxu0 %vm7685_vm2, %v7684_v1  ;;  %7001 = vmatpush3.msra.mxu0 %v2801_v4 }
0x1054   : > { %7002 = vmatprep.subr.mxu0 %v7684_v1 }
0x1112   : > { %v2684_v53 = vpop.f32.mrf.mxu0 }
0x1113   : > { %6998 = vmatmul.mubr.msk.f32.vlgmr.msra.gmra.mxu1 %vm1056_vm4, %v2684_v53 }
0x1114   : > { %v6994_v54 = vpop.f32.mrf.mxu0  ;;  %7043 = vmatprep.mubr.msk.f32.mxu1 %vm7685_vm2, %v7684_v1  ;;  %7012 = vmatpush3.msra.mxu1 %v2905_v18 }
0x1115   : > { %7013 = vmatprep.subr.mxu1 %v7684_v1 }
0x1116   : > { %7014 = vmatpush3.msra.mxu1 %v2904_v19  ;;  %v6327_v19 = vld [vmem:[%s9372_s6 + $0x10] ss:$0 sm:$0xff] }
0x1117   : > { %7015 = vmatprep.subr.mxu1 %v7684_v1 }
0x1118   : > { %7016 = vmatpush3.msra.mxu1 %v2903_v20 }
0x1119   : > { %7017 = vmatprep.subr.mxu1 %v7684_v1 }
0x111a   : > { %7018 = vmatpush3.msra.mxu1 %v2902_v21  ;;  %v6320_v21 = vld [vmem:[%s9372_s6 + $0xc] ss:$0 sm:$0xff] }
0x111b   : > { %7019 = vmatprep.subr.mxu1 %v7684_v1 }
0x111c   : > { %7020 = vmatpush3.msra.mxu1 %v2901_v22 }
0x111d   : > { %7021 = vmatprep.subr.mxu1 %v7684_v1 }
0x111e   : > { %7022 = vmatpush3.msra.mxu1 %v2900_v23 }
0x111f   : > { %7023 = vmatprep.subr.mxu1 %v7684_v1 }
0x1120   : > { %7024 = vmatpush3.msra.mxu1 %v2899_v24 }
0x1121   : > { %7025 = vmatprep.subr.mxu1 %v7684_v1 }
0x1122   : > { %7026 = vmatpush3.msra.mxu1 %v2898_v25  ;;  %v6344_v25 = vld [vmem:[%s9370_s5 + $0x1b8] sm:$0xff] }
0x1123   : > { %7027 = vmatprep.subr.mxu1 %v7684_v1 }
0x1124   : > { %7028 = vmatpush3.msra.mxu1 %v2897_v26  ;;  %v6334_v26 = vld [vmem:[%s9372_s6 + $0x14] ss:$0 sm:$0xff] }
0x1125   : > { %7029 = vmatprep.subr.mxu1 %v7684_v1 }
0x11d3   : > { %v2759_v55 = vpop.f32.mrf.mxu1 }
0x11d4   : > { %v2763_v56 = vadd.f32 %v2759_v55, %v2274_v27  ;;  %v2896_v27 = vld [vmem:[%s9323_s11 + $0x30] sm:$0xff] }
0x11d5   : > { %v6999_v58 = vpop.f32.mrf.mxu1  ;;  %7030 = vmatpush3.msra.mxu1 %v2896_v27  ;;  %v6343_v27 = vld [vmem:[%s9370_s5 + $0x1b0] sm:$0xff] }
0x11d6   : > { %v2764_v59 = vadd.f32 %v2763_v56, %v7999_v50  ;;  %v2800_v50 = vld [vmem:[%s9321_s9 + $0x10] sm:$0xff]  ;;  %7031 = vmatprep.subr.mxu1 %v7684_v1  ;;  %v6318_v58 = vld [vmem:[%s9370_s5 + $0x198] sm:$0xff] }
0x11d7   : > { %7003 = vmatpush3.msra.mxu0 %v2800_v50  ;;  %7032 = vmatpush3.msra.mxu1 %v2895_v28 }
0x11d8   : > { %v8378_v60 = vadd.f32 %v6308_v57, %v2764_v59  ;;  %7004 = vmatprep.subr.mxu0 %v7684_v1  ;;  %7033 = vmatprep.subr.mxu1 %v7684_v1  ;;  %v6317_v59 = vld [vmem:[%s9370_s5 + $0x190] sm:$0xff] }
0x11d9   : > { %7005 = vmatpush3.msra.mxu0 %v2799_v5  ;;  %7034 = vmatpush3.msra.mxu1 %v2894_v29  ;;  %v6342_v29 = vld [vmem:[%s9370_s5 + $0x1a8] sm:$0xff] }
0x11da   : > { %v2775_v61 = vsel %vm756_vm1, %v8378_v60, 0.0  ;;  %7006 = vmatprep.subr.mxu0 %v7684_v1  ;;  %7035 = vmatprep.subr.mxu1 %v7684_v1 }
0x11db   : > { %2776 = vadd.xlane.f32.xlu0 %v2775_v61  ;;  %7007 = vmatpush3.msra.mxu0 %v2798_v6  ;;  %v6315_v61 = vld [vmem:[%s9370_s5 + $0x180] sm:$0xff] }
0x11dc   : > { %7046 = vmatprep.subr.mxu0 %v7684_v1  ;;  %7036 = vmatpush3.msra.mxu1 %v2893_v30 }
0x11dd   : > { %7037 = vmatprep.subr.mxu1 %v7684_v1 }
0x11de   : > { %7038 = vmatpush3.msra.mxu1 %v2892_v7 }
0x11df   : > { %7039 = vmatprep.subr.mxu1 %v7684_v1 }
0x11e0   : > { %7040 = vmatpush3.msra.mxu1 %v2891_v32  ;;  %v6341_v32 = vld [vmem:[%s9370_s5 + $0x1a0] sm:$0xff] }
0x11e1   : > { %7041 = vmatprep.subr.mxu1 %v7684_v1 }
0x11e2   : > { %7042 = vmatpush3.msra.mxu1 %v2890_v33  ;;  %v6358_v33 = vld [vmem:[%s9370_s5 + $0x2b8] sm:$0xff] }
0x11e3   : > { %7084 = vmatprep.subr.mxu1 %v7684_v1 }
0x1264   : > { %v2777_v62 = vpop.xlane.xlu0 %2776 }
0x1265   : > { %v2778_v63 = vmul.f32 0.03125, %v2777_v62 }
0x1267   : > { %v2779_v0 = vsub.f32 %v8378_v60, %v2778_v63 }
0x1269   : > { %v2780_v2 = vmul.f32 %v2779_v0, %v2779_v0 }
0x126b   : > { %v2781_v3 = vsel %vm756_vm1, %v2780_v2, 0.0  ;;  %v6314_v2 = vld [vmem:[%s9371_s21 + $0x4] sm:$0x3] }
0x126c   : > { %2782 = vadd.xlane.f32.xlu1 %v2781_v3  ;;  %v3002_v3 = vrot.slane %v6314_v2, %v7990_v42  ;;  %v3007_v50 = vrot.slane %v6314_v2, %v7995_v44  ;;  %v6346_v2 = vld [vmem:[%s9372_s6 + $0xd] ss:$0 sm:$0xff] }
0x12f5   : > { %v2783_v8 = vpop.xlane.xlu1 %2782 }
0x12f6   : > { %v2784_v9 = vmul.f32 0.03125, %v2783_v8 }
0x12f8   : > { %v2785_v10 = vadd.f32 1e-05, %v2784_v9  ;;  %v6325_v9 = vld [vmem:[%s9370_s5 + $0x218] sm:$0xff] }
0x12fa   : > { %7530 = vrsqrt.f32 %v2785_v10  ;;  %v6324_v10 = vld [vmem:[%s9370_s5 + $0x210] sm:$0xff] }
0x1307   : > { %v7531_v13 = vpop.eup %7530 }
0x1308   : > { %v2787_v14 = vmul.f32 %v7531_v13, %v2779_v0  ;;  %v6332_v13 = vld [vmem:[%s9370_s5 + $0x298] sm:$0xff] }
0x130a   : > { %v2792_v16 = vmul.f32 %v2791_v12, %v2787_v14  ;;  %v6322_v12 = vld [vmem:[%s9370_s5 + $0x200] sm:$0xff]  ;;  %v6331_v14 = vld [vmem:[%s9370_s5 + $0x290] sm:$0xff] }
0x130c   : > { %v2797_v17 = vadd.f32 %v2796_v15, %v2792_v16  ;;  %v6330_v15 = vld [vmem:[%s9370_s5 + $0x288] sm:$0xff]  ;;  %v6329_v16 = vld [vmem:[%s9370_s5 + $0x280] sm:$0xff] }
0x130e   : > { %7009 = vmatmul.mubr.msk.f32.vlgmr.msra.gmra.mxu0 %vm816_vm3, %v2797_v17 }
0x130f   : > { %7054 = vmatprep.mubr.msk.f32.mxu0 %vm7685_vm2, %v7684_v1  ;;  %7047 = vmatpush3.msra.mxu0 %v6318_v58  ;;  %v6350_v58 = vld [vmem:[%s9370_s5 + $0x230] sm:$0xff] }
0x1310   : > { %7048 = vmatprep.subr.mxu0 %v7684_v1 }
0x1311   : > { %7049 = vmatpush3.msra.mxu0 %v6317_v59  ;;  %v6349_v59 = vld [vmem:[%s9370_s5 + $0x228] sm:$0xff] }
0x1312   : > { %7050 = vmatprep.subr.mxu0 %v7684_v1 }
0x13ce   : > { %v2878_v31 = vpop.f32.mrf.mxu0 }
0x13cf   : > { %v2879_v35 = vadd.f32 %v6310_v34, %v2878_v31  ;;  %v6357_v34 = vld [vmem:[%s9370_s5 + $0x2b0] sm:$0xff]  ;;  %v6356_v31 = vld [vmem:[%s9370_s5 + $0x2a8] sm:$0xff] }
0x13d0   : > { %v7010_v36 = vpop.f32.mrf.mxu0 }
0x13d1   : > { %v6312_v37 = vmul.f32 -1.702, %v2879_v35 }
0x13d3   : > { %v2884_v38 = vmul.f32 1.442695, %v6312_v37 }
0x13d5   : > { %7532 = vpow2.f32 %v2884_v38 }
0x13e2   : > { %v7533_v39 = vpop.eup %7532 }
0x13e3   : > { %v2886_v41 = vadd.f32 1.0, %v7533_v39 }
0x13e5   : > { %7534 = vrcp.f32 %v2886_v41 }
0x13f2   : > { %v7535_v43 = vpop.eup %7534 }
0x13f3   : > { %v2889_v45 = vmul.f32 %v7535_v43, %v2879_v35  ;;  %v6355_v35 = vld [vmem:[%s9370_s5 + $0x2a0] sm:$0xff] }
0x13f5   : > { %7044 = vmatmul.mubr.f32.vlgmr.msra.gmra.mxu1 %v2889_v45 }
0x13f6   : > { %7086 = vmatprep.mubr.msk.f32.mxu1 %vm7685_vm2, %v7684_v1 }
0x14b5   : > { %v2979_v47 = vpop.f32.mrf.mxu1 }
0x14b6   : > { %v2980_v48 = vadd.f32 %v6313_v46, %v2979_v47 }
0x14b7   : > { %v7045_v49 = vpop.f32.mrf.mxu1 }
0x14b8   : > { %v8481_v51 = vadd.f32 %v2980_v48, %v8378_v60  ;;  %v6316_v60 = vld [vmem:[%s9370_s5 + $0x188] sm:$0xff] }
0x14b9   : > { %7051 = vmatpush3.msra.mxu0 %v6316_v60  ;;  %v6348_v60 = vld [vmem:[%s9370_s5 + $0x220] sm:$0xff] }
0x14ba   : > { %v2986_v52 = vsel %vm756_vm1, %v8481_v51, 0.0  ;;  %7052 = vmatprep.subr.mxu0 %v7684_v1 }
0x14bb   : > { %2987 = vadd.xlane.f32.xlu0 %v2986_v52  ;;  %7053 = vmatpush3.msra.mxu0 %v6315_v61 }
0x14bc   : > { %7057 = vmatprep.subr.mxu0 %v7684_v1 }
0x1544   : > { %v2988_v53 = vpop.xlane.xlu0 %2987 }
0x1545   : > { %v2989_v54 = vmul.f32 0.03125, %v2988_v53 }
0x1547   : > { %v2990_v55 = vsub.f32 %v8481_v51, %v2989_v54 }
0x1549   : > { %v2991_v56 = vmul.f32 %v2990_v55, %v2990_v55 }
0x154b   : > { %v2992_v57 = vsel %vm756_vm1, %v2991_v56, 0.0 }
0x154c   : > { %2993 = vadd.xlane.f32.xlu1 %v2992_v57  ;;  %v6351_v57 = vld [vmem:[%s9370_s5 + $0x238] sm:$0xff] }
0x15d5   : > { %v2994_v62 = vpop.xlane.xlu1 %2993 }
0x15d6   : > { %v2995_v63 = vmul.f32 0.03125, %v2994_v62 }
0x15d8   : > { %v2996_v0 = vadd.f32 1e-05, %v2995_v63  ;;  %v6353_v63 = vld [vmem:[%s9372_s6 + $0x11] ss:$0 sm:$0xff] }
0x15da   : > { %7536 = vrsqrt.f32 %v2996_v0 }
0x15e7   : > { %v7537_v4 = vpop.eup %7536 }
0x15e8   : > { %v2998_v5 = vmul.f32 %v7537_v4, %v2990_v55  ;;  %v6360_v4 = vld [vmem:[%s9372_s6 + $0x15] ss:$0 sm:$0xff] }
0x15ea   : > { %v3003_v6 = vmul.f32 %v3002_v3, %v2998_v5 }
0x15ec   : > { %v8508_v8 = vadd.f32 %v3007_v50, %v3003_v6 }
0x15ee   : > { %7055 = vmatmul.mubr.msk.f32.vlgmr.msra.gmra.mxu0 %vm816_vm3, %v8508_v8 }
0x15ef   : > { %7058 = vmatpush3.msra.mxu0 %v6325_v9  ;;  %7065 = vmatprep.mubr.msk.f32.mxu0 %vm7685_vm2, %v7684_v1 }
0x15f0   : > { %7059 = vmatprep.subr.mxu0 %v7684_v1 }
0x15f1   : > { %7060 = vmatpush3.msra.mxu0 %v6324_v10 }
0x15f2   : > { %7061 = vmatprep.subr.mxu0 %v7684_v1 }
0x15f3   : > { %7062 = vmatpush3.msra.mxu0 %v6323_v11 }
0x15f4   : > { %7063 = vmatprep.subr.mxu0 %v7684_v1 }
0x15f5   : > { %7064 = vmatpush3.msra.mxu0 %v6322_v12 }
0x15f6   : > { %7066 = vmatmul.mubr.msk.f32.vlgmr.msra.gmra.mxu0 %vm816_vm3, %v8508_v8  ;;  %7068 = vmatprep.subr.mxu0 %v7684_v1 }
0x15f7   : > { %7069 = vmatpush3.msra.mxu0 %v6332_v13  ;;  %7076 = vmatprep.mubr.msk.f32.mxu0 %vm7685_vm2, %v7684_v1 }
0x15f8   : > { %7070 = vmatprep.subr.mxu0 %v7684_v1 }
0x15f9   : > { %7071 = vmatpush3.msra.mxu0 %v6331_v14 }
0x15fa   : > { %7072 = vmatprep.subr.mxu0 %v7684_v1 }
0x15fb   : > { %7073 = vmatpush3.msra.mxu0 %v6330_v15 }
0x15fc   : > { %7074 = vmatprep.subr.mxu0 %v7684_v1 }
0x15fd   : > { %7075 = vmatpush3.msra.mxu0 %v6329_v16 }
0x15fe   : > { %7077 = vmatmul.mubr.msk.f32.vlgmr.msra.gmra.mxu0 %vm816_vm3, %v8508_v8  ;;  %7079 = vmatprep.subr.mxu0 %v7684_v1 }
0x15ff   : > { %7081 = vmatprep.mubr.msk.f32.mxu0 %vm7685_vm2, %v7684_v1 }
0x16ae   : > { %v3091_v17 = vpop.f32.mrf.mxu0 }
0x16af   : > { %v3092_v24 = vadd.f32 %v6320_v21, %v3091_v17 }
0x16b0   : > { %v7056_v18 = vpop.f32.mrf.mxu0 }
0x16b1   : > { %v6366_v18 = vld [vmem:[%s9373_s7 + $0x28] sm:$0xff] }
0x16b6   : > { %v3174_v20 = vpop.f32.mrf.mxu0 }
0x16b7   : > { %v3175_v22 = vadd.f32 %v6327_v19, %v3174_v20 }
0x16b8   : > { %v7067_v23 = vpop.f32.mrf.mxu0 }
0x16b9   : > { %7080 = vmatpush3.xpose.msk.msra.mxu0 %vm1056_vm4, %v3175_v22  ;;  %v6340_v22 = vld [vmem:[%s9373_s7 + $0x20] sm:$0xff]  ;;  %v6379_v23 = vld [vmem:[%s9370_s5 + $0x258] sm:$0xff] }
0x16ba   : > { %7089 = vmatprep.subr.mxu0 %v7684_v1 }
0x16bc   : > { %7082 = vmatmul.mubr.msk.f32.vlgmr.msra.gmra.mxu0 %vm1056_vm4, %v3092_v24  ;;  %v6378_v24 = vld [vmem:[%s9370_s5 + $0x250] sm:$0xff] }
0x16bd   : > { %7090 = vmatpush3.msra.mxu0 %v6344_v25  ;;  %7097 = vmatprep.mubr.msk.f32.mxu0 %vm7685_vm2, %v7684_v1  ;;  %v6377_v25 = vld [vmem:[%s9370_s5 + $0x248] sm:$0xff] }
0x16be   : > { %v3257_v28 = vpop.f32.mrf.mxu0  ;;  %7091 = vmatprep.subr.mxu0 %v7684_v1 }
0x16bf   : > { %v3258_v30 = vadd.f32 %v6334_v26, %v3257_v28  ;;  %7092 = vmatpush3.msra.mxu0 %v6343_v27  ;;  %v6376_v26 = vld [vmem:[%s9370_s5 + $0x240] sm:$0xff]  ;;  %v6372_v27 = vld [vmem:[%s9370_s5 + $0x1d8] sm:$0xff] }
0x16c0   : > { %v7078_v7 = vpop.f32.mrf.mxu0  ;;  %7093 = vmatprep.subr.mxu0 %v7684_v1 }
0x16c1   : > { %7085 = vmatpush3.msk.msra.mxu1 %vm1150_vm5, %v3258_v30  ;;  %7094 = vmatpush3.msra.mxu0 %v6342_v29  ;;  %v6371_v29 = vld [vmem:[%s9370_s5 + $0x1d0] sm:$0xff]  ;;  %v6370_v7 = vld [vmem:[%s9370_s5 + $0x1c8] sm:$0xff] }
0x16c2   : > { %7095 = vmatprep.subr.mxu0 %v7684_v1  ;;  %7100 = vmatprep.subr.mxu1 %v7684_v1 }
0x16c3   : > { %7096 = vmatpush3.msra.mxu0 %v6341_v32 }
0x16c4   : > { %7098 = vmatmul.mubr.msk.f32.vlgmr.msra.gmra.mxu0 %vm816_vm3, %v8508_v8  ;;  %7111 = vmatprep.subr.mxu0 %v7684_v1 }
0x16c5   : > { %7112 = vmatpush3.msra.mxu0 %v6358_v33  ;;  %7119 = vmatprep.mubr.msk.f32.mxu0 %vm7685_vm2, %v7684_v1  ;;  %v6369_v33 = vld [vmem:[%s9370_s5 + $0x1c0] sm:$0xff] }
0x16c6   : > { %7113 = vmatprep.subr.mxu0 %v7684_v1 }
0x16c7   : > { %7114 = vmatpush3.msra.mxu0 %v6357_v34 }
0x16c8   : > { %7115 = vmatprep.subr.mxu0 %v7684_v1 }
0x16c9   : > { %7116 = vmatpush3.msra.mxu0 %v6356_v31  ;;  %v6386_v31 = vld [vmem:[%s9370_s5 + $0x2d8] sm:$0xff] }
0x16ca   : > { %7117 = vmatprep.subr.mxu0 %v7684_v1 }
0x16cb   : > { %7118 = vmatpush3.msra.mxu0 %v6355_v35  ;;  %v6385_v35 = vld [vmem:[%s9370_s5 + $0x2d0] sm:$0xff] }
0x16cc   : > { %7120 = vmatmul.mubr.msk.f32.vlgmr.msra.gmra.mxu0 %vm816_vm3, %v8508_v8  ;;  %7132 = vmatprep.subr.mxu0 %v7684_v1 }
0x16cd   : > { %7134 = vmatprep.mubr.msk.f32.mxu0 %vm7685_vm2, %v7684_v1  ;;  %7133 = vmatpush3.msra.mxu0 %v6366_v18  ;;  %v6405_v18 = vld [vmem:[%s9370_s5 + $0x270] sm:$0xff] }
0x16ce   : > { %7142 = vmatprep.subr.mxu0 %v7684_v1 }
0x177c   : > { %v3333_v36 = vpop.f32.mrf.mxu0 }
0x177d   : > { %v3337_v37 = vmul.f32 0.35355338, %v3333_v36  ;;  %v6381_v36 = vld [vmem:[%s9372_s6 + $0x12] ss:$0 sm:$0xff] }
0x177e   : > { %v7083_v38 = vpop.f32.mrf.mxu0 }
0x177f   : > { %v3338_v39 = vsel %vm1134_vm6, %v3337_v37, -inf }
0x1780   : > { %3339 = vmax.xlane.f32.xlu0 %v3338_v39 }
0x1784   : > { %v3506_v41 = vpop.f32.mrf.mxu0 }
0x1785   : > { %v3507_v5 = vadd.f32 %v6346_v2, %v3506_v41  ;;  %v6383_v41 = vld [vmem:[%s9370_s5 + $0x2c0] sm:$0xff] }
0x1786   : > { %v7099_v43 = vpop.f32.mrf.mxu0 }
0x178c   : > { %v3672_v45 = vpop.f32.mrf.mxu0 }
0x178d   : > { %v3673_v6 = vadd.f32 %v6360_v4, %v3672_v45 }
0x178e   : > { %v7121_v46 = vpop.f32.mrf.mxu0 }
0x1809   : > { %v3340_v47 = vpop.xlane.xlu0 %3339 }
0x180a   : > { %v3341_v48 = vsub.f32 %v3337_v37, %v3340_v47  ;;  %v6384_v37 = vld [vmem:[%s9370_s5 + $0x2c8] sm:$0xff] }
0x180b   : > { %v6374_v47 = vld [vmem:[%s9372_s6 + $0xe] ss:$0 sm:$0xff] }
0x180c   : > { %v3342_v49 = vmul.f32 1.442695, %v3341_v48 }
0x180e   : > { %7538 = vpow2.f32 %v3342_v49 }
0x181b   : > { %v7539_v52 = vpop.eup %7538 }
0x181c   : > { %v3344_v53 = vsel %vm1134_vm6, %v7539_v52, 0.0 }
0x181d   : > { %3345 = vadd.xlane.f32.xlu1 %v3344_v53  ;;  %v6388_v53 = vld [vmem:[%s9372_s6 + $0x16] ss:$0 sm:$0xff] }
0x18a6   : > { %v3346_v54 = vpop.xlane.xlu1 %3345 }
0x18a7   : > { %7540 = vrcp.f32 %v3346_v54 }
0x18b4   : > { %v7541_v55 = vpop.eup %7540 }
0x18b5   : > { %v3348_v56 = vmul.f32 %v7541_v55, %v7539_v52 }
0x18b7   : > { %7087 = vmatmul.mubr.msk.f32.vlgmr.msra.gmra.mxu1 %vm1146_vm7, %v3348_v56 }
0x18b8   : > { %7101 = vmatpush3.msra.mxu1 %v6351_v57  ;;  %7108 = vmatprep.mubr.msk.f32.mxu1 %vm7685_vm2, %v7684_v1 }
0x18b9   : > { %7102 = vmatprep.subr.mxu1 %v7684_v1 }
0x18ba   : > { %7103 = vmatpush3.msra.mxu1 %v6350_v58 }
0x18bb   : > { %7104 = vmatprep.subr.mxu1 %v7684_v1 }
0x18bc   : > { %7105 = vmatpush3.msra.mxu1 %v6349_v59 }
0x18bd   : > { %7106 = vmatprep.subr.mxu1 %v7684_v1 }
0x18be   : > { %7107 = vmatpush3.msra.mxu1 %v6348_v60 }
0x18bf   : > { %7109 = vmatmul.mubr.msk.f32.vlgmr.msra.gmra.mxu1 %vm816_vm3, %v8508_v8  ;;  %7122 = vmatprep.subr.mxu1 %v7684_v1 }
0x18c0   : > { %7124 = vmatprep.mubr.msk.f32.mxu1 %vm7685_vm2, %v7684_v1 }
0x1977   : > { %v3421_v61 = vpop.f32.mrf.mxu1 }
0x1979   : > { %v7088_v62 = vpop.f32.mrf.mxu1 }
0x197f   : > { %v3589_v0 = vpop.f32.mrf.mxu1 }
0x1980   : > { %v3590_v3 = vadd.f32 %v6353_v63, %v3589_v0 }
0x1981   : > { %v7110_v50 = vpop.f32.mrf.mxu1 }
0x1982   : > { %7123 = vmatpush3.xpose.msk.msra.mxu1 %vm1056_vm4, %v3590_v3  ;;  %v6394_v3 = vld [vmem:[%s9373_s7 + $0x30] sm:$0xff] }
0x1983   : > { %7127 = vmatprep.subr.mxu1 %v7684_v1 }
0x1985   : > { %7125 = vmatmul.mubr.msk.f32.vlgmr.msra.gmra.mxu1 %vm1056_vm4, %v3507_v5 }
0x1986   : > { %7128 = vmatpush3.msk.msra.mxu1 %vm1150_vm5, %v3673_v6  ;;  %7129 = vmatprep.mubr.msk.f32.mxu1 %vm7685_vm2, %v7684_v1  ;;  %v6399_v6 = vld [vmem:[%s9370_s5 + $0x1f8] sm:$0xff] }
0x1987   : > { %7137 = vmatprep.subr.mxu1 %v7684_v1 }
0x1a45   : > { %v3748_v9 = vpop.f32.mrf.mxu1 }
0x1a46   : > { %v3752_v10 = vmul.f32 0.35355338, %v3748_v9  ;;  %v6398_v9 = vld [vmem:[%s9370_s5 + $0x1f0] sm:$0xff] }
0x1a47   : > { %v7126_v11 = vpop.f32.mrf.mxu1 }
0x1a48   : > { %v3753_v12 = vsel %vm1134_vm6, %v3752_v10, -inf  ;;  %v6396_v11 = vld [vmem:[%s9370_s5 + $0x1e0] sm:$0xff] }
0x1a49   : > { %3754 = vmax.xlane.f32.xlu0 %v3753_v12  ;;  %v6413_v12 = vld [vmem:[%s9370_s5 + $0x2f8] sm:$0xff] }
0x1ad2   : > { %v3755_v13 = vpop.xlane.xlu0 %3754 }
0x1ad3   : > { %v3756_v14 = vsub.f32 %v3752_v10, %v3755_v13  ;;  %v6397_v10 = vld [vmem:[%s9370_s5 + $0x1e8] sm:$0xff]  ;;  %v6412_v13 = vld [vmem:[%s9370_s5 + $0x2f0] sm:$0xff] }
0x1ad5   : > { %v3757_v15 = vmul.f32 1.442695, %v3756_v14  ;;  %v6411_v14 = vld [vmem:[%s9370_s5 + $0x2e8] sm:$0xff] }
0x1ad7   : > { %7542 = vpow2.f32 %v3757_v15  ;;  %v6410_v15 = vld [vmem:[%s9370_s5 + $0x2e0] sm:$0xff] }
0x1ae4   : > { %v7543_v16 = vpop.eup %7542 }
0x1ae5   : > { %v3759_v17 = vsel %vm1134_vm6, %v7543_v16, 0.0 }
0x1ae6   : > { %3760 = vadd.xlane.f32.xlu1 %v3759_v17 }
0x1b6f   : > { %v3761_v19 = vpop.xlane.xlu1 %3760 }
0x1b70   : > { %7544 = vrcp.f32 %v3761_v19 }
0x1b7d   : > { %v7545_v20 = vpop.eup %7544 }
0x1b7e   : > { %v3763_v21 = vmul.f32 %v7545_v20, %v7543_v16  ;;  %v6406_v16 = vld [vmem:[%s9370_s5 + $0x278] sm:$0xff]  ;;  %v6404_v20 = vld [vmem:[%s9370_s5 + $0x268] sm:$0xff] }
0x1b80   : > { %7130 = vmatmul.mubr.msk.f32.vlgmr.msra.gmra.mxu1 %vm1146_vm7, %v3763_v21  ;;  %v6403_v21 = vld [vmem:[%s9370_s5 + $0x260] sm:$0xff]  ;;  %s6070_s5 = sld [smem:[#allocation2 + %s6069_s28]] }
0x1b81   : > { %7138 = vmatpush3.msra.mxu1 %v6340_v22  ;;  %7139 = vmatprep.mubr.msk.f32.mxu1 %vm7685_vm2, %v7684_v1 }
0x1b82   : > { %7153 = vmatprep.subr.mxu1 %v7684_v1 }
0x1b84   : > { %7140 = vmatmul.mubr.msk.f32.vlgmr.msra.gmra.mxu1 %vm1056_vm4, %v3421_v61 }
0x1b85   : > { %7154 = vmatpush3.msra.mxu1 %v6379_v23  ;;  %7161 = vmatprep.mubr.msk.f32.mxu1 %vm7685_vm2, %v7684_v1 }
0x1b86   : > { %7155 = vmatprep.subr.mxu1 %v7684_v1 }
0x1b87   : > { %7156 = vmatpush3.msra.mxu1 %v6378_v24 }
0x1b88   : > { %7157 = vmatprep.subr.mxu1 %v7684_v1 }
0x1b89   : > { %7158 = vmatpush3.msra.mxu1 %v6377_v25 }
0x1b8a   : > { %7159 = vmatprep.subr.mxu1 %v7684_v1 }
0x1b8b   : > { %7160 = vmatpush3.msra.mxu1 %v6376_v26 }
0x1b8c   : > { %7162 = vmatmul.mubr.msk.f32.vlgmr.msra.gmra.mxu1 %vm816_vm3, %v8508_v8  ;;  %7175 = vmatprep.subr.mxu1 %v7684_v1 }
0x1b8d   : > { %7177 = vmatprep.mubr.msk.f32.mxu1 %vm7685_vm2, %v7684_v1 }
0x1c40   : > { %v3836_v28 = vpop.f32.mrf.mxu1 }
0x1c41   : > { %7135 = vmatmul.mubr.msk.f32.vlgmr.msra.gmra.mxu0 %vm1056_vm4, %v3836_v28 }
0x1c42   : > { %7143 = vmatpush3.msra.mxu0 %v6372_v27  ;;  %v7131_v30 = vpop.f32.mrf.mxu1  ;;  %7150 = vmatprep.mubr.msk.f32.mxu0 %vm7685_vm2, %v7684_v1 }
0x1c43   : > { %7144 = vmatprep.subr.mxu0 %v7684_v1  ;;  %v6408_v30 = vld [vmem:[%s9372_s6 + $0x13] ss:$0 sm:$0xff] }
0x1c44   : > { %7145 = vmatpush3.msra.mxu0 %v6371_v29  ;;  %v8700_v32 = vpop.f32.mrf.mxu1 }
0x1c45   : > { %7146 = vmatprep.subr.mxu0 %v7684_v1 }
0x1c46   : > { %7147 = vmatpush3.msra.mxu0 %v6370_v7  ;;  %v7141_v34 = vpop.f32.mrf.mxu1 }
0x1c47   : > { %7148 = vmatprep.subr.mxu0 %v7684_v1  ;;  %v6415_v34 = vld [vmem:[%s9372_s6 + $0x17] ss:$0 sm:$0xff] }
0x1c48   : > { %7149 = vmatpush3.msra.mxu0 %v6369_v33 }
0x1c49   : > { %7151 = vmatmul.mubr.msk.f32.vlgmr.msra.gmra.mxu0 %vm816_vm3, %v8508_v8  ;;  %7164 = vmatprep.subr.mxu0 %v7684_v1 }
0x1c4a   : > { %7165 = vmatpush3.msra.mxu0 %v6386_v31  ;;  %7172 = vmatprep.mubr.msk.f32.mxu0 %vm7685_vm2, %v7684_v1 }
0x1c4b   : > { %7166 = vmatprep.subr.mxu0 %v7684_v1 }
0x1c4c   : > { %v4150_v38 = vpop.f32.mrf.mxu1  ;;  %7167 = vmatpush3.msra.mxu0 %v6385_v35 }
0x1c4d   : > { %v4151_v39 = vadd.f32 %v6381_v36, %v4150_v38  ;;  %7168 = vmatprep.subr.mxu0 %v7684_v1 }
0x1c4e   : > { %v7163_v43 = vpop.f32.mrf.mxu1  ;;  %7169 = vmatpush3.msra.mxu0 %v6384_v37 }
0x1c4f   : > { %7170 = vmatprep.subr.mxu0 %v7684_v1  ;;  %7176 = vmatpush3.xpose.msk.msra.mxu1 %vm1056_vm4, %v4151_v39 }
0x1c50   : > { %7171 = vmatpush3.msra.mxu0 %v6383_v41  ;;  %7180 = vmatprep.subr.mxu1 %v7684_v1 }
0x1c51   : > { %7173 = vmatmul.mubr.msk.f32.vlgmr.msra.gmra.mxu0 %vm816_vm3, %v8508_v8  ;;  %7185 = vmatprep.subr.mxu0 %v7684_v1 }
0x1c52   : > { %7187 = vmatprep.mubr.msk.f32.mxu0 %vm7685_vm2, %v7684_v1  ;;  %7186 = vmatpush3.msra.mxu0 %v6394_v3 }
0x1c53   : > { %7201 = vmatprep.subr.mxu0 %v7684_v1 }
0x1d01   : > { %v8737_v45 = vpop.f32.mrf.mxu0 }
0x1d02   : > { %v3985_v26 = vadd.f32 %v8700_v32, %v8737_v45 }
0x1d03   : > { %v7136_v46 = vpop.f32.mrf.mxu0 }
0x1d09   : > { %v4067_v48 = vpop.f32.mrf.mxu0 }
0x1d0a   : > { %v4068_v49 = vadd.f32 %v6374_v47, %v4067_v48  ;;  %v6421_v48 = vld [vmem:[%s9373_s7 + $0x38] sm:$0xff] }
0x1d0b   : > { %v7152_v52 = vpop.f32.mrf.mxu0 }
0x1d0c   : > { %7178 = vmatmul.mubr.msk.f32.vlgmr.msra.gmra.mxu1 %vm1056_vm4, %v4068_v49 }
0x1d0d   : > { %7182 = vmatprep.mubr.msk.f32.mxu1 %vm7685_vm2, %v7684_v1 }
0x1d11   : > { %v4233_v54 = vpop.f32.mrf.mxu0 }
0x1d12   : > { %v4234_v55 = vadd.f32 %v6388_v53, %v4233_v54 }
0x1d13   : > { %v7174_v56 = vpop.f32.mrf.mxu0 }
0x1d14   : > { %7181 = vmatpush3.msk.msra.mxu1 %vm1150_vm5, %v4234_v55 }
0x1d15   : > { %7190 = vmatprep.subr.mxu1 %v7684_v1 }
0x1dcc   : > { %v4309_v57 = vpop.f32.mrf.mxu1 }
0x1dcd   : > { %v4313_v58 = vmul.f32 0.35355338, %v4309_v57 }
0x1dce   : > { %v7179_v59 = vpop.f32.mrf.mxu1 }
0x1dcf   : > { %v4314_v60 = vsel %vm1134_vm6, %v4313_v58, -inf }
0x1dd0   : > { %4315 = vmax.xlane.f32.xlu0 %v4314_v60 }
0x1e59   : > { %v4316_v61 = vpop.xlane.xlu0 %4315 }
0x1e5a   : > { %v4317_v62 = vsub.f32 %v4313_v58, %v4316_v61  ;;  %v6424_v58 = vld [vmem:[%s9320_s8 + $0x1] ss:$0 sm:$0xff] }
0x1e5c   : > { %v4318_v63 = vmul.f32 1.442695, %v4317_v62 }
0x1e5e   : > { %7546 = vpow2.f32 %v4318_v63 }
0x1e6b   : > { %v7547_v0 = vpop.eup %7546 }
0x1e6c   : > { %v4320_v2 = vsel %vm1134_vm6, %v7547_v0, 0.0 }
0x1e6d   : > { %4321 = vadd.xlane.f32.xlu1 %v4320_v2 }
0x1ef6   : > { %v4322_v4 = vpop.xlane.xlu1 %4321 }
0x1ef7   : > { %7548 = vrcp.f32 %v4322_v4 }
0x1f04   : > { %v7549_v50 = vpop.eup %7548 }
0x1f05   : > { %v4324_v5 = vmul.f32 %v7549_v50, %v7547_v0  ;;  %v6429_v50 = vld [vmem:[%s9321_s9 + $0x38] sm:$0xff] }
0x1f07   : > { %7183 = vmatmul.mubr.msk.f32.vlgmr.msra.gmra.mxu1 %vm1146_vm7, %v4324_v5  ;;  %v6427_v5 = vld [vmem:[%s9321_s9 + $0x28] sm:$0xff] }
0x1f08   : > { %7191 = vmatpush3.msra.mxu1 %v6399_v6  ;;  %7198 = vmatprep.mubr.msk.f32.mxu1 %vm7685_vm2, %v7684_v1  ;;  %v6426_v6 = vld [vmem:[%s9321_s9 + $0x20] sm:$0xff] }
0x1f09   : > { %7192 = vmatprep.subr.mxu1 %v7684_v1 }
0x1f0a   : > { %7193 = vmatpush3.msra.mxu1 %v6398_v9 }
0x1f0b   : > { %7194 = vmatprep.subr.mxu1 %v7684_v1 }
0x1f0c   : > { %7195 = vmatpush3.msra.mxu1 %v6397_v10 }
0x1f0d   : > { %7196 = vmatprep.subr.mxu1 %v7684_v1 }
0x1f0e   : > { %7197 = vmatpush3.msra.mxu1 %v6396_v11 }
0x1f0f   : > { %7199 = vmatmul.mubr.msk.f32.vlgmr.msra.gmra.mxu1 %vm816_vm3, %v8508_v8  ;;  %7212 = vmatprep.subr.mxu1 %v7684_v1 }
0x1f10   : > { %7213 = vmatpush3.msra.mxu1 %v6413_v12  ;;  %7220 = vmatprep.mubr.msk.f32.mxu1 %vm7685_vm2, %v7684_v1  ;;  %v6425_v12 = vld [vmem:[%s9371_s21 + $0x6] sm:$0x3] }
0x1f11   : > { %7214 = vmatprep.subr.mxu1 %v7684_v1 }
0x1f12   : > { %7215 = vmatpush3.msra.mxu1 %v6412_v13  ;;  %v4994_v13 = vrot.slane %v6425_v12, %v7990_v42  ;;  %v6448_v42 = vld [vmem:[%s9323_s11 + $0xf0] sm:$0xff] }
0x1f13   : > { %7216 = vmatprep.subr.mxu1 %v7684_v1 }
0x1f14   : > { %7217 = vmatpush3.msra.mxu1 %v6411_v14 }
0x1f15   : > { %7218 = vmatprep.subr.mxu1 %v7684_v1 }
0x1f16   : > { %7219 = vmatpush3.msra.mxu1 %v6410_v15 }
0x1f17   : > { %7221 = vmatmul.mubr.msk.f32.vlgmr.msra.gmra.mxu1 %vm816_vm3, %v8508_v8  ;;  %7233 = vmatprep.subr.mxu1 %v7684_v1 }
0x1f18   : > { %7235 = vmatprep.mubr.msk.f32.mxu1 %vm7685_vm2, %v7684_v1  ;;  %7234 = vmatpush3.msra.mxu1 %v6421_v48 }
0x1f19   : > { %7249 = vmatprep.subr.mxu1 %v7684_v1 }
0x1fc7   : > { %v4397_v17 = vpop.f32.mrf.mxu1 }
0x1fc8   : > { %7188 = vmatmul.mubr.msk.f32.vlgmr.msra.gmra.mxu0 %vm1056_vm4, %v4397_v17 }
0x1fc9   : > { %7202 = vmatpush3.msra.mxu0 %v6406_v16  ;;  %v7184_v19 = vpop.f32.mrf.mxu1  ;;  %7209 = vmatprep.mubr.msk.f32.mxu0 %vm7685_vm2, %v7684_v1  ;;  %v4999_v16 = vrot.slane %v6425_v12, %v7995_v44  ;;  %v6447_v44 = vld [vmem:[%s9323_s11 + $0xe8] sm:$0xff]  ;;  %v5290_v12 = vld [vmem:[%s9327_s15 + $0x10] sm:$0xff] }
0x1fca   : > { %7203 = vmatprep.subr.mxu0 %v7684_v1  ;;  %v6449_v19 = vld [vmem:[%s9323_s11 + $0xf8] sm:$0xff] }
0x1fcb   : > { %7204 = vmatpush3.msra.mxu0 %v6405_v18 }
0x1fcc   : > { %7205 = vmatprep.subr.mxu0 %v7684_v1 }
0x1fcd   : > { %7206 = vmatpush3.msra.mxu0 %v6404_v20  ;;  %v6446_v20 = vld [vmem:[%s9323_s11 + $0xe0] sm:$0xff] }
0x1fce   : > { %7207 = vmatprep.subr.mxu0 %v7684_v1 }
0x1fcf   : > { %v4556_v22 = vpop.f32.mrf.mxu1  ;;  %7208 = vmatpush3.msra.mxu0 %v6403_v21  ;;  %v6445_v21 = vld [vmem:[%s9323_s11 + $0xd8] sm:$0xff] }
0x1fd0   : > { %7210 = vmatmul.mubr.msk.f32.vlgmr.msra.gmra.mxu0 %vm816_vm3, %v8508_v8  ;;  %7223 = vmatprep.subr.mxu0 %v7684_v1  ;;  %v6401_v8 = vld [vmem:[%s9372_s6 + $0xf] ss:$0 sm:$0xff] }
0x1fd1   : > { %v7200_v23 = vpop.f32.mrf.mxu1  ;;  %7225 = vmatprep.mubr.msk.f32.mxu0 %vm7685_vm2, %v7684_v1  ;;  %v4557_v32 = vadd.f32 %v6401_v8, %v4556_v22  ;;  %v6444_v22 = vld [vmem:[%s9323_s11 + $0xd0] sm:$0xff]  ;;  %v6434_v8 = vld [vmem:[%s9323_s11 + $0x80] sm:$0xff] }
0x1fd2   : > { %v6443_v23 = vld [vmem:[%s9323_s11 + $0xc8] sm:$0xff] }
0x1fd7   : > { %v4722_v24 = vpop.f32.mrf.mxu1 }
0x1fd8   : > { %v4723_v35 = vadd.f32 %v6415_v34, %v4722_v24  ;;  %v6442_v24 = vld [vmem:[%s9323_s11 + $0xc0] sm:$0xff] }
0x1fd9   : > { %v7222_v25 = vpop.f32.mrf.mxu1 }
0x1fda   : > { %v6441_v25 = vld [vmem:[%s9323_s11 + $0xb8] sm:$0xff] }
0x2088   : > { %v4472_v27 = vpop.f32.mrf.mxu0 }
0x2089   : > { %v4476_v28 = vadd.f32 %v4472_v27, %v3985_v26  ;;  %v6440_v26 = vld [vmem:[%s9323_s11 + $0xb0] sm:$0xff]  ;;  %v6439_v27 = vld [vmem:[%s9323_s11 + $0xa8] sm:$0xff] }
0x208a   : > { %v7189_v29 = vpop.f32.mrf.mxu0 }
0x208b   : > { %v6437_v29 = vld [vmem:[%s9323_s11 + $0x98] sm:$0xff] }
0x2090   : > { %v4639_v7 = vpop.f32.mrf.mxu0 }
0x2091   : > { %v4640_v33 = vadd.f32 %v6408_v30, %v4639_v7  ;;  %v6436_v30 = vld [vmem:[%s9323_s11 + $0x90] sm:$0xff]  ;;  %v6435_v7 = vld [vmem:[%s9323_s11 + $0x88] sm:$0xff] }
0x2092   : > { %v7211_v31 = vpop.f32.mrf.mxu0 }
0x2093   : > { %7224 = vmatpush3.xpose.msk.msra.mxu0 %vm1056_vm4, %v4640_v33  ;;  %v6431_v33 = vld [vmem:[%s9322_s10 + $0x1] ss:$0 sm:$0xff] }
0x2094   : > { %7228 = vmatprep.subr.mxu0 %v7684_v1 }
0x2096   : > { %7226 = vmatmul.mubr.msk.f32.vlgmr.msra.gmra.mxu0 %vm1056_vm4, %v4557_v32 }
0x2097   : > { %7229 = vmatpush3.msk.msra.mxu0 %vm1150_vm5, %v4723_v35  ;;  %7230 = vmatprep.mubr.msk.f32.mxu0 %vm7685_vm2, %v7684_v1 }
0x2098   : > { %7238 = vmatprep.subr.mxu0 %v7684_v1 }
0x2156   : > { %v4798_v36 = vpop.f32.mrf.mxu0 }
0x2157   : > { %v4802_v37 = vmul.f32 0.35355338, %v4798_v36 }
0x2158   : > { %v7227_v38 = vpop.f32.mrf.mxu0 }
0x2159   : > { %v4803_v39 = vsel %vm1134_vm6, %v4802_v37, -inf }
0x215a   : > { %4804 = vmax.xlane.f32.xlu0 %v4803_v39 }
0x21e3   : > { %v4805_v41 = vpop.xlane.xlu0 %4804 }
0x21e4   : > { %v4806_v43 = vsub.f32 %v4802_v37, %v4805_v41 }
0x21e6   : > { %v4807_v45 = vmul.f32 1.442695, %v4806_v43  ;;  %v6451_v43 = vld [vmem:[%s9324_s12 + $0x1] ss:$0 sm:$0xff] }
0x21e8   : > { %7550 = vpow2.f32 %v4807_v45 }
0x21f5   : > { %v7551_v46 = vpop.eup %7550 }
0x21f6   : > { %v4809_v47 = vsel %vm1134_vm6, %v7551_v46, 0.0 }
0x21f7   : > { %4810 = vadd.xlane.f32.xlu1 %v4809_v47 }
0x2280   : > { %v4811_v49 = vpop.xlane.xlu1 %4810 }
0x2281   : > { %7552 = vrcp.f32 %v4811_v49 }
0x228e   : > { %v7553_v52 = vpop.eup %7552 }
0x228f   : > { %v4813_v53 = vmul.f32 %v7553_v52, %v7551_v46 }
0x2291   : > { %7231 = vmatmul.mubr.msk.f32.vlgmr.msra.gmra.mxu0 %vm1146_vm7, %v4813_v53 }
0x2292   : > { %7246 = vmatprep.mubr.msk.f32.mxu0 %vm7685_vm2, %v7684_v1  ;;  %7239 = vmatpush3.msra.mxu0 %v6429_v50 }
0x2293   : > { %7240 = vmatprep.subr.mxu0 %v7684_v1 }
0x2351   : > { %v4886_v54 = vpop.f32.mrf.mxu0 }
0x2352   : > { %7236 = vmatmul.mubr.msk.f32.vlgmr.msra.gmra.mxu1 %vm1056_vm4, %v4886_v54 }
0x2353   : > { %v7232_v55 = vpop.f32.mrf.mxu0  ;;  %7281 = vmatprep.mubr.msk.f32.mxu1 %vm7685_vm2, %v7684_v1  ;;  %7250 = vmatpush3.msra.mxu1 %v6449_v19  ;;  %v6459_v19 = vld [vmem:[%s9327_s15 + $0x68] sm:$0xff] }
0x2354   : > { %7251 = vmatprep.subr.mxu1 %v7684_v1 }
0x2355   : > { %7252 = vmatpush3.msra.mxu1 %v6448_v42  ;;  %v6458_v42 = vld [vmem:[%s9327_s15 + $0x60] sm:$0xff] }
0x2356   : > { %7253 = vmatprep.subr.mxu1 %v7684_v1 }
0x2357   : > { %7254 = vmatpush3.msra.mxu1 %v6447_v44  ;;  %v6457_v44 = vld [vmem:[%s9327_s15 + $0x58] sm:$0xff] }
0x2358   : > { %7255 = vmatprep.subr.mxu1 %v7684_v1 }
0x2359   : > { %7256 = vmatpush3.msra.mxu1 %v6446_v20  ;;  %v6456_v20 = vld [vmem:[%s9327_s15 + $0x50] sm:$0xff] }
0x235a   : > { %7257 = vmatprep.subr.mxu1 %v7684_v1 }
0x235b   : > { %7258 = vmatpush3.msra.mxu1 %v6445_v21  ;;  %v6455_v21 = vld [vmem:[%s9327_s15 + $0x48] sm:$0xff] }
0x235c   : > { %7259 = vmatprep.subr.mxu1 %v7684_v1 }
0x235d   : > { %7260 = vmatpush3.msra.mxu1 %v6444_v22  ;;  %v6454_v22 = vld [vmem:[%s9327_s15 + $0x40] sm:$0xff] }
0x235e   : > { %7261 = vmatprep.subr.mxu1 %v7684_v1 }
0x235f   : > { %7262 = vmatpush3.msra.mxu1 %v6443_v23  ;;  %v5296_v23 = vld [vmem:[%s9328_s16] sm:$0x1] }
0x2360   : > { %7263 = vmatprep.subr.mxu1 %v7684_v1 }
0x2361   : > { %7264 = vmatpush3.msra.mxu1 %v6442_v24 }
0x2362   : > { %7265 = vmatprep.subr.mxu1 %v7684_v1 }
0x2363   : > { %7266 = vmatpush3.msra.mxu1 %v6441_v25 }
0x2364   : > { %7267 = vmatprep.subr.mxu1 %v7684_v1 }
0x2365   : > { %7268 = vmatpush3.msra.mxu1 %v6440_v26 }
0x2366   : > { %7269 = vmatprep.subr.mxu1 %v7684_v1 }
0x2367   : > { %7270 = vmatpush3.msra.mxu1 %v6439_v27 }
0x2368   : > { %7271 = vmatprep.subr.mxu1 %v7684_v1 }
0x2412   : > { %v4961_v56 = vpop.f32.mrf.mxu1 }
0x2413   : > { %v4965_v57 = vadd.f32 %v4961_v56, %v4476_v28  ;;  %v6438_v28 = vld [vmem:[%s9323_s11 + $0xa0] sm:$0xff] }
0x2414   : > { %v7237_v59 = vpop.f32.mrf.mxu1  ;;  %7272 = vmatpush3.msra.mxu1 %v6438_v28 }
0x2415   : > { %v4966_v60 = vadd.f32 %v4965_v57, %v8481_v51  ;;  %v6428_v51 = vld [vmem:[%s9321_s9 + $0x30] sm:$0xff]  ;;  %7273 = vmatprep.subr.mxu1 %v7684_v1  ;;  %v5214_v57 = vld [vmem:[%s9326_s14 + $0x18] sm:$0xff]  ;;  %v5212_v59 = vld [vmem:[%s9326_s14 + $0x8] sm:$0xff] }
0x2416   : > { %7241 = vmatpush3.msra.mxu0 %v6428_v51  ;;  %7274 = vmatpush3.msra.mxu1 %v6437_v29 }
0x2417   : > { %v8856_v61 = vadd.f32 %v6424_v58, %v4966_v60  ;;  %7242 = vmatprep.subr.mxu0 %v7684_v1  ;;  %7275 = vmatprep.subr.mxu1 %v7684_v1  ;;  %v5213_v58 = vld [vmem:[%s9326_s14 + $0x10] sm:$0xff]  ;;  %v5211_v60 = vld [vmem:[%s9326_s14] sm:$0xff] }
0x2418   : > { %7243 = vmatpush3.msra.mxu0 %v6427_v5  ;;  %7276 = vmatpush3.msra.mxu1 %v6436_v30  ;;  %v5295_v5 = vld [vmem:[%s9327_s15 + $0x38] sm:$0xff] }
0x2419   : > { %v4978_v62 = vsel %vm756_vm1, %v8856_v61, 0.0  ;;  %7244 = vmatprep.subr.mxu0 %v7684_v1  ;;  %7277 = vmatprep.subr.mxu1 %v7684_v1 }
0x241a   : > { %4979 = vadd.xlane.f32.xlu0 %v4978_v62  ;;  %7245 = vmatpush3.msra.mxu0 %v6426_v6  ;;  %v5294_v6 = vld [vmem:[%s9327_s15 + $0x30] sm:$0xff] }
0x241b   : > { %7284 = vmatprep.subr.mxu0 %v7684_v1  ;;  %7278 = vmatpush3.msra.mxu1 %v6435_v7 }
0x241c   : > { %7279 = vmatprep.subr.mxu1 %v7684_v1 }
0x241d   : > { %7280 = vmatpush3.msra.mxu1 %v6434_v8 }
0x241e   : > { %7333 = vmatprep.subr.mxu1 %v7684_v1 }
0x24a3   : > { %v4980_v63 = vpop.xlane.xlu0 %4979 }
0x24a4   : > { %v4981_v0 = vmul.f32 0.03125, %v4980_v63 }
0x24a6   : > { %v4982_v2 = vsub.f32 %v8856_v61, %v4981_v0  ;;  %v5191_v0 = vld [vmem:[%s9325_s13] sm:$0x3] }
0x24a8   : > { %v4983_v3 = vmul.f32 %v4982_v2, %v4982_v2 }
0x24aa   : > { %v4984_v4 = vsel %vm756_vm1, %v4983_v3, 0.0 }
0x24ab   : > { %4985 = vadd.xlane.f32.xlu1 %v4984_v4  ;;  %v5208_v4 = vrot.slane %v5191_v0, 1 }
0x2534   : > { %v4986_v9 = vpop.xlane.xlu1 %4985 }
0x2535   : > { %v4987_v10 = vmul.f32 0.03125, %v4986_v9  ;;  %v5293_v9 = vld [vmem:[%s9327_s15 + $0x28] sm:$0xff] }
0x2537   : > { %v4988_v11 = vadd.f32 1e-05, %v4987_v10  ;;  %v5292_v10 = vld [vmem:[%s9327_s15 + $0x20] sm:$0xff] }
0x2539   : > { %7554 = vrsqrt.f32 %v4988_v11  ;;  %v5291_v11 = vld [vmem:[%s9327_s15 + $0x18] sm:$0xff] }
0x2546   : > { %v7555_v14 = vpop.eup %7554 }
0x2547   : > { %v4990_v15 = vmul.f32 %v7555_v14, %v4982_v2  ;;  %v5288_v14 = vld [vmem:[%s9327_s15] sm:$0xff] }
0x2549   : > { %v4995_v17 = vmul.f32 %v4994_v13, %v4990_v15  ;;  %v5289_v13 = vld [vmem:[%s9327_s15 + $0x8] sm:$0xff] }
0x254b   : > { %v5000_v18 = vadd.f32 %v4999_v16, %v4995_v17  ;;  %v6461_v17 = vld [vmem:[%s9327_s15 + $0x78] sm:$0xff] }
0x254d   : > { %7247 = vmatmul.mubr.msk.f32.vlgmr.msra.gmra.mxu0 %vm816_vm3, %v5000_v18  ;;  %v6460_v18 = vld [vmem:[%s9327_s15 + $0x70] sm:$0xff] }
0x254e   : > { %7292 = vmatprep.mubr.msk.f32.mxu0 %vm7685_vm2, %v7684_v1  ;;  %7285 = vmatpush3.msra.mxu0 %v5214_v57  ;;  %v6470_v57 = vld [vmem:[%s9327_s15 + $0xb0] sm:$0xff] }
0x254f   : > { %7286 = vmatprep.subr.mxu0 %v7684_v1 }
0x2550   : > { %7287 = vmatpush3.msra.mxu0 %v5213_v58  ;;  %v6469_v58 = vld [vmem:[%s9327_s15 + $0xa8] sm:$0xff] }
0x2551   : > { %7288 = vmatprep.subr.mxu0 %v7684_v1 }
0x2552   : > { %7289 = vmatpush3.msra.mxu0 %v5212_v59  ;;  %v6468_v59 = vld [vmem:[%s9327_s15 + $0xa0] sm:$0xff] }
0x2553   : > { %7290 = vmatprep.subr.mxu0 %v7684_v1 }
0x2554   : > { %7291 = vmatpush3.msra.mxu0 %v5211_v60  ;;  %v6467_v60 = vld [vmem:[%s9327_s15 + $0x98] sm:$0xff] }
0x2555   : > { %7295 = vmatprep.subr.mxu0 %v7684_v1 }
0x260d   : > { %v5083_v34 = vpop.f32.mrf.mxu0 }
0x260e   : > { %v5084_v31 = vadd.f32 %v6431_v33, %v5083_v34 }
0x260f   : > { %v7248_v32 = vpop.f32.mrf.mxu0 }
0x2610   : > { %v6433_v35 = vmul.f32 -1.702, %v5084_v31 }
0x2612   : > { %v5089_v36 = vmul.f32 1.442695, %v6433_v35 }
0x2614   : > { %7556 = vpow2.f32 %v5089_v36 }
0x2621   : > { %v7557_v37 = vpop.eup %7556 }
0x2622   : > { %v5091_v38 = vadd.f32 1.0, %v7557_v37 }
0x2624   : > { %7558 = vrcp.f32 %v5091_v38 }
0x2631   : > { %v7559_v39 = vpop.eup %7558 }
0x2632   : > { %v5094_v41 = vmul.f32 %v7559_v39, %v5084_v31 }
0x2634   : > { %7282 = vmatmul.mubr.f32.vlgmr.msra.gmra.mxu1 %v5094_v41 }
0x2635   : > { %7349 = vmatprep.mubr.msk.f32.mxu1 %vm7685_vm2, %v7684_v1 }
0x26f4   : > { %v5186_v45 = vpop.f32.mrf.mxu1 }
0x26f5   : > { %v5187_v46 = vadd.f32 %v6451_v43, %v5186_v45 }
0x26f6   : > { %v7283_v47 = vpop.f32.mrf.mxu1 }
0x26f7   : > { %v5190_v48 = vadd.f32 %v5187_v46, %v8856_v61 }
0x26f9   : > { %v5193_v49 = vsel %vm5192_vm8, %v5190_v48, 0.0 }
0x26fa   : > { %5194 = vadd.xlane.f32.xlu0 %v5193_v49 }
0x2783   : > { %v5195_v52 = vpop.xlane.xlu0 %5194 }
0x2784   : > { %v5196_v53 = vmul.f32 0.03125, %v5195_v52 }
0x2786   : > { %v5197_v54 = vsub.f32 %v5190_v48, %v5196_v53  ;;  %v7686_v48 = vmov -1.0  }
0x2788   : > { %v5198_v55 = vmul.f32 %v5197_v54, %v5197_v54 }
0x278a   : > { %v5199_v56 = vsel %vm5192_vm8, %v5198_v55, 0.0 }
0x278b   : > { %5200 = vadd.xlane.f32.xlu1 %v5199_v56  ;;  %v6471_v56 = vld [vmem:[%s9327_s15 + $0xb8] sm:$0xff] }
0x278c   : > { %7334 = vmatpush3.msra.mxu1 %v6471_v56 }
0x278d   : > { %7335 = vmatprep.subr.mxu1 %v7684_v1 }
0x278e   : > { %7336 = vmatpush3.msra.mxu1 %v6470_v57 }
0x278f   : > { %7337 = vmatprep.subr.mxu1 %v7684_v1 }
0x2790   : > { %7338 = vmatpush3.msra.mxu1 %v6469_v58 }
0x2791   : > { %7339 = vmatprep.subr.mxu1 %v7684_v1 }
0x2792   : > { %7340 = vmatpush3.msra.mxu1 %v6468_v59 }
0x2793   : > { %7341 = vmatprep.subr.mxu1 %v7684_v1 }
0x2794   : > { %7342 = vmatpush3.msra.mxu1 %v6467_v60 }
0x2795   : > { %7343 = vmatprep.subr.mxu1 %v7684_v1 }
0x2814   : > { %v5201_v61 = vpop.xlane.xlu1 %5200 }
0x2815   : > { %v5202_v62 = vmul.f32 0.03125, %v5201_v61  ;;  %v6466_v61 = vld [vmem:[%s9327_s15 + $0x90] sm:$0xff] }
0x2816   : > { %7344 = vmatpush3.msra.mxu1 %v6466_v61 }
0x2817   : > { %v5203_v63 = vadd.f32 1e-05, %v5202_v62  ;;  %7345 = vmatprep.subr.mxu1 %v7684_v1  ;;  %v6465_v62 = vld [vmem:[%s9327_s15 + $0x88] sm:$0xff] }
0x2818   : > { %7346 = vmatpush3.msra.mxu1 %v6465_v62 }
0x2819   : > { %7560 = vrsqrt.f32 %v5203_v63  ;;  %7347 = vmatprep.subr.mxu1 %v7684_v1  ;;  %v6464_v63 = vld [vmem:[%s9327_s15 + $0x80] sm:$0xff] }
0x281a   : > { %7348 = vmatpush3.msra.mxu1 %v6464_v63 }
0x281b   : > { %7371 = vmatprep.subr.mxu1 %v7684_v1 }
0x2826   : > { %v7561_v2 = vpop.eup %7560 }
0x2827   : > { %v5205_v3 = vmul.f32 %v7561_v2, %v5197_v54 }
0x2829   : > { %v5206_v50 = vmul.f32 %v5205_v3, %v5191_v0  ;;  %v6462_v0 = vld [vmem:[%s9328_s16 + $0x1] sm:$0x1] }
0x282b   : > { %v5210_v51 = vadd.f32 %v5208_v4, %v5206_v50 }
0x282d   : > { %7293 = vmatmul.mubr.msk.f32.vlgmr.msra.gmra.mxu0 %vm816_vm3, %v5210_v51 }
0x282e   : > { %7296 = vmatpush3.msra.mxu0 %v5295_v5  ;;  %7311 = vmatprep.mubr.msk.f32.mxu0 %vm7685_vm2, %v7684_v1 }
0x282f   : > { %7297 = vmatprep.subr.mxu0 %v7684_v1 }
0x2830   : > { %7298 = vmatpush3.msra.mxu0 %v5294_v6 }
0x2831   : > { %7299 = vmatprep.subr.mxu0 %v7684_v1 }
0x2832   : > { %7300 = vmatpush3.msra.mxu0 %v5293_v9 }
0x2833   : > { %7301 = vmatprep.subr.mxu0 %v7684_v1 }
0x2834   : > { %7302 = vmatpush3.msra.mxu0 %v5292_v10 }
0x2835   : > { %7303 = vmatprep.subr.mxu0 %v7684_v1 }
0x2836   : > { %7304 = vmatpush3.msra.mxu0 %v5291_v11 }
0x2837   : > { %7305 = vmatprep.subr.mxu0 %v7684_v1 }
0x2838   : > { %7306 = vmatpush3.msra.mxu0 %v5290_v12 }
0x2839   : > { %7307 = vmatprep.subr.mxu0 %v7684_v1 }
0x283a   : > { %7308 = vmatpush3.msra.mxu0 %v5289_v13 }
0x283b   : > { %7309 = vmatprep.subr.mxu0 %v7684_v1 }
0x283c   : > { %7310 = vmatpush3.msra.mxu0 %v5288_v14 }
0x283d   : > { %7314 = vmatprep.subr.mxu0 %v7684_v1 }
0x28ed   : > { %v5284_v15 = vpop.f32.mrf.mxu0 }
0x28ee   : > { %7312 = vmatmul.mubr.msk.f32.vlgmr.msra.gmra.mxu0 %vm681_vm0, %v5284_v15 }
0x28ef   : > { %v7294_v16 = vpop.f32.mrf.mxu0  ;;  %7330 = vmatprep.mubr.msk.f32.mxu0 %vm7685_vm2, %v7684_v1  ;;  %7315 = vmatpush3.msra.mxu0 %v6461_v17 }
0x28f0   : > { %7316 = vmatprep.subr.mxu0 %v7684_v1 }
0x28f1   : > { %7317 = vmatpush3.msra.mxu0 %v6460_v18 }
0x28f2   : > { %7318 = vmatprep.subr.mxu0 %v7684_v1 }
0x28f3   : > { %7319 = vmatpush3.msra.mxu0 %v6459_v19 }
0x28f4   : > { %7320 = vmatprep.subr.mxu0 %v7684_v1 }
0x28f5   : > { %7321 = vmatpush3.msra.mxu0 %v6458_v42 }
0x28f6   : > { %7322 = vmatprep.subr.mxu0 %v7684_v1 }
0x28f7   : > { %7323 = vmatpush3.msra.mxu0 %v6457_v44 }
0x28f8   : > { %7324 = vmatprep.subr.mxu0 %v7684_v1 }
0x28f9   : > { %7325 = vmatpush3.msra.mxu0 %v6456_v20 }
0x28fa   : > { %7326 = vmatprep.subr.mxu0 %v7684_v1 }
0x28fb   : > { %7327 = vmatpush3.msra.mxu0 %v6455_v21 }
0x28fc   : > { %7328 = vmatprep.subr.mxu0 %v7684_v1 }
0x28fd   : > { %7329 = vmatpush3.msra.mxu0 %v6454_v22 }
0x28fe   : > { %7352 = vmatprep.subr.mxu0 %v7684_v1 }
0x29ae   : > { %v5366_v24 = vpop.f32.mrf.mxu0 }
0x29af   : > { %v5367_v25 = vadd.f32 %v5366_v24, %v5296_v23 }
0x29b0   : > { %v7313_v26 = vpop.f32.mrf.mxu0 }
0x29b1   : > { %v5371_v27 = vmul.f32 0.70710677, %v5367_v25  ;;  %v5370_v53 = vmul.f32 0.5, %v5367_v25 }
0x29b3   : > { %v5374_v28 = vand.u32 2147483647, %v5371_v27  ;;  %vm5372_vm9 = vcmp.ge.f32.partialorder %v5371_v27, 0.0 }
0x29b4   : > { %v5373_v49 = vsel %vm5372_vm9, 1.0, %v7686_v48 }
0x29b5   : > { %v5375_v29 = vmul.f32 0.3275911, %v5374_v28  ;;  %v5388_v7 = vsub.f32 0.0, %v5374_v28 }
0x29b7   : > { %v5376_v30 = vadd.f32 1.0, %v5375_v29  ;;  %v5389_v8 = vmul.f32 %v5388_v7, %v5374_v28  ;;  %v6481_v28 = vld [vmem:[%s9327_s15 + $0xf8] sm:$0xff]  ;;  %v6480_v29 = vld [vmem:[%s9327_s15 + $0xf0] sm:$0xff]  ;;  %v6478_v7 = vld [vmem:[%s9327_s15 + $0xe0] sm:$0xff] }
0x29b9   : > { %7562 = vrcp.f32 %v5376_v30  ;;  %v5390_v31 = vmul.f32 1.442695, %v5389_v8  ;;  %v6479_v30 = vld [vmem:[%s9327_s15 + $0xe8] sm:$0xff]  ;;  %v6477_v8 = vld [vmem:[%s9327_s15 + $0xd8] sm:$0xff] }
0x29bb   : > { %7564 = vpow2.f32 %v5390_v31  ;;  %v6474_v31 = vld [vmem:[%s9327_s15 + $0xc0] sm:$0xff] }
0x29c6   : > { %v7563_v33 = vpop.eup %7562 }
0x29c7   : > { %v5379_v34 = vmul.f32 1.0614054, %v7563_v33 }
0x29c8   : > { %v7565_v45 = vpop.eup %7564 }
0x29c9   : > { %v5380_v32 = vadd.f32 -1.4531521, %v5379_v34  ;;  %v6475_v34 = vld [vmem:[%s9327_s15 + $0xc8] sm:$0xff] }
0x29cb   : > { %v5381_v35 = vmul.f32 %v7563_v33, %v5380_v32  ;;  %v6472_v32 = vld [vmem:[%s9328_s16 + $0x2] sm:$0x1] }
0x29cd   : > { %v5382_v36 = vadd.f32 1.4214138, %v5381_v35 }
0x29cf   : > { %v5383_v37 = vmul.f32 %v7563_v33, %v5382_v36 }
0x29d1   : > { %v5384_v38 = vadd.f32 -0.28449672, %v5383_v37 }
0x29d3   : > { %v5385_v39 = vmul.f32 %v7563_v33, %v5384_v38 }
0x29d5   : > { %v5386_v41 = vadd.f32 0.2548296, %v5385_v39 }
0x29d7   : > { %v5387_v43 = vmul.f32 %v7563_v33, %v5386_v41  ;;  %v6476_v33 = vld [vmem:[%s9327_s15 + $0xd0] sm:$0xff] }
0x29d9   : > { %v5392_v46 = vmul.f32 %v7565_v45, %v5387_v43 }
0x29db   : > { %v5393_v47 = vsub.f32 1.0, %v5392_v46 }
0x29dd   : > { %v5394_v52 = vmul.f32 %v5393_v47, %v5373_v49 }
0x29df   : > { %v5395_v54 = vadd.f32 1.0, %v5394_v52 }
0x29e1   : > { %v5396_v55 = vmul.f32 %v5395_v54, %v5370_v53 }
0x29e3   : > { %7331 = vmatmul.mubr.msk.f32.vlgmr.msra.gmra.mxu0 %vm681_vm0, %v5396_v55 }
0x29e4   : > { %7368 = vmatprep.mubr.msk.f32.mxu0 %vm7685_vm2, %v7684_v1  ;;  %7353 = vmatpush3.msra.mxu0 %v6481_v28 }
0x29e5   : > { %7354 = vmatprep.subr.mxu0 %v7684_v1 }
0x29e6   : > { %7355 = vmatpush3.msra.mxu0 %v6480_v29 }
0x29e7   : > { %7356 = vmatprep.subr.mxu0 %v7684_v1 }
0x29e8   : > { %7357 = vmatpush3.msra.mxu0 %v6479_v30 }
0x29e9   : > { %7358 = vmatprep.subr.mxu0 %v7684_v1 }
0x29ea   : > { %7359 = vmatpush3.msra.mxu0 %v6478_v7 }
0x29eb   : > { %7360 = vmatprep.subr.mxu0 %v7684_v1 }
0x29ec   : > { %7361 = vmatpush3.msra.mxu0 %v6477_v8 }
0x29ed   : > { %7362 = vmatprep.subr.mxu0 %v7684_v1 }
0x29ee   : > { %7363 = vmatpush3.msra.mxu0 %v6476_v33 }
0x29ef   : > { %7364 = vmatprep.subr.mxu0 %v7684_v1 }
0x29f0   : > { %7365 = vmatpush3.msra.mxu0 %v6475_v34 }
0x29f1   : > { %7366 = vmatprep.subr.mxu0 %v7684_v1 }
0x29f2   : > { %7367 = vmatpush3.msra.mxu0 %v6474_v31 }
0x29f3   : > { %7390 = vmatprep.subr.mxu0 %v7684_v1 }
0x2aa3   : > { %v5477_v2 = vpop.f32.mrf.mxu0 }
0x2aa4   : > { %v5478_v3 = vadd.f32 %v6462_v0, %v5477_v2 }
0x2aa5   : > { %v7332_v4 = vpop.f32.mrf.mxu0 }
0x2aa6   : > { %v5482_v50 = vmul.f32 0.70710677, %v5478_v3  ;;  %v5481_v25 = vmul.f32 0.5, %v5478_v3 }
0x2aa8   : > { %v5485_v51 = vand.u32 2147483647, %v5482_v50  ;;  %vm5483_vm10 = vcmp.ge.f32.partialorder %v5482_v50, 0.0 }
0x2aa9   : > { %v5484_v23 = vsel %vm5483_vm10, 1.0, %v7686_v48 }
0x2aaa   : > { %v5486_v5 = vmul.f32 0.3275911, %v5485_v51  ;;  %v5499_v9 = vsub.f32 0.0, %v5485_v51 }
0x2aac   : > { %v5487_v6 = vadd.f32 1.0, %v5486_v5  ;;  %v5500_v10 = vmul.f32 %v5499_v9, %v5485_v51  ;;  %v6491_v51 = vld [vmem:[%s9327_s15 + $0x138] sm:$0xff]  ;;  %v6490_v5 = vld [vmem:[%s9327_s15 + $0x130] sm:$0xff]  ;;  %v6488_v9 = vld [vmem:[%s9327_s15 + $0x120] sm:$0xff] }
0x2aae   : > { %7566 = vrcp.f32 %v5487_v6  ;;  %v5501_v13 = vmul.f32 1.442695, %v5500_v10  ;;  %v6489_v6 = vld [vmem:[%s9327_s15 + $0x128] sm:$0xff]  ;;  %v6487_v10 = vld [vmem:[%s9327_s15 + $0x118] sm:$0xff] }
0x2ab0   : > { %7568 = vpow2.f32 %v5501_v13  ;;  %v6484_v13 = vld [vmem:[%s9327_s15 + $0x100] sm:$0xff] }
0x2abb   : > { %v7567_v11 = vpop.eup %7566 }
0x2abc   : > { %v5490_v12 = vmul.f32 1.0614054, %v7567_v11 }
0x2abd   : > { %v7569_v20 = vpop.eup %7568 }
0x2abe   : > { %v5491_v14 = vadd.f32 -1.4531521, %v5490_v12  ;;  %v6485_v12 = vld [vmem:[%s9327_s15 + $0x108] sm:$0xff] }
0x2ac0   : > { %v5492_v15 = vmul.f32 %v7567_v11, %v5491_v14  ;;  %v6482_v14 = vld [vmem:[%s9328_s16 + $0x3] sm:$0x1] }
0x2ac2   : > { %v5493_v16 = vadd.f32 1.4214138, %v5492_v15 }
0x2ac4   : > { %v5494_v17 = vmul.f32 %v7567_v11, %v5493_v16 }
0x2ac6   : > { %v5495_v18 = vadd.f32 -0.28449672, %v5494_v17 }
0x2ac8   : > { %v5496_v19 = vmul.f32 %v7567_v11, %v5495_v18 }
0x2aca   : > { %v5497_v42 = vadd.f32 0.2548296, %v5496_v19 }
0x2acc   : > { %v5498_v44 = vmul.f32 %v7567_v11, %v5497_v42  ;;  %v6486_v11 = vld [vmem:[%s9327_s15 + $0x110] sm:$0xff] }
0x2ace   : > { %v5503_v21 = vmul.f32 %v7569_v20, %v5498_v44 }
0x2ad0   : > { %v5504_v22 = vsub.f32 1.0, %v5503_v21 }
0x2ad2   : > { %v5505_v24 = vmul.f32 %v5504_v22, %v5484_v23 }
0x2ad4   : > { %v5506_v26 = vadd.f32 1.0, %v5505_v24 }
0x2ad6   : > { %v5507_v27 = vmul.f32 %v5506_v26, %v5481_v25 }
0x2ad8   : > { %7350 = vmatmul.mubr.msk.f32.vlgmr.msra.gmra.mxu1 %vm681_vm0, %v5507_v27 }
0x2ad9   : > { %7387 = vmatprep.mubr.msk.f32.mxu1 %vm7685_vm2, %v7684_v1  ;;  %7372 = vmatpush3.msra.mxu1 %v6491_v51 }
0x2ada   : > { %7373 = vmatprep.subr.mxu1 %v7684_v1 }
0x2adb   : > { %7374 = vmatpush3.msra.mxu1 %v6490_v5  ;;  %v6511_v5 = vld [vmem:[%s9329_s17 + $0xb8] sm:$0xff] }
0x2adc   : > { %7375 = vmatprep.subr.mxu1 %v7684_v1 }
0x2add   : > { %7376 = vmatpush3.msra.mxu1 %v6489_v6  ;;  %v6510_v6 = vld [vmem:[%s9329_s17 + $0xb0] sm:$0xff] }
0x2ade   : > { %7377 = vmatprep.subr.mxu1 %v7684_v1 }
0x2adf   : > { %7378 = vmatpush3.msra.mxu1 %v6488_v9  ;;  %v6509_v9 = vld [vmem:[%s9329_s17 + $0xa8] sm:$0xff] }
0x2ae0   : > { %7379 = vmatprep.subr.mxu1 %v7684_v1 }
0x2ae1   : > { %7380 = vmatpush3.msra.mxu1 %v6487_v10  ;;  %v6508_v10 = vld [vmem:[%s9329_s17 + $0xa0] sm:$0xff] }
0x2ae2   : > { %7381 = vmatprep.subr.mxu1 %v7684_v1 }
0x2ae3   : > { %7382 = vmatpush3.msra.mxu1 %v6486_v11  ;;  %v6507_v11 = vld [vmem:[%s9329_s17 + $0x98] sm:$0xff] }
0x2ae4   : > { %7383 = vmatprep.subr.mxu1 %v7684_v1 }
0x2ae5   : > { %7384 = vmatpush3.msra.mxu1 %v6485_v12  ;;  %v6506_v12 = vld [vmem:[%s9329_s17 + $0x90] sm:$0xff] }
0x2ae6   : > { %7385 = vmatprep.subr.mxu1 %v7684_v1 }
0x2ae7   : > { %7386 = vmatpush3.msra.mxu1 %v6484_v13  ;;  %v6505_v13 = vld [vmem:[%s9329_s17 + $0x88] sm:$0xff] }
0x2ae8   : > { %7409 = vmatprep.subr.mxu1 %v7684_v1 }
0x2b98   : > { %v5588_v35 = vpop.f32.mrf.mxu1 }
0x2b99   : > { %v5589_v36 = vadd.f32 %v6472_v32, %v5588_v35 }
0x2b9a   : > { %v7351_v37 = vpop.f32.mrf.mxu1 }
0x2b9b   : > { %v5593_v38 = vmul.f32 0.70710677, %v5589_v36  ;;  %v5592_v3 = vmul.f32 0.5, %v5589_v36 }
0x2b9d   : > { %v5596_v39 = vand.u32 2147483647, %v5593_v38  ;;  %vm5594_vm11 = vcmp.ge.f32.partialorder %v5593_v38, 0.0 }
0x2b9e   : > { %v5595_v0 = vsel %vm5594_vm11, 1.0, %v7686_v48 }
0x2b9f   : > { %v5597_v41 = vmul.f32 0.3275911, %v5596_v39  ;;  %v5610_v45 = vsub.f32 0.0, %v5596_v39 }
0x2ba1   : > { %v5598_v43 = vadd.f32 1.0, %v5597_v41  ;;  %v5611_v46 = vmul.f32 %v5610_v45, %v5596_v39  ;;  %v6492_v39 = vld [vmem:[%s9328_s16 + $0x4] sm:$0x1] }
0x2ba3   : > { %7570 = vrcp.f32 %v5598_v43  ;;  %v5612_v52 = vmul.f32 1.442695, %v5611_v46 }
0x2ba5   : > { %7572 = vpow2.f32 %v5612_v52  ;;  %v5828_v52 = vld [vmem:[%s9329_s17 + $0x30] sm:$0xff] }
0x2bb0   : > { %v7571_v47 = vpop.eup %7570 }
0x2bb1   : > { %v5601_v49 = vmul.f32 1.0614054, %v7571_v47 }
0x2bb2   : > { %v7573_v61 = vpop.eup %7572 }
0x2bb3   : > { %v5602_v53 = vadd.f32 -1.4531521, %v5601_v49  ;;  %v6502_v49 = vld [vmem:[%s9329_s17 + $0x78] sm:$0xff] }
0x2bb5   : > { %v5603_v54 = vmul.f32 %v7571_v47, %v5602_v53  ;;  %v6501_v53 = vld [vmem:[%s9329_s17 + $0x70] sm:$0xff] }
0x2bb7   : > { %v5604_v55 = vadd.f32 1.4214138, %v5603_v54  ;;  %v5827_v54 = vld [vmem:[%s9329_s17 + $0x28] sm:$0xff] }
0x2bb9   : > { %v5605_v56 = vmul.f32 %v7571_v47, %v5604_v55  ;;  %v6500_v55 = vld [vmem:[%s9329_s17 + $0x68] sm:$0xff] }
0x2bbb   : > { %v5606_v57 = vadd.f32 -0.28449672, %v5605_v56  ;;  %v5826_v56 = vld [vmem:[%s9329_s17 + $0x20] sm:$0xff] }
0x2bbd   : > { %v5607_v58 = vmul.f32 %v7571_v47, %v5606_v57  ;;  %v6499_v57 = vld [vmem:[%s9329_s17 + $0x60] sm:$0xff] }
0x2bbf   : > { %v5608_v59 = vadd.f32 0.2548296, %v5607_v58  ;;  %v5825_v58 = vld [vmem:[%s9329_s17 + $0x18] sm:$0xff] }
0x2bc1   : > { %v5609_v60 = vmul.f32 %v7571_v47, %v5608_v59  ;;  %v6498_v59 = vld [vmem:[%s9329_s17 + $0x58] sm:$0xff] }
0x2bc3   : > { %v5614_v62 = vmul.f32 %v7573_v61, %v5609_v60  ;;  %v5824_v60 = vld [vmem:[%s9329_s17 + $0x10] sm:$0xff] }
0x2bc4   : > { %v6497_v61 = vld [vmem:[%s9329_s17 + $0x50] sm:$0xff] }
0x2bc5   : > { %v5615_v63 = vsub.f32 1.0, %v5614_v62  ;;  %v5823_v62 = vld [vmem:[%s9329_s17 + $0x8] sm:$0xff] }
0x2bc7   : > { %v5616_v2 = vmul.f32 %v5615_v63, %v5595_v0  ;;  %v6496_v63 = vld [vmem:[%s9329_s17 + $0x48] sm:$0xff]  ;;  %v5822_v0 = vld [vmem:[%s9329_s17] sm:$0xff] }
0x2bc9   : > { %v5617_v4 = vadd.f32 1.0, %v5616_v2  ;;  %v6495_v2 = vld [vmem:[%s9329_s17 + $0x40] sm:$0xff] }
0x2bcb   : > { %v5618_v50 = vmul.f32 %v5617_v4, %v5592_v3 }
0x2bcd   : > { %7369 = vmatmul.mubr.msk.f32.vlgmr.msra.gmra.mxu0 %vm681_vm0, %v5618_v50 }
0x2bce   : > { %7406 = vmatprep.mubr.msk.f32.mxu0 %vm7685_vm2, %v7684_v1 }
0x2c8d   : > { %v5699_v15 = vpop.f32.mrf.mxu0 }
0x2c8e   : > { %v5700_v16 = vadd.f32 %v6482_v14, %v5699_v15  ;;  %v6504_v14 = vld [vmem:[%s9329_s17 + $0x80] sm:$0xff] }
0x2c8f   : > { %v7370_v17 = vpop.f32.mrf.mxu0 }
0x2c90   : > { %v5704_v18 = vmul.f32 0.70710677, %v5700_v16  ;;  %v5703_v36 = vmul.f32 0.5, %v5700_v16 }
0x2c92   : > { %v5707_v19 = vand.u32 2147483647, %v5704_v18  ;;  %vm5705_vm12 = vcmp.ge.f32.partialorder %v5704_v18, 0.0 }
0x2c93   : > { %v5706_v32 = vsel %vm5705_vm12, 1.0, %v7686_v48  ;;  %v5829_v48 = vld [vmem:[%s9329_s17 + $0x38] sm:$0xff] }
0x2c94   : > { %v5708_v42 = vmul.f32 0.3275911, %v5707_v19  ;;  %v5721_v20 = vsub.f32 0.0, %v5707_v19  ;;  %7391 = vmatpush3.msra.mxu0 %v5829_v48 }
0x2c95   : > { %7392 = vmatprep.subr.mxu0 %v7684_v1 }
0x2c96   : > { %v5709_v44 = vadd.f32 1.0, %v5708_v42  ;;  %v5722_v21 = vmul.f32 %v5721_v20, %v5707_v19  ;;  %7393 = vmatpush3.msra.mxu0 %v5828_v52 }
0x2c97   : > { %7394 = vmatprep.subr.mxu0 %v7684_v1 }
0x2c98   : > { %7574 = vrcp.f32 %v5709_v44  ;;  %v5723_v24 = vmul.f32 1.442695, %v5722_v21  ;;  %7395 = vmatpush3.msra.mxu0 %v5827_v54 }
0x2c99   : > { %7396 = vmatprep.subr.mxu0 %v7684_v1 }
0x2c9a   : > { %7576 = vpow2.f32 %v5723_v24  ;;  %7397 = vmatpush3.msra.mxu0 %v5826_v56  ;;  %v6073_v24 = vand.u32 127, %v771_v40  ;;  %v6093_v40 = vstv %s6068_s0  ;;  %s7687_s0 = smov [#allocation7]  }
0x2c9b   : > { %7398 = vmatprep.subr.mxu0 %v7684_v1  ;;  %s7616_s6 = sshll.u32 %s7687_s0, 4  ;;  %s7617_s6 = int_to_ptr.vmem [resolvable:$false] %s7616_s6 }
0x2c9c   : > { %7399 = vmatpush3.msra.mxu0 %v5825_v58  ;;  %p7619_p8 = scmp.lt.s32.totalorder %s6119_s23, %s7617_s6 }
0x2c9d   : > { %7400 = vmatprep.subr.mxu0 %v7684_v1 }
0x2c9e   : > { %7401 = vmatpush3.msra.mxu0 %v5824_v60 }
0x2c9f   : > { %7402 = vmatprep.subr.mxu0 %v7684_v1 }
0x2ca0   : > { %7403 = vmatpush3.msra.mxu0 %v5823_v62 }
0x2ca1   : > { %7404 = vmatprep.subr.mxu0 %v7684_v1 }
0x2ca2   : > { %7405 = vmatpush3.msra.mxu0 %v5822_v0 }
0x2ca3   : > { %7428 = vmatprep.subr.mxu0 %v7684_v1 }
0x2ca5   : > { %v7575_v22 = vpop.eup %7574 }
0x2ca6   : > { %v5712_v23 = vmul.f32 1.0614054, %v7575_v22 }
0x2ca7   : > { %v7577_v33 = vpop.eup %7576 }
0x2ca8   : > { %v5713_v25 = vadd.f32 -1.4531521, %v5712_v23 }
0x2caa   : > { %v5714_v26 = vmul.f32 %v7575_v22, %v5713_v25  ;;  %v6074_v25 = vstv %s6071_s18  ;;  %s6515_s18 = sshll.u32 %s7814_s2, 4  ;;  %s7618_s2 = scalar_lea.vmem %s7617_s6, 32 }
0x2cab   : > { %vm6075_vm14 = vcmp.eq.s32.totalorder %v6073_v24, %v6074_v25 }
0x2cac   : > { %v5715_v27 = vadd.f32 1.4214138, %v5714_v26 }
0x2cae   : > { %v5716_v28 = vmul.f32 %v7575_v22, %v5715_v27 }
0x2cb0   : > { %v5717_v29 = vadd.f32 -0.28449672, %v5716_v28 }
0x2cb2   : > { %v5718_v30 = vmul.f32 %v7575_v22, %v5717_v29  ;;  %v6088_v29 = vstv %s6064_s19 }
0x2cb4   : > { %v5719_v7 = vadd.f32 0.2548296, %v5718_v30  ;;  %v6090_v30 = vstv %s6066_s30  ;;  %s6116_s30 = scalar_lea.hbm %s9332_s20, %s6515_s18 }
0x2cb6   : > { %v5720_v8 = vmul.f32 %v7575_v22, %v5719_v7 }
0x2cb8   : > { %v5725_v34 = vmul.f32 %v7577_v33, %v5720_v8  ;;  %v6514_v8 = vsel %vm6075_vm14, 1.0, %v7684_v1 }
0x2cba   : > { %v5726_v31 = vsub.f32 1.0, %v5725_v34  ;;  %v6095_v34 = vstv %s6070_s5  ;;  %s7612_s5 = scalar_lea.vmem %s6119_s23, 16 }
0x2cbb   : > { %p7613_p10 = scmp.ne.s32.totalorder %s6119_s23, %s7612_s5  ;;  %p7620_p11 = scmp.lt.s32.totalorder %s7618_s2, %s7612_s5 }
0x2cbc   : > { %v5727_v35 = vmul.f32 %v5726_v31, %v5706_v32 }
0x2cbd   : > { %p7614_p0 = pnand %p7613_p10, %p9374_p12  ;;  %p7621_p13 = por %p7620_p11, %p7619_p8 }
0x2cbe   : > { %v5728_v37 = vadd.f32 1.0, %v5727_v35  ;;  %v6099_v35 = vsub.f32 1.0, %v6514_v8 }
0x2cbf   : > { %p7615_p7 = pneg %p7614_p0 }
0x2cc0   : > { %v5729_v38 = vmul.f32 %v5728_v37, %v5703_v36 }
0x2cc1   : > { %p7622_p1 = pnand %p7621_p13, %p7615_p7 }
0x2cc2   : > { %7388 = vmatmul.mubr.msk.f32.vlgmr.msra.gmra.mxu1 %vm681_vm0, %v5729_v38 }
0x2cc3   : > { %7425 = vmatprep.mubr.msk.f32.mxu1 %vm7685_vm2, %v7684_v1  ;;  %7410 = vmatpush3.msra.mxu1 %v6502_v49 }
0x2cc4   : > { %7411 = vmatprep.subr.mxu1 %v7684_v1 }
0x2cc5   : > { %7412 = vmatpush3.msra.mxu1 %v6501_v53 }
0x2cc6   : > { %7413 = vmatprep.subr.mxu1 %v7684_v1 }
0x2cc7   : > { %7414 = vmatpush3.msra.mxu1 %v6500_v55 }
0x2cc8   : > { %7415 = vmatprep.subr.mxu1 %v7684_v1 }
0x2cc9   : > { %7416 = vmatpush3.msra.mxu1 %v6499_v57 }
0x2cca   : > { %7417 = vmatprep.subr.mxu1 %v7684_v1 }
0x2ccb   : > { %7418 = vmatpush3.msra.mxu1 %v6498_v59 }
0x2ccc   : > { %7419 = vmatprep.subr.mxu1 %v7684_v1 }
0x2ccd   : > { %7420 = vmatpush3.msra.mxu1 %v6497_v61 }
0x2cce   : > { %7421 = vmatprep.subr.mxu1 %v7684_v1 }
0x2ccf   : > { %7422 = vmatpush3.msra.mxu1 %v6496_v63 }
0x2cd0   : > { %7423 = vmatprep.subr.mxu1 %v7684_v1 }
0x2cd1   : > { %7424 = vmatpush3.msra.mxu1 %v6495_v2 }
0x2d82   : > { %v5810_v41 = vpop.f32.mrf.mxu1 }
0x2d83   : > { %v5811_v43 = vadd.f32 %v6492_v39, %v5810_v41 }
0x2d84   : > { %v7389_v45 = vpop.f32.mrf.mxu1 }
0x2d85   : > { %v5814_v46 = vmul.f32 %v5811_v43, %v5811_v43 }
0x2d87   : > { %v5816_v47 = vsel %vm5815_vm13, %v5814_v46, 0.0 }
0x2d88   : > { %5817 = vadd.xlane.f32.xlu0 %v5816_v47 }
0x2e11   : > { %v5818_v3 = vpop.xlane.xlu0 %5817 }
0x2e12   : > { %v5819_v4 = vmax.f32 %v5818_v3, 1e-24 }
0x2e14   : > { %7578 = vrsqrt.f32 %v5819_v4 }
0x2e21   : > { %v7579_v50 = vpop.eup %7578 }
0x2e22   : > { %v5821_v51 = vmul.f32 %v7579_v50, %v5811_v43 }
0x2e24   : > { %7407 = vmatmul.mubr.msk.f32.vlgmr.msra.gmra.mxu0 %vm681_vm0, %v5821_v51  ;;  %7426 = vmatmul.mubr.msk.f32.vlgmr.msra.gmra.mxu1 %vm681_vm0, %v5821_v51 }
0x2e25   : > { %7429 = vmatpush3.msra.mxu0 %v6511_v5  ;;  %7444 = vmatprep.mubr.msk.f32.mxu0 %vm7685_vm2, %v7684_v1  ;;  %vm6103_vm2 = vcmask 122880  }
0x2e26   : > { %7430 = vmatprep.subr.mxu0 %v7684_v1 }
0x2e27   : > { %7431 = vmatpush3.msra.mxu0 %v6510_v6 }
0x2e28   : > { %7432 = vmatprep.subr.mxu0 %v7684_v1 }
0x2e29   : > { %7433 = vmatpush3.msra.mxu0 %v6509_v9 }
0x2e2a   : > { %7434 = vmatprep.subr.mxu0 %v7684_v1 }
0x2e2b   : > { %7435 = vmatpush3.msra.mxu0 %v6508_v10 }
0x2e2c   : > { %7436 = vmatprep.subr.mxu0 %v7684_v1 }
0x2e2d   : > { %7437 = vmatpush3.msra.mxu0 %v6507_v11 }
0x2e2e   : > { %7438 = vmatprep.subr.mxu0 %v7684_v1 }
0x2e2f   : > { %7439 = vmatpush3.msra.mxu0 %v6506_v12 }
0x2e30   : > { %7440 = vmatprep.subr.mxu0 %v7684_v1 }
0x2e31   : > { %7441 = vmatpush3.msra.mxu0 %v6505_v13 }
0x2e32   : > { %7442 = vmatprep.subr.mxu0 %v7684_v1 }
0x2e33   : > { %7443 = vmatpush3.msra.mxu0 %v6504_v14 }
0x2e34   : > { %7445 = vmatmul.mubr.msk.f32.vlgmr.msra.gmra.mxu0 %vm681_vm0, %v5821_v51 }
0x2ee4   : > { %v5899_v15 = vpop.f32.mrf.mxu0  ;;  %v5978_v16 = vpop.f32.mrf.mxu1 }
0x2ee5   : > { %v5982_v19 = vmax.f32 %v5899_v15, %v5978_v16 }
0x2ee6   : > { %v7408_v17 = vpop.f32.mrf.mxu0  ;;  %v7427_v18 = vpop.f32.mrf.mxu1 }
0x2ef4   : > { %v6058_v42 = vpop.f32.mrf.mxu0 }
0x2ef5   : > { %v6062_v44 = vmax.f32 %v5982_v19, %v6058_v42 }
0x2ef6   : > { %v7446_v20 = vpop.f32.mrf.mxu0 }
0x2ef7   : > { %v6078_v21 = vmul.f32 %v6062_v44, %v6062_v44  ;;  %v6089_v31 = vmul.f32 %v6088_v29, %v6062_v44  ;;  %v6096_v37 = vsub.f32 %v6062_v44, %v6095_v34  ;;  %vm6094_vm1 = vcmp.gt.f32.partialorder %v6062_v44, %v6093_v40 }
0x2ef8   : > { %v6100_v41 = vmul.f32 %v6099_v35, %v6062_v44 }
0x2ef9   : > { %v6079_v22 = vsub.f32 1.0, %v6078_v21 }
0x2efb   : > { %v6080_v23 = vmax.f32 %v6079_v22, 0.0 }
0x2efd   : > { %7580 = vrsqrt.f32 %v6080_v23  ;;  %vm6083_vm15 = vcmp.eq.f32.partialorder %v6080_v23, inf  ;;  %v6086_v28 = vand.u32 2147483648, %v6080_v23  ;;  %vm6085_vm0 = vcmp.eq.f32.partialorder %v6080_v23, 0.0 }
0x2f0a   : > { %v7581_v26 = vpop.eup %7580 }
0x2f0b   : > { %v6082_v27 = vmul.f32 %v7581_v26, %v6080_v23 }
0x2f0d   : > { %v6084_v7 = vsel %vm6083_vm15, %v6080_v23, %v6082_v27 }
0x2f0e   : > { %v6087_v33 = vsel %vm6085_vm0, %v6086_v28, %v6084_v7 }
0x2f0f   : > { %v6091_v32 = vmul.f32 %v6090_v30, %v6087_v33 }
0x2f11   : > { %v6092_v36 = vsub.f32 %v6089_v31, %v6091_v32 }
0x2f13   : > { %v6097_v38 = vsel %vm6094_vm1, %v6092_v36, %v6096_v37 }
0x2f14   : > { %v6098_v39 = vmul.f32 %v6514_v8, %v6097_v38 }
0x2f16   : > { %v6101_v43 = vadd.f32 %v6100_v41, %v6098_v39 }
0x2f18   : > { %v6102_v1 = vmul.f32 45.0, %v6101_v43 }
0x2f1a   : > { %6104 = vst.msk [vmem:[%s648_s3] sm:$0x1] %vm6103_vm2, %v6102_v1 }
0x2f1b   : > { %7625 = shalt.err (!%p7622_p1)
}
0x2f1c   : > { %s7626_s7 = scalar_lea.hbm %s6116_s30, 16  ;;  %s7630_s3 = scalar_lea.hbm %s9332_s20, 32 }
0x2f1d   : > { %p7627_p2 = scmp.ne.s32.totalorder %s6116_s30, %s7626_s7  ;;  %p7631_p9 = scmp.lt.s32.totalorder %s6116_s30, %s9332_s20 }
0x2f1e   : > { %p7632_p5 = scmp.lt.s32.totalorder %s7630_s3, %s7626_s7 }
0x2f1f   : > { %p7628_p3 = pnand %p7627_p2, %p9374_p12 }
0x2f20   : > { %p7633_p6 = por %p7632_p5, %p7631_p9 }
0x2f21   : > { %p7629_p4 = pneg %p7628_p3 }
0x2f23   : > { %p7634_p10 = pnand %p7633_p6, %p7629_p4 }
0x2f25   : > { %7637 = shalt.err (!%p7634_p10)
}
0x2f26   : > { %7455 = dma.vmem_to_hbm [thread:$0]  (%p9374_p12), %s6119_s23, 16, %s6116_s30, %s6106_s26  }
0x2f27 PF: > { %p7472_p0 = scmp.ge.s32.totalorder %s7680_s24, 2  ;;  %s6130_s6 = sand.u32 1, %s7668_s1  }
0x2f28   : > { %p9375_p7 = scmp.ne.s32.totalorder %s9355_s29, 0  ;;  %s6131_s5 = scalar_lea.sflag [#allocation3], %s6130_s6 }
0x2f2a   : > { %p7465_p8 = pnand %p7472_p0, %p9375_p7 }
0x2f2c   : > { %p7466_p11 = pneg %p7465_p8 }
0x2f2e   : > { %7663 = dma.done.wait (%p7466_p11), %s6131_s5, 16  }
0x2f2f   : > { %7665 = vsyncadd (%p7466_p11), %s6131_s5, 4294967280  ;;  %s9376_s24 = sld [smem:[#allocation12_spill]]  ;;  %s9379_s1 = smov %s7672_s22 }
0x2f30   : > { %s9377_s7 = sld [smem:[#allocation11_spill]] }
0x2f31   : > { %s9378_s23 = sld [smem:[#allocation13_spill]] }
0x2f35   : > { %p32_p13 = scmp.ge.s32.totalorder %s9376_s24, 4  }
0x2f36   : > { %s9380_s22 = smov %s9377_s7 }
0x2f37   :  { %34 = sbr.rel (!%p32_p13) target bundleno = 16 (0x10), region = 215 }
0x2f3c   :  { %6135 = vsyncpa [#allocation3], 1 }
0x2f3d   :  { %6137 = vsyncpa [#allocation3 + $0x1], 1 }
0x2f3e   :  { %6138 = vsyncpa [#allocation4], 1 }
0x2f3f   :  { %6140 = vsyncpa [#allocation4 + $0x1], 1 }
0x2f40   :  { %6141 = vsyncpa [#allocation6], 1 }

</bundles_post_ra>
